<compile_context>
chip_gen: v7x
topology: tpu7x:2x2x1
jax: 0.10.0
libtpu: 0.0.40
codegen_flags: <defaults>
</compile_context>

<pallas_src>
import jax
import jax.numpy as jnp
from jax.experimental import pallas as pl
from jax.experimental.pallas import tpu as pltpu


def _round_up(n, m):
    return (n + m - 1) // m * m


def _discriminator_kernel(
    x_ref,
    w1_ref, b1_ref,
    w2_ref, b2_ref,
    w3_ref, b3_ref,
    w4_ref, b4_ref,
    w5_ref, b5_ref,
    o_ref,
):
    """Fused 5-layer MLP forward for one (TM, K) batch tile. bf16 in / f32 accum."""

    def layer(h_bf16, w_ref, b_ref):
        acc = jnp.dot(h_bf16, w_ref[...], preferred_element_type=jnp.float32)
        acc = acc + b_ref[...]                               # f32 bias add
        return jnp.maximum(acc, 0.0).astype(jnp.bfloat16)    # ReLU + one downcast

    h = x_ref[...]                                           # bf16 (TM, K_pad)
    h = layer(h, w1_ref, b1_ref)
    h = layer(h, w2_ref, b2_ref)
    h = layer(h, w3_ref, b3_ref)
    h = layer(h, w4_ref, b4_ref)

    logits = jnp.dot(h, w5_ref[...], preferred_element_type=jnp.float32) + b5_ref[...]
    # sigmoid(x) = 1 / (1 + exp(-x)): exp and approx reciprocal both on the EUP.
    e = jnp.exp(-logits)
    o_ref[...] = pl.reciprocal(1.0 + e, approx=True).astype(o_ref.dtype)


def discriminator_forward(x, params, *, block_batch=256):
    """x: (B, input_size) float32. params: list of (W, b) with W (in, out), b (out,)."""
    B, K = x.shape
    out_size = params[-1][0].shape[1]

    # --- batch tiling (TM multiple of 8; pad batch to a whole number of tiles) ----
    if B <= block_batch:
        tm = max(8, _round_up(B, 8))
        b_pad = tm
    else:
        tm = block_batch
        b_pad = _round_up(B, tm)

    # --- pad the contraction dim of the first matmul to a lane multiple ----------
    k_pad = _round_up(K, 128)

    x_bf = x.astype(jnp.bfloat16)
    if (b_pad, k_pad) != (B, K):
        x_bf = jnp.pad(x_bf, ((0, b_pad - B), (0, k_pad - K)))

    # --- pack weights (bf16) and biases (f32 rows) --------------------------------
    flat_inputs = [x_bf]
    in_specs = [pl.BlockSpec((tm, k_pad), lambda i: (i, 0))]
    for layer_idx, (w, b) in enumerate(params):
        w_bf = w.astype(jnp.bfloat16)
        if layer_idx == 0 and k_pad != K:
            w_bf = jnp.pad(w_bf, ((0, k_pad - K), (0, 0)))   # zero rows: no-op on result
        b_row = b.astype(jnp.float32).reshape(1, -1)
        flat_inputs.append(w_bf)
        in_specs.append(pl.BlockSpec(w_bf.shape, lambda i: (0, 0)))  # constant block
        flat_inputs.append(b_row)
        in_specs.append(pl.BlockSpec(b_row.shape, lambda i: (0, 0)))

    out_shape = jax.ShapeDtypeStruct((b_pad, out_size), x.dtype)
    out_spec = pl.BlockSpec((tm, out_size), lambda i: (i, 0))

    fn = pl.pallas_call(
        _discriminator_kernel,
        out_shape=out_shape,
        grid_spec=pltpu.PrefetchScalarGridSpec(
            num_scalar_prefetch=0,
            grid=(b_pad // tm,),
            in_specs=in_specs,
            out_specs=out_spec,
        ),
        compiler_params=pltpu.CompilerParams(
            # Batch tiles are independent -> shard across TensorCores on v7x.
            dimension_semantics=("parallel",),
            # ~2x bf16 weights + activation double-buffers, with headroom
            # (64 MiB would be the entire physical VMEM of a v7x core).
            vmem_limit_bytes=16 << 20,
        ),
    )
    out = fn(*flat_inputs)
    return out[:B]


def init_discriminator_params(key, input_size, output_size):
    """Deterministic PyTorch-style init: U(-1/sqrt(fan_in), 1/sqrt(fan_in))."""
    dims = [input_size, 1024, 512, 256, 128, output_size]
    params = []
    for fan_in, fan_out in zip(dims[:-1], dims[1:]):
        key, kw, kb = jax.random.split(key, 3)
        bound = 1.0 / (fan_in ** 0.5)
        w = jax.random.uniform(kw, (fan_in, fan_out), jnp.float32, -bound, bound)
        b = jax.random.uniform(kb, (fan_out,), jnp.float32, -bound, bound)
        params.append((w, b))
    return params


def reference_forward(x, params):
    """Pure-f32 JAX reference matching the PyTorch module."""
    h = x
    for i, (w, b) in enumerate(params):
        h = h @ w + b
        if i < len(params) - 1:
            h = jnp.maximum(h, 0.0)
    return jax.nn.sigmoid(h)


if __name__ == "__main__":
    key = jax.random.PRNGKey(0)
    k_param, k_x = jax.random.split(key)

    batch = 16
    input_size = 784   # MNIST-style flattened input (exercises K padding 784 -> 896)
    output_size = 1    # real/fake probability

    params = init_discriminator_params(k_param, input_size, output_size)
    x = jax.random.normal(k_x, (batch, input_size), jnp.float32)

    # block_batch=8 -> grid of 2 batch tiles (exercises the pipelined/parallel grid).
    out = discriminator_forward(x, params, block_batch=8)
    out = jax.block_until_ready(out)

    ref = reference_forward(x, params)
    assert out.shape == (batch, output_size), out.shape
    # bf16 weights/activations vs the f32 reference: ~1e-2 relative error is expected.
    max_err = float(jnp.max(jnp.abs(out - ref)))
    assert jnp.allclose(out, ref, atol=2e-2, rtol=2e-2), max_err

    print("KERNEL_OK")
</pallas_src>

<mosaic_0001>
module attributes {stable_mosaic.version = 11 : i64} {
  func.func @_discriminator_kernel(%arg0: i32, %arg1: memref<8x896xbf16, #tpu.memory_space<vmem>>, %arg2: memref<896x1024xbf16, #tpu.memory_space<vmem>>, %arg3: memref<1x1024xf32, #tpu.memory_space<vmem>>, %arg4: memref<1024x512xbf16, #tpu.memory_space<vmem>>, %arg5: memref<1x512xf32, #tpu.memory_space<vmem>>, %arg6: memref<512x256xbf16, #tpu.memory_space<vmem>>, %arg7: memref<1x256xf32, #tpu.memory_space<vmem>>, %arg8: memref<256x128xbf16, #tpu.memory_space<vmem>>, %arg9: memref<1x128xf32, #tpu.memory_space<vmem>>, %arg10: memref<128x1xbf16, #tpu.memory_space<vmem>>, %arg11: memref<1x1xf32, #tpu.memory_space<vmem>>, %arg12: memref<8x1xf32, #tpu.memory_space<vmem>>) attributes {dimension_semantics = [#tpu.dimension_semantics<parallel>], iteration_bounds = array<i64: 2>, scalar_prefetch = 0 : i64, scratch_operands = 0 : i64, tpu.core_type = #tpu.core_type<tc>, window_params = [{transform_indices = @transform_0, window_bounds = array<i64: 8, 896>}, {pipeline_mode = #tpu.pipeline_mode<synchronous>, transform_indices = @transform_1, window_bounds = array<i64: 896, 1024>}, {pipeline_mode = #tpu.pipeline_mode<synchronous>, transform_indices = @transform_2, window_bounds = array<i64: 1, 1024>}, {pipeline_mode = #tpu.pipeline_mode<synchronous>, transform_indices = @transform_3, window_bounds = array<i64: 1024, 512>}, {pipeline_mode = #tpu.pipeline_mode<synchronous>, transform_indices = @transform_4, window_bounds = array<i64: 1, 512>}, {pipeline_mode = #tpu.pipeline_mode<synchronous>, transform_indices = @transform_5, window_bounds = array<i64: 512, 256>}, {pipeline_mode = #tpu.pipeline_mode<synchronous>, transform_indices = @transform_6, window_bounds = array<i64: 1, 256>}, {pipeline_mode = #tpu.pipeline_mode<synchronous>, transform_indices = @transform_7, window_bounds = array<i64: 256, 128>}, {pipeline_mode = #tpu.pipeline_mode<synchronous>, transform_indices = @transform_8, window_bounds = array<i64: 1, 128>}, {pipeline_mode = #tpu.pipeline_mode<synchronous>, transform_indices = @transform_9, window_bounds = array<i64: 128, 1>}, {pipeline_mode = #tpu.pipeline_mode<synchronous>, transform_indices = @transform_10, window_bounds = array<i64: 1, 1>}, {transform_indices = @transform_11, window_bounds = array<i64: 8, 1>}]} {
    %c0 = arith.constant 0 : index
    %c0_0 = arith.constant 0 : index
    %0 = vector.load %arg1[%c0, %c0_0] : memref<8x896xbf16, #tpu.memory_space<vmem>>, vector<8x896xbf16>
    %c0_1 = arith.constant 0 : index
    %c0_2 = arith.constant 0 : index
    %1 = vector.load %arg2[%c0_1, %c0_2] : memref<896x1024xbf16, #tpu.memory_space<vmem>>, vector<896x1024xbf16>
    %cst = arith.constant dense<0.000000e+00> : vector<8x1024xf32>
    %2 = tpu.matmul %0, %1, %cst {dimension_numbers = #tpu.dot_dimension_numbers<[1], [0], [0], [1], [0, 0, 1, 1], [], []>} : vector<8x896xbf16>, vector<896x1024xbf16>, vector<8x1024xf32> -> vector<8x1024xf32>
    %c0_3 = arith.constant 0 : index
    %c0_4 = arith.constant 0 : index
    %3 = vector.load %arg3[%c0_3, %c0_4] : memref<1x1024xf32, #tpu.memory_space<vmem>>, vector<1x1024xf32>
    %4 = vector.broadcast %3 : vector<1x1024xf32> to vector<8x1024xf32>
    %5 = arith.addf %2, %4 : vector<8x1024xf32>
    %cst_5 = arith.constant 0.000000e+00 : f32
    %6 = vector.broadcast %cst_5 : f32 to vector<8x1024xf32>
    %7 = arith.maximumf %5, %6 : vector<8x1024xf32>
    %8 = arith.truncf %7 : vector<8x1024xf32> to vector<8x1024xbf16>
    %c0_6 = arith.constant 0 : index
    %c0_7 = arith.constant 0 : index
    %9 = vector.load %arg4[%c0_6, %c0_7] : memref<1024x512xbf16, #tpu.memory_space<vmem>>, vector<1024x512xbf16>
    %cst_8 = arith.constant dense<0.000000e+00> : vector<8x512xf32>
    %10 = tpu.matmul %8, %9, %cst_8 {dimension_numbers = #tpu.dot_dimension_numbers<[1], [0], [0], [1], [0, 0, 1, 1], [], []>} : vector<8x1024xbf16>, vector<1024x512xbf16>, vector<8x512xf32> -> vector<8x512xf32>
    %c0_9 = arith.constant 0 : index
    %c0_10 = arith.constant 0 : index
    %11 = vector.load %arg5[%c0_9, %c0_10] : memref<1x512xf32, #tpu.memory_space<vmem>>, vector<1x512xf32>
    %12 = vector.broadcast %11 : vector<1x512xf32> to vector<8x512xf32>
    %13 = arith.addf %10, %12 : vector<8x512xf32>
    %cst_11 = arith.constant 0.000000e+00 : f32
    %14 = vector.broadcast %cst_11 : f32 to vector<8x512xf32>
    %15 = arith.maximumf %13, %14 : vector<8x512xf32>
    %16 = arith.truncf %15 : vector<8x512xf32> to vector<8x512xbf16>
    %c0_12 = arith.constant 0 : index
    %c0_13 = arith.constant 0 : index
    %17 = vector.load %arg6[%c0_12, %c0_13] : memref<512x256xbf16, #tpu.memory_space<vmem>>, vector<512x256xbf16>
    %cst_14 = arith.constant dense<0.000000e+00> : vector<8x256xf32>
    %18 = tpu.matmul %16, %17, %cst_14 {dimension_numbers = #tpu.dot_dimension_numbers<[1], [0], [0], [1], [0, 0, 1, 1], [], []>} : vector<8x512xbf16>, vector<512x256xbf16>, vector<8x256xf32> -> vector<8x256xf32>
    %c0_15 = arith.constant 0 : index
    %c0_16 = arith.constant 0 : index
    %19 = vector.load %arg7[%c0_15, %c0_16] : memref<1x256xf32, #tpu.memory_space<vmem>>, vector<1x256xf32>
    %20 = vector.broadcast %19 : vector<1x256xf32> to vector<8x256xf32>
    %21 = arith.addf %18, %20 : vector<8x256xf32>
    %cst_17 = arith.constant 0.000000e+00 : f32
    %22 = vector.broadcast %cst_17 : f32 to vector<8x256xf32>
    %23 = arith.maximumf %21, %22 : vector<8x256xf32>
    %24 = arith.truncf %23 : vector<8x256xf32> to vector<8x256xbf16>
    %c0_18 = arith.constant 0 : index
    %c0_19 = arith.constant 0 : index
    %25 = vector.load %arg8[%c0_18, %c0_19] : memref<256x128xbf16, #tpu.memory_space<vmem>>, vector<256x128xbf16>
    %cst_20 = arith.constant dense<0.000000e+00> : vector<8x128xf32>
    %26 = tpu.matmul %24, %25, %cst_20 {dimension_numbers = #tpu.dot_dimension_numbers<[1], [0], [0], [1], [0, 0, 1, 1], [], []>} : vector<8x256xbf16>, vector<256x128xbf16>, vector<8x128xf32> -> vector<8x128xf32>
    %c0_21 = arith.constant 0 : index
    %c0_22 = arith.constant 0 : index
    %27 = vector.load %arg9[%c0_21, %c0_22] : memref<1x128xf32, #tpu.memory_space<vmem>>, vector<1x128xf32>
    %28 = vector.broadcast %27 : vector<1x128xf32> to vector<8x128xf32>
    %29 = arith.addf %26, %28 : vector<8x128xf32>
    %cst_23 = arith.constant 0.000000e+00 : f32
    %30 = vector.broadcast %cst_23 : f32 to vector<8x128xf32>
    %31 = arith.maximumf %29, %30 : vector<8x128xf32>
    %32 = arith.truncf %31 : vector<8x128xf32> to vector<8x128xbf16>
    %c0_24 = arith.constant 0 : index
    %c0_25 = arith.constant 0 : index
    %33 = vector.load %arg10[%c0_24, %c0_25] : memref<128x1xbf16, #tpu.memory_space<vmem>>, vector<128x1xbf16>
    %cst_26 = arith.constant dense<0.000000e+00> : vector<8x1xf32>
    %34 = tpu.matmul %32, %33, %cst_26 {dimension_numbers = #tpu.dot_dimension_numbers<[1], [0], [0], [1], [0, 0, 1, 1], [], []>} : vector<8x128xbf16>, vector<128x1xbf16>, vector<8x1xf32> -> vector<8x1xf32>
    %c0_27 = arith.constant 0 : index
    %c0_28 = arith.constant 0 : index
    %35 = vector.load %arg11[%c0_27, %c0_28] : memref<1x1xf32, #tpu.memory_space<vmem>>, vector<1x1xf32>
    %36 = vector.broadcast %35 : vector<1x1xf32> to vector<8x1xf32>
    %37 = arith.addf %34, %36 : vector<8x1xf32>
    %cst_29 = arith.constant 0.000000e+00 : f32
    %38 = vector.broadcast %cst_29 : f32 to vector<8x1xf32>
    %39 = arith.subf %38, %37 : vector<8x1xf32>
    %40 = math.exp %39 : vector<8x1xf32>
    %cst_30 = arith.constant 1.000000e+00 : f32
    %41 = vector.broadcast %cst_30 : f32 to vector<8x1xf32>
    %42 = arith.addf %41, %40 : vector<8x1xf32>
    %43 = tpu.reciprocal %42 {approx = true} : vector<8x1xf32> -> vector<8x1xf32>
    %c0_31 = arith.constant 0 : index
    %c0_32 = arith.constant 0 : index
    %44 = vector.load %arg12[%c0_31, %c0_32] : memref<8x1xf32, #tpu.memory_space<vmem>>, vector<8x1xf32>
    tpu.vector_store %arg12[%c0_31, %c0_32], %43 {strides = array<i32>} : memref<8x1xf32, #tpu.memory_space<vmem>>, vector<8x1xf32>,
    return
  }
  func.func @transform_0(%arg0: i32) -> (i32, i32) {
    %c0_i32 = arith.constant 0 : i32
    %c0_i32_0 = arith.constant 0 : i32
    return %arg0, %c0_i32 : i32, i32
  }
  func.func @transform_1(%arg0: i32) -> (i32, i32) {
    %c0_i32 = arith.constant 0 : i32
    %c0_i32_0 = arith.constant 0 : i32
    %c0_i32_1 = arith.constant 0 : i32
    return %c0_i32, %c0_i32_0 : i32, i32
  }
  func.func @transform_2(%arg0: i32) -> (i32, i32) {
    %c0_i32 = arith.constant 0 : i32
    %c0_i32_0 = arith.constant 0 : i32
    %c0_i32_1 = arith.constant 0 : i32
    return %c0_i32, %c0_i32_0 : i32, i32
  }
  func.func @transform_3(%arg0: i32) -> (i32, i32) {
    %c0_i32 = arith.constant 0 : i32
    %c0_i32_0 = arith.constant 0 : i32
    %c0_i32_1 = arith.constant 0 : i32
    return %c0_i32, %c0_i32_0 : i32, i32
  }
  func.func @transform_4(%arg0: i32) -> (i32, i32) {
    %c0_i32 = arith.constant 0 : i32
    %c0_i32_0 = arith.constant 0 : i32
    %c0_i32_1 = arith.constant 0 : i32
    return %c0_i32, %c0_i32_0 : i32, i32
  }
  func.func @transform_5(%arg0: i32) -> (i32, i32) {
    %c0_i32 = arith.constant 0 : i32
    %c0_i32_0 = arith.constant 0 : i32
    %c0_i32_1 = arith.constant 0 : i32
    return %c0_i32, %c0_i32_0 : i32, i32
  }
  func.func @transform_6(%arg0: i32) -> (i32, i32) {
    %c0_i32 = arith.constant 0 : i32
    %c0_i32_0 = arith.constant 0 : i32
    %c0_i32_1 = arith.constant 0 : i32
    return %c0_i32, %c0_i32_0 : i32, i32
  }
  func.func @transform_7(%arg0: i32) -> (i32, i32) {
    %c0_i32 = arith.constant 0 : i32
    %c0_i32_0 = arith.constant 0 : i32
    %c0_i32_1 = arith.constant 0 : i32
    return %c0_i32, %c0_i32_0 : i32, i32
  }
  func.func @transform_8(%arg0: i32) -> (i32, i32) {
    %c0_i32 = arith.constant 0 : i32
    %c0_i32_0 = arith.constant 0 : i32
    %c0_i32_1 = arith.constant 0 : i32
    return %c0_i32, %c0_i32_0 : i32, i32
  }
  func.func @transform_9(%arg0: i32) -> (i32, i32) {
    %c0_i32 = arith.constant 0 : i32
    %c0_i32_0 = arith.constant 0 : i32
    %c0_i32_1 = arith.constant 0 : i32
    return %c0_i32, %c0_i32_0 : i32, i32
  }
  func.func @transform_10(%arg0: i32) -> (i32, i32) {
    %c0_i32 = arith.constant 0 : i32
    %c0_i32_0 = arith.constant 0 : i32
    %c0_i32_1 = arith.constant 0 : i32
    return %c0_i32, %c0_i32_0 : i32, i32
  }
  func.func @transform_11(%arg0: i32) -> (i32, i32) {
    %c0_i32 = arith.constant 0 : i32
    %c0_i32_0 = arith.constant 0 : i32
    return %arg0, %c0_i32 : i32, i32
  }
}

</mosaic_0001>

<bundles_post_ra>
// kernel: tpu_custom_call.1
= control target key start
LH: loop header
LB: loop body
LE: loop exit
PB: predicated region body
PF: predicated region fallthrough
CT: control target
= control target key end

     0   :  { %s9258_s0 = inlined_call_operand.hbm [shape: bf16[16,896], index: 0, kind: input, shape index: {}]   ;;  %s9259_s1 = inlined_call_operand.hbm [shape: bf16[896,1024], index: 1, kind: input, shape index: {}]   ;;  %s9260_s2 = inlined_call_operand.hbm [shape: f32[1,1024], index: 2, kind: input, shape index: {}]   ;;  %s9261_s3 = inlined_call_operand.hbm [shape: bf16[1024,512], index: 3, kind: input, shape index: {}]   ;;  %s9262_s4 = inlined_call_operand.hbm [shape: f32[1,512], index: 4, kind: input, shape index: {}]   ;;  %s9263_s5 = inlined_call_operand.hbm [shape: bf16[512,256], index: 5, kind: input, shape index: {}]   ;;  %s9264_s6 = inlined_call_operand.hbm [shape: f32[1,256], index: 6, kind: input, shape index: {}]   ;;  %s9265_s7 = inlined_call_operand.hbm [shape: bf16[256,128], index: 7, kind: input, shape index: {}]   ;;  %s9266_s8 = inlined_call_operand.hbm [shape: f32[1,128], index: 8, kind: input, shape index: {}]   ;;  %s9267_s9 = inlined_call_operand.vmem [shape: bf16[128,1], index: 9, kind: input, shape index: {}]   ;;  %s9268_s10 = inlined_call_operand.<no memory space> [shape: f32[1,1], index: 10, kind: input, shape index: {}]   ;;  %s9269_s11 = inlined_call_operand.vmem [shape: f32[16,1], index: 11, kind: output, shape index: {}]  }
   0x1   :  { %9273 = sst [smem:[#allocation22_spill]] %s9267_s9  ;;  %v16_v0 = vstv %s9268_s10 }
   0x2   :  { %9274 = sst [smem:[#allocation23_spill]] %s9269_s11  ;;  %17 = vst [vmem:[#allocation2] sm:$0x1] %v16_v0 }
   0x3   :  { %18 = vsyncpa [#allocation4], 0 }
   0x4   :  { %20 = vsyncpa [#allocation4 + $0x1], 0 }
   0x5   :  { %21 = vsyncpa [#allocation6], 0 }
   0x6   :  { %22 = vsyncpa [#allocation9], 0 }
   0x7   :  { %23 = vsyncpa [#allocation12], 0 }
   0x8   :  { %24 = vsyncpa [#allocation15], 0  ;;  %s8762_s19 = smov 0   ;;  %s8764_s20 = smov 0  }
   0x9   :  { %s8766_s21 = smov 0   ;;  %s8768_s22 = smov 0  }
   0xa LB: > { %s8679_s10 = smov [#allocation5]   ;;  %s8783_s24 = sadd.s32 4294967295, %s8677_s22   ;;  %s8677_s22 = sphi %s8768_s22, %s9295_s22   ;;  %s8673_s21 = sphi %s8766_s21, %s9294_s21   ;;  %s8669_s20 = sphi %s8764_s20, %s9293_s20   ;;  %s8665_s19 = sphi %s8762_s19, %s9292_s19  }
   0xb   : > { %s309_s23 = sshll.u32 %s8679_s10, 4  ;;  %p6758_p0 = scmp.ge.s32.totalorder %s8677_s22, 1  ;;  %s8788_s23 = int_to_ptr.vmem [resolvable:$true] %s309_s23 }
   0xc   : > { %p9271_p1 = scmp.eq.s32.totalorder %s8783_s24, 0  ;;  %p297_p2 = scmp.lt.s32.totalorder %s8677_s22, 3 }
   0xd   : > { %s8680_s26 = smov [#allocation8]   ;;  %s8681_s29 = smov [#allocation11]  }
   0xe   : > { %p8790_p3 = pnand %p6758_p0, %p297_p2  ;;  %s333_s27 = sshll.u32 %s8680_s26, 4  ;;  %s8802_s27 = int_to_ptr.vmem [resolvable:$true] %s333_s27 }
   0xf   : > { %s8804_s30 = sshll.u32 %s8681_s29, 4  ;;  %s8373_s14 = scalar_lea.hbm %s9259_s1, 57344  ;;  %s358_s30 = int_to_ptr.vmem [resolvable:$true] %s8804_s30 }
  0x10   : > { %s9275_s25 = scalar_select %p8790_p3, 1, 0 }
  0x11   : > { %p7758_p4 = pneg %p8790_p3  ;;  %p8374_p6 = scmp.ne.s32.totalorder %s9259_s1, %s8373_s14 }
  0x12   : > { %p8380_p10 = scmp.lt.u32.totalorder %s8373_s14, %s9259_s1 }
  0x13   : > { %p8798_p5 = pnand %p7758_p4, %p9271_p1 }
  0x15   : > { %p8814_p7 = pneg %p8798_p5 }
  0x17   : > { %p8376_p8 = pnand %p8814_p7, %p8374_p6 }
  0x19   : > { %p8377_p9 = pneg %p8376_p8 }
  0x1b   : > { %p8382_p11 = pnand %p8380_p10, %p8377_p9 }
  0x1d   : > { %8385 = shalt.err (!%p8382_p11)
}
  0x1e   : > { %s8386_s26 = scalar_lea.vmem %s8788_s23, 57344  ;;  %p8394_p2 = scmp.lt.s32.totalorder %s8788_s23, %s8788_s23 }
  0x1f   : > { %p8387_p12 = scmp.ne.s32.totalorder %s8788_s23, %s8386_s26  ;;  %p8395_p4 = scmp.lt.s32.totalorder %s8386_s26, %s8386_s26 }
  0x21   : > { %p8389_p13 = pnand %p8387_p12, %p8814_p7  ;;  %p8396_p6 = por %p8395_p4, %p8394_p2 }
  0x23   : > { %p8390_p0 = pneg %p8389_p13 }
  0x25   : > { %p8397_p8 = pnand %p8396_p6, %p8390_p0 }
  0x27   : > { %8400 = shalt.err (!%p8397_p8)
}
  0x28   : > { %s8682_s29 = smov 512   ;;  %s8683_s12 = smov 32  }
  0x29   : > { %7761 = dma.hbm_to_vmem [thread:$0]  (!%p8798_p5), %s9259_s1, 57344, %s8788_s23, [#allocation6], %s8682_s29, %s8682_s29, %s8683_s12  }
  0x2a   : > { %s8401_s18 = scalar_lea.hbm %s9261_s3, 32768 }
  0x2b   : > { %p8402_p9 = scmp.ne.s32.totalorder %s9261_s3, %s8401_s18  ;;  %p8408_p12 = scmp.lt.u32.totalorder %s8401_s18, %s9261_s3 }
  0x2d   : > { %p8404_p10 = pnand %p8402_p9, %p8814_p7 }
  0x2f   : > { %p8405_p11 = pneg %p8404_p10 }
  0x31   : > { %p8410_p13 = pnand %p8408_p12, %p8405_p11 }
  0x33   : > { %8413 = shalt.err (!%p8410_p13)
}
  0x34   : > { %s8414_s23 = scalar_lea.vmem %s8802_s27, 32768  ;;  %p8422_p6 = scmp.lt.s32.totalorder %s8802_s27, %s8802_s27 }
  0x35   : > { %p8415_p0 = scmp.ne.s32.totalorder %s8802_s27, %s8414_s23  ;;  %p8423_p8 = scmp.lt.s32.totalorder %s8414_s23, %s8414_s23 }
  0x37   : > { %p8417_p2 = pnand %p8415_p0, %p8814_p7  ;;  %p8424_p9 = por %p8423_p8, %p8422_p6 }
  0x39   : > { %p8418_p4 = pneg %p8417_p2 }
  0x3b   : > { %p8425_p10 = pnand %p8424_p9, %p8418_p4 }
  0x3d   : > { %8428 = shalt.err (!%p8425_p10)
}
  0x3e   : > { %s8684_s11 = smov 256   ;;  %s8685_s9 = smov 16  }
  0x3f   : > { %7767 = dma.hbm_to_vmem [thread:$0]  (!%p8798_p5), %s9261_s3, 32768, %s8802_s27, [#allocation9], %s8684_s11, %s8684_s11, %s8685_s9  }
  0x40   : > { %s8429_s15 = scalar_lea.hbm %s9263_s5, 8192 }
  0x41   : > { %p8430_p11 = scmp.ne.s32.totalorder %s9263_s5, %s8429_s15  ;;  %p8436_p0 = scmp.lt.u32.totalorder %s8429_s15, %s9263_s5 }
  0x43   : > { %p8432_p12 = pnand %p8430_p11, %p8814_p7 }
  0x45   : > { %p8433_p13 = pneg %p8432_p12 }
  0x47   : > { %p8438_p2 = pnand %p8436_p0, %p8433_p13 }
  0x49   : > { %8441 = shalt.err (!%p8438_p2)
}
  0x4a   : > { %s8442_s23 = scalar_lea.vmem %s358_s30, 8192  ;;  %p8450_p9 = scmp.lt.s32.totalorder %s358_s30, %s358_s30 }
  0x4b   : > { %p8443_p4 = scmp.ne.s32.totalorder %s358_s30, %s8442_s23  ;;  %p8451_p10 = scmp.lt.s32.totalorder %s8442_s23, %s8442_s23 }
  0x4d   : > { %p8445_p6 = pnand %p8443_p4, %p8814_p7  ;;  %p8452_p1 = por %p8451_p10, %p8450_p9 }
  0x4f   : > { %p8446_p8 = pneg %p8445_p6 }
  0x51   : > { %p8453_p3 = pnand %p8452_p1, %p8446_p8 }
  0x53   : > { %8456 = shalt.err (!%p8453_p3)
}
  0x54   : > { %s8686_s27 = smov 128   ;;  %s8687_s11 = smov 8  }
  0x55   : > { %7773 = dma.hbm_to_vmem [thread:$0]  (!%p8798_p5), %s9263_s5, 8192, %s358_s30, [#allocation12], %s8686_s27, %s8686_s27, %s8687_s11  }
  0x56   : > { %s8688_s12 = smov [#allocation14]   ;;  %s8457_s16 = scalar_lea.hbm %s9265_s7, 2048 }
  0x57   : > { %s381_s13 = sshll.u32 %s8688_s12, 4  ;;  %p8458_p1 = scmp.ne.s32.totalorder %s9265_s7, %s8457_s16  ;;  %s382_s13 = int_to_ptr.vmem [resolvable:$true] %s381_s13 }
  0x58   : > { %p8464_p12 = scmp.lt.u32.totalorder %s8457_s16, %s9265_s7 }
  0x59   : > { %p8460_p3 = pnand %p8458_p1, %p8814_p7 }
  0x5b   : > { %p8461_p11 = pneg %p8460_p3 }
  0x5d   : > { %p8466_p13 = pnand %p8464_p12, %p8461_p11 }
  0x5f   : > { %8469 = shalt.err (!%p8466_p13)
}
  0x60   : > { %s8470_s30 = scalar_lea.vmem %s382_s13, 2048  ;;  %p8478_p6 = scmp.lt.s32.totalorder %s382_s13, %s382_s13 }
  0x61   : > { %p8471_p0 = scmp.ne.s32.totalorder %s382_s13, %s8470_s30  ;;  %p8479_p8 = scmp.lt.s32.totalorder %s8470_s30, %s8470_s30 }
  0x63   : > { %p8473_p2 = pnand %p8471_p0, %p8814_p7  ;;  %p8480_p9 = por %p8479_p8, %p8478_p6 }
  0x65   : > { %p8474_p4 = pneg %p8473_p2 }
  0x67   : > { %p8481_p10 = pnand %p8480_p9, %p8474_p4 }
  0x69   : > { %8484 = shalt.err (!%p8481_p10)
}
  0x6a   : > { %s8689_s27 = smov 64   ;;  %s8690_s11 = smov 4  }
  0x6b   : > { %7779 = dma.hbm_to_vmem [thread:$0]  (!%p8798_p5), %s9265_s7, 2048, %s382_s13, [#allocation15], %s8689_s27, %s8689_s27, %s8690_s11  }
  0x6c   : > { %s8691_s12 = smov [#allocation7]   ;;  %s8692_s15 = smov [#allocation10]  }
  0x6d   : > { %s323_s14 = sshll.u32 %s8691_s12, 4  ;;  %s347_s16 = sshll.u32 %s8692_s15, 4  ;;  %s324_s14 = int_to_ptr.vmem [resolvable:$true] %s323_s14  ;;  %s8895_s16 = int_to_ptr.vmem [resolvable:$true] %s347_s16 }
  0x6e   : > { %s8485_s26 = scalar_lea.hbm %s9260_s2, 128 }
  0x6f   : > { %p8486_p1 = scmp.ne.s32.totalorder %s9260_s2, %s8485_s26  ;;  %p8492_p12 = scmp.lt.u32.totalorder %s8485_s26, %s9260_s2 }
  0x71   : > { %p8488_p3 = pnand %p8486_p1, %p8814_p7 }
  0x73   : > { %p8489_p11 = pneg %p8488_p3 }
  0x75   : > { %p8494_p13 = pnand %p8492_p12, %p8489_p11 }
  0x77   : > { %8497 = shalt.err (!%p8494_p13)
}
  0x78   : > { %s8498_s27 = scalar_lea.vmem %s324_s14, 128  ;;  %p8506_p6 = scmp.lt.s32.totalorder %s324_s14, %s324_s14 }
  0x79   : > { %p8499_p0 = scmp.ne.s32.totalorder %s324_s14, %s8498_s27  ;;  %p8507_p8 = scmp.lt.s32.totalorder %s8498_s27, %s8498_s27 }
  0x7b   : > { %p8501_p2 = pnand %p8499_p0, %p8814_p7  ;;  %p8508_p9 = por %p8507_p8, %p8506_p6 }
  0x7d   : > { %p8502_p4 = pneg %p8501_p2 }
  0x7f   : > { %p8509_p10 = pnand %p8508_p9, %p8502_p4 }
  0x81   : > { %8512 = shalt.err (!%p8509_p10)
}
  0x82   : > { %7764 = dma.hbm_to_vmem [thread:$0]  (!%p8798_p5), %s9260_s2, 128, %s324_s14, [#allocation6]  }
  0x83   : > { %s8513_s18 = scalar_lea.hbm %s9262_s4, 64 }
  0x84   : > { %p8514_p1 = scmp.ne.s32.totalorder %s9262_s4, %s8513_s18  ;;  %p8520_p12 = scmp.lt.u32.totalorder %s8513_s18, %s9262_s4 }
  0x86   : > { %p8516_p3 = pnand %p8514_p1, %p8814_p7 }
  0x88   : > { %p8517_p11 = pneg %p8516_p3 }
  0x8a   : > { %p8522_p13 = pnand %p8520_p12, %p8517_p11 }
  0x8c   : > { %8525 = shalt.err (!%p8522_p13)
}
  0x8d   : > { %s8526_s14 = scalar_lea.vmem %s8895_s16, 64  ;;  %p8534_p6 = scmp.lt.s32.totalorder %s8895_s16, %s8895_s16 }
  0x8e   : > { %p8527_p0 = scmp.ne.s32.totalorder %s8895_s16, %s8526_s14  ;;  %p8535_p8 = scmp.lt.s32.totalorder %s8526_s14, %s8526_s14 }
  0x90   : > { %p8529_p2 = pnand %p8527_p0, %p8814_p7  ;;  %p8536_p9 = por %p8535_p8, %p8534_p6 }
  0x92   : > { %p8530_p4 = pneg %p8529_p2 }
  0x94   : > { %p8537_p10 = pnand %p8536_p9, %p8530_p4 }
  0x96   : > { %8540 = shalt.err (!%p8537_p10)
}
  0x97   : > { %7770 = dma.hbm_to_vmem [thread:$0]  (!%p8798_p5), %s9262_s4, 64, %s8895_s16, [#allocation9]  }
  0x98   : > { %s8693_s27 = smov [#allocation13]   ;;  %s8694_s29 = smov [#allocation16]  }
  0x99   : > { %s371_s11 = sshll.u32 %s8693_s27, 4  ;;  %s395_s12 = sshll.u32 %s8694_s29, 4  ;;  %s372_s11 = int_to_ptr.vmem [resolvable:$true] %s371_s11  ;;  %s8938_s12 = int_to_ptr.vmem [resolvable:$true] %s395_s12 }
  0x9a   : > { %s8541_s10 = scalar_lea.hbm %s9264_s6, 32 }
  0x9b   : > { %p8542_p1 = scmp.ne.s32.totalorder %s9264_s6, %s8541_s10  ;;  %p8548_p12 = scmp.lt.u32.totalorder %s8541_s10, %s9264_s6 }
  0x9d   : > { %p8544_p3 = pnand %p8542_p1, %p8814_p7 }
  0x9f   : > { %p8545_p11 = pneg %p8544_p3 }
  0xa1   : > { %p8550_p13 = pnand %p8548_p12, %p8545_p11 }
  0xa3   : > { %8553 = shalt.err (!%p8550_p13)
}
  0xa4   : > { %s8554_s14 = scalar_lea.vmem %s372_s11, 32  ;;  %p8562_p6 = scmp.lt.s32.totalorder %s372_s11, %s372_s11 }
  0xa5   : > { %p8555_p0 = scmp.ne.s32.totalorder %s372_s11, %s8554_s14  ;;  %p8563_p8 = scmp.lt.s32.totalorder %s8554_s14, %s8554_s14 }
  0xa7   : > { %p8557_p2 = pnand %p8555_p0, %p8814_p7  ;;  %p8564_p9 = por %p8563_p8, %p8562_p6 }
  0xa9   : > { %p8558_p4 = pneg %p8557_p2 }
  0xab   : > { %p8565_p10 = pnand %p8564_p9, %p8558_p4 }
  0xad   : > { %8568 = shalt.err (!%p8565_p10)
}
  0xae   : > { %7776 = dma.hbm_to_vmem [thread:$0]  (!%p8798_p5), %s9264_s6, 32, %s372_s11, [#allocation12]  }
  0xaf   : > { %s8569_s15 = scalar_lea.hbm %s9266_s8, 16 }
  0xb0   : > { %p8570_p1 = scmp.ne.s32.totalorder %s9266_s8, %s8569_s15  ;;  %p8576_p12 = scmp.lt.u32.totalorder %s8569_s15, %s9266_s8 }
  0xb2   : > { %p8572_p3 = pnand %p8570_p1, %p8814_p7 }
  0xb4   : > { %p8573_p11 = pneg %p8572_p3 }
  0xb6   : > { %p8578_p13 = pnand %p8576_p12, %p8573_p11 }
  0xb8   : > { %8581 = shalt.err (!%p8578_p13)
}
  0xb9   : > { %s8582_s11 = scalar_lea.vmem %s8938_s12, 16  ;;  %s8589_s30 = scalar_lea.vmem %s8938_s12, 32 }
  0xba   : > { %p8583_p0 = scmp.ne.s32.totalorder %s8938_s12, %s8582_s11  ;;  %p8590_p6 = scmp.lt.s32.totalorder %s8938_s12, %s8938_s12 }
  0xbb   : > { %p8591_p8 = scmp.lt.s32.totalorder %s8589_s30, %s8582_s11 }
  0xbc   : > { %p8585_p2 = pnand %p8583_p0, %p8814_p7 }
  0xbd   : > { %p8592_p9 = por %p8591_p8, %p8590_p6 }
  0xbe   : > { %p8586_p4 = pneg %p8585_p2 }
  0xc0   : > { %p8593_p10 = pnand %p8592_p9, %p8586_p4 }
  0xc2   : > { %8596 = shalt.err (!%p8593_p10)
}
  0xc3   : > { %7782 = dma.hbm_to_vmem [thread:$0]  (!%p8798_p5), %s9266_s8, 16, %s8938_s12, [#allocation15]  }
  0xc4   : > { %s8983_s17 = sadd.s32 1, %s8677_s22   ;;  %s37_s28 = sadd.s32 1, %s8673_s21 }
  0xc5   : > { %s34_s9 = ssub.s32 %s8677_s22, %s8983_s17  ;;  %p44_p7 = scmp.ne.s32.totalorder %s8673_s21, %s8669_s20 }
  0xc6   : > { %p35_p1 = scmp.eq.s32.totalorder %s34_s9, 0  ;;  %p45_p3 = scmp.eq.s32.totalorder %s8677_s22, 0 }
  0xc7   : > { %p50_p11 = scmp.ne.s32.totalorder %s8669_s20, %s8665_s19  ;;  %p7795_p12 = scmp.lt.s32.totalorder %s8677_s22, 2 }
  0xc8   : > { %s8995_s13 = scalar_select %p35_p1, %s8673_s21, %s37_s28  }
  0xc9   : > { %p46_p13 = por %p45_p3, %p44_p7  ;;  %p9278_p0 = scmp.eq.s32.totalorder %s8783_s24, 0 }
  0xca   : > { %s412_s29 = sand.u32 1, %s8673_s21   ;;  %s7722_s12 = smul.u32 448, %s8677_s22 }
  0xcb   : > { %p8999_p2 = por %p9278_p0, %p50_p11  ;;  %s7721_s15 = smul.u32 28, %s412_s29 }
  0xcc   : > { %p9005_p5 = pnand %p7795_p12, %p46_p13  ;;  %s9012_s19 = scalar_lea.hbm %s9258_s0, %s7722_s12 }
  0xcd   : > { %s416_s23 = scalar_lea.vmem [#allocation3], %s7721_s15  ;;  %s413_s22 = scalar_lea.sflag [#allocation4], %s412_s29 }
  0xce   : > { %s424_s11 = sshll.u32 %s416_s23, 4  ;;  %s8597_s30 = scalar_lea.hbm %s9012_s19, 448  ;;  %s9014_s11 = int_to_ptr.vmem [resolvable:$true] %s424_s11 }
  0xcf   : > { %p8598_p4 = scmp.ne.s32.totalorder %s9012_s19, %s8597_s30  ;;  %p8599_p6 = pneg %p9005_p5 }
  0xd0   : > { %s8602_s28 = scalar_lea.hbm %s9258_s0, 896  ;;  %p8603_p10 = scmp.lt.u32.totalorder %s9012_s19, %s9258_s0 }
  0xd1   : > { %p8600_p8 = pnand %p8599_p6, %p8598_p4  ;;  %p8604_p7 = scmp.lt.u32.totalorder %s8602_s28, %s8597_s30 }
  0xd2   : > { %p8606_p3 = scmp.lt.u32.totalorder %s8597_s30, %s9012_s19 }
  0xd3   : > { %p8601_p9 = pneg %p8600_p8  ;;  %p8605_p1 = por %p8604_p7, %p8603_p10 }
  0xd5   : > { %p8607_p11 = por %p8606_p3, %p8605_p1 }
  0xd7   : > { %p8608_p12 = pnand %p8607_p11, %p8601_p9 }
  0xd9   : > { %8611 = shalt.err (!%p8608_p12)
}
  0xda   : > { %s8612_s29 = scalar_lea.vmem %s9014_s11, 448  ;;  %s8695_s15 = smov [#allocation3]  }
  0xdb   : > { %p8613_p13 = scmp.ne.s32.totalorder %s9014_s11, %s8612_s29  ;;  %s8617_s10 = sshll.u32 %s8695_s15, 4  ;;  %s8618_s10 = int_to_ptr.vmem [resolvable:$false] %s8617_s10 }
  0xdc   : > { %s8619_s26 = scalar_lea.vmem %s8618_s10, 896  ;;  %p8620_p8 = scmp.lt.s32.totalorder %s9014_s11, %s8618_s10 }
  0xdd   : > { %p8615_p0 = pnand %p8613_p13, %p8599_p6  ;;  %p8621_p10 = scmp.lt.s32.totalorder %s8619_s26, %s8612_s29 }
  0xdf   : > { %p8616_p4 = pneg %p8615_p0  ;;  %p8622_p7 = por %p8621_p10, %p8620_p8 }
  0xe1   : > { %p8623_p1 = pnand %p8622_p7, %p8616_p4 }
  0xe3   : > { %8626 = shalt.err (!%p8623_p1)
}
  0xe4   : > { %7786 = dma.hbm_to_vmem [thread:$0]  (!%p9005_p5), %s9012_s19, 448, %s9014_s11, %s413_s22  }
  0xe5   : > { %p9281_p9 = scmp.ne.s32.totalorder %s9275_s25, 0 }
  0xe6   : > { %s435_s23 = sand.u32 (!%p9281_p9), 1, %s8669_s20  }
  0xe7   : > { %433 = sbr.rel (%p9281_p9) target bundleno = 1927 (0x787), region = 64  ;;  %s436_s16 = scalar_lea.sflag (!%p9281_p9), [#allocation4], %s435_s23 }
  0xe8   : > { %s7723_s30 = smul.u32 (!%p9281_p9), 28, %s435_s23 }
  0xea   : > { %s9044_s14 = scalar_lea.vmem (!%p9281_p9), [#allocation3], %s7723_s30 }
  0xee   : > { %8644 = dma.done.wait (%p8999_p2), %s436_s16, 448  }
  0xef   : > { %8646 = vsyncadd (%p8999_p2), %s436_s16, 4294966848  ;;  %p9282_p6 = scmp.eq.s32.totalorder %s8783_s24, 0 }
  0xf1   : > { %8648 = dma.done.wait (%p9282_p6), [#allocation6], 57472   ;;  %p9283_p5 = pmov %p9282_p6 }
  0xf3   : > { %8650 = vsyncadd (%p9283_p5), [#allocation6], 4294909824  ;;  %p9284_p3 = pmov %p9283_p5 }
  0xf5   : > { %8652 = dma.done.wait (%p9284_p3), [#allocation9], 32832   ;;  %p9285_p11 = pmov %p9284_p3 }
  0xf6   : > { %p9286_p12 = pmov %p9284_p3 }
  0xf7   : > { %8654 = vsyncadd (%p9285_p11), [#allocation9], 4294934464 }
  0xf8   : > { %8656 = dma.done.wait (%p9286_p12), [#allocation12], 8224   ;;  %p9287_p13 = pmov %p9284_p3 }
  0xf9   : > { %p9288_p2 = pmov %p9284_p3 }
  0xfa   : > { %8658 = vsyncadd (%p9287_p13), [#allocation12], 4294959072 }
  0xfb   : > { %8660 = dma.done.wait (%p9288_p2), [#allocation15], 2064   ;;  %p9289_p0 = pmov %p9288_p2 }
  0xfc   : > { %v8696_v1 = vmov 0   ;;  %v518_v2 = vld [vmem:[#allocation5] sm:$0xff]  ;;  %s9290_s18 = sld [smem:[#allocation22_spill]]  ;;  %vm8698_vm0 = vmmov 0   ;;  %p509_p4 = scmp.lt.s32.totalorder %s8783_s24, 1  ;;  %vm6614_vm1 = vcmask 7168  }
  0xfd   : > { %8662 = vsyncadd (%p9289_p0), [#allocation15], 4294965232  ;;  %3428 = vmatprep.mubr.bf16.mxu1 %v8696_v1  ;;  %v522_v3 = vld [vmem:[#allocation5 + $0x20] sm:$0xff]  ;;  %s9291_s11 = sld [smem:[#allocation23_spill]] }
  0xfe   : > { %v902_v4 = vld [vmem:[#allocation5 + $0xc00] sm:$0xff]  ;;  %v6787_v5 = vcombine.high %v518_v2, %v522_v3  ;;  %v6786_v7 = vcombine.low %v518_v2, %v522_v3  ;;  %s9297_s24 = smov (!%p509_p4, %s8783_s24), 1 }
  0xff   : > { %v906_v6 = vld [vmem:[#allocation5 + $0xc20] sm:$0xff]  ;;  %s6778_s25 = sshll.u32 %s9297_s24, 3 }
 0x100   : > { %v526_v8 = vld [vmem:[#allocation5 + $0x40] sm:$0xff]  ;;  %v7171_v10 = vcombine.high %v902_v4, %v906_v6  ;;  %v7170_v11 = vcombine.low %v902_v4, %v906_v6  ;;  %3273 = vmatprep.subr.bf16.mxu0 %v6787_v5  ;;  %v519_v5 = vld [vmem:[#allocation5 + $0x8] sm:$0xff] }
 0x101   : > { %v530_v9 = vld [vmem:[#allocation5 + $0x60] sm:$0xff]  ;;  %3274 = vmatpush1.bf16.msra.mxu0 %v6786_v7  ;;  %v523_v6 = vld [vmem:[#allocation5 + $0x28] sm:$0xff] }
 0x102   : > { %v6795_v12 = vcombine.high %v526_v8, %v530_v9  ;;  %v910_v13 = vld [vmem:[#allocation5 + $0xc40] sm:$0xff]  ;;  %3396 = vmatprep.subr.bf16.mxu1 %v7171_v10  ;;  %v6794_v20 = vcombine.low %v526_v8, %v530_v9  ;;  %v6789_v10 = vcombine.high %v519_v5, %v523_v6 }
 0x103   : > { %v914_v14 = vld [vmem:[#allocation5 + $0xc60] sm:$0xff]  ;;  %3397 = vmatpush1.bf16.msra.mxu1 %v7170_v11  ;;  %s512_s22 = scalar_lea.vmem %s9291_s11, %s6778_s25 }
 0x104   : > { %v534_v15 = vld [vmem:[#allocation5 + $0x80] sm:$0xff]  ;;  %v7179_v16 = vcombine.high %v910_v13, %v914_v14  ;;  %3275 = vmatprep.subr.bf16.mxu0 %v6795_v12  ;;  %v7178_v21 = vcombine.low %v910_v13, %v914_v14  ;;  %v527_v13 = vld [vmem:[#allocation5 + $0x48] sm:$0xff] }
 0x105   : > { %v538_v17 = vld [vmem:[#allocation5 + $0xa0] sm:$0xff]  ;;  %3276 = vmatpush1.bf16.msra.mxu0 %v6794_v20  ;;  %v531_v14 = vld [vmem:[#allocation5 + $0x68] sm:$0xff] }
 0x106   : > { %v918_v18 = vld [vmem:[#allocation5 + $0xc80] sm:$0xff]  ;;  %v6803_v22 = vcombine.high %v534_v15, %v538_v17  ;;  %3398 = vmatprep.subr.bf16.mxu1 %v7179_v16  ;;  %v6802_v28 = vcombine.low %v534_v15, %v538_v17  ;;  %v6788_v17 = vcombine.low %v519_v5, %v523_v6 }
 0x107   : > { %v922_v19 = vld [vmem:[#allocation5 + $0xca0] sm:$0xff]  ;;  %3399 = vmatpush1.bf16.msra.mxu1 %v7178_v21 }
 0x108   : > { %v7187_v23 = vcombine.high %v918_v18, %v922_v19  ;;  %v542_v24 = vld [vmem:[#allocation5 + $0xc0] sm:$0xff]  ;;  %3277 = vmatprep.subr.bf16.mxu0 %v6803_v22  ;;  %v7186_v29 = vcombine.low %v918_v18, %v922_v19  ;;  %v6797_v19 = vcombine.high %v527_v13, %v531_v14  ;;  %v535_v22 = vld [vmem:[#allocation5 + $0x88] sm:$0xff] }
 0x109   : > { %v546_v25 = vld [vmem:[#allocation5 + $0xe0] sm:$0xff]  ;;  %3278 = vmatpush1.bf16.msra.mxu0 %v6802_v28 }
 0x10a   : > { %v926_v26 = vld [vmem:[#allocation5 + $0xcc0] sm:$0xff]  ;;  %v6811_v30 = vcombine.high %v542_v24, %v546_v25  ;;  %3400 = vmatprep.subr.bf16.mxu1 %v7187_v23  ;;  %v6810_v36 = vcombine.low %v542_v24, %v546_v25  ;;  %v539_v23 = vld [vmem:[#allocation5 + $0xa8] sm:$0xff]  ;;  %v6796_v25 = vcombine.low %v527_v13, %v531_v14 }
 0x10b   : > { %v930_v27 = vld [vmem:[#allocation5 + $0xce0] sm:$0xff]  ;;  %3401 = vmatpush1.bf16.msra.mxu1 %v7186_v29  ;;  %v9078_v14 = vld [vmem:[%s9044_s14 + $0x8] sm:$0xff] }
 0x10c   : > { %v7195_v31 = vcombine.high %v926_v26, %v930_v27  ;;  %v550_v32 = vld [vmem:[#allocation5 + $0x100] sm:$0xff]  ;;  %3279 = vmatprep.subr.bf16.mxu0 %v6811_v30  ;;  %v7194_v37 = vcombine.low %v926_v26, %v930_v27  ;;  %v6805_v27 = vcombine.high %v535_v22, %v539_v23  ;;  %v543_v30 = vld [vmem:[#allocation5 + $0xc8] sm:$0xff] }
 0x10d   : > { %v554_v33 = vld [vmem:[#allocation5 + $0x120] sm:$0xff]  ;;  %3280 = vmatpush1.bf16.msra.mxu0 %v6810_v36 }
 0x10e   : > { %v934_v34 = vld [vmem:[#allocation5 + $0xd00] sm:$0xff]  ;;  %v6819_v38 = vcombine.high %v550_v32, %v554_v33  ;;  %3402 = vmatprep.subr.bf16.mxu1 %v7195_v31  ;;  %v6818_v44 = vcombine.low %v550_v32, %v554_v33  ;;  %v547_v31 = vld [vmem:[#allocation5 + $0xe8] sm:$0xff]  ;;  %v6804_v33 = vcombine.low %v535_v22, %v539_v23  ;;  %v9086_v22 = vcombine.high %v9078_v14, %v9078_v14 }
 0x10f   : > { %v938_v35 = vld [vmem:[#allocation5 + $0xd20] sm:$0xff]  ;;  %3403 = vmatpush1.bf16.msra.mxu1 %v7194_v37 }
 0x110   : > { %v7203_v39 = vcombine.high %v934_v34, %v938_v35  ;;  %v558_v40 = vld [vmem:[#allocation5 + $0x140] sm:$0xff]  ;;  %3281 = vmatprep.subr.bf16.mxu0 %v6819_v38  ;;  %v7202_v45 = vcombine.low %v934_v34, %v938_v35  ;;  %v6813_v35 = vcombine.high %v543_v30, %v547_v31  ;;  %v551_v38 = vld [vmem:[#allocation5 + $0x108] sm:$0xff] }
 0x111   : > { %v562_v41 = vld [vmem:[#allocation5 + $0x160] sm:$0xff]  ;;  %3282 = vmatpush1.bf16.msra.mxu0 %v6818_v44 }
 0x112   : > { %v942_v42 = vld [vmem:[#allocation5 + $0xd40] sm:$0xff]  ;;  %v6827_v46 = vcombine.high %v558_v40, %v562_v41  ;;  %3404 = vmatprep.subr.bf16.mxu1 %v7203_v39  ;;  %v6826_v52 = vcombine.low %v558_v40, %v562_v41  ;;  %v555_v39 = vld [vmem:[#allocation5 + $0x128] sm:$0xff]  ;;  %v6812_v41 = vcombine.low %v543_v30, %v547_v31 }
 0x113   : > { %v946_v43 = vld [vmem:[#allocation5 + $0xd60] sm:$0xff]  ;;  %3405 = vmatpush1.bf16.msra.mxu1 %v7202_v45 }
 0x114   : > { %v7211_v47 = vcombine.high %v942_v42, %v946_v43  ;;  %v566_v48 = vld [vmem:[#allocation5 + $0x180] sm:$0xff]  ;;  %3283 = vmatprep.subr.bf16.mxu0 %v6827_v46  ;;  %v7210_v53 = vcombine.low %v942_v42, %v946_v43  ;;  %v6821_v43 = vcombine.high %v551_v38, %v555_v39  ;;  %v559_v46 = vld [vmem:[#allocation5 + $0x148] sm:$0xff] }
 0x115   : > { %v570_v49 = vld [vmem:[#allocation5 + $0x1a0] sm:$0xff]  ;;  %3284 = vmatpush1.bf16.msra.mxu0 %v6826_v52 }
 0x116   : > { %v950_v50 = vld [vmem:[#allocation5 + $0xd80] sm:$0xff]  ;;  %v6835_v54 = vcombine.high %v566_v48, %v570_v49  ;;  %3406 = vmatprep.subr.bf16.mxu1 %v7211_v47  ;;  %v6834_v62 = vcombine.low %v566_v48, %v570_v49  ;;  %v563_v47 = vld [vmem:[#allocation5 + $0x168] sm:$0xff]  ;;  %v6820_v49 = vcombine.low %v551_v38, %v555_v39 }
 0x117   : > { %v954_v51 = vld [vmem:[#allocation5 + $0xda0] sm:$0xff]  ;;  %3407 = vmatpush1.bf16.msra.mxu1 %v7210_v53 }
 0x118   : > { %v7219_v55 = vcombine.high %v950_v50, %v954_v51  ;;  %v574_v56 = vld [vmem:[#allocation5 + $0x1c0] sm:$0xff]  ;;  %3285 = vmatprep.subr.bf16.mxu0 %v6835_v54  ;;  %v7218_v63 = vcombine.low %v950_v50, %v954_v51  ;;  %v6829_v51 = vcombine.high %v559_v46, %v563_v47  ;;  %v567_v54 = vld [vmem:[#allocation5 + $0x188] sm:$0xff] }
 0x119   : > { %v578_v57 = vld [vmem:[#allocation5 + $0x1e0] sm:$0xff]  ;;  %3286 = vmatpush1.bf16.msra.mxu0 %v6834_v62 }
 0x11a   : > { %v9068_v58 = vld [vmem:[%s9044_s14] sm:$0xff]  ;;  %v6843_v0 = vcombine.high %v574_v56, %v578_v57  ;;  %3408 = vmatprep.subr.bf16.mxu1 %v7219_v55  ;;  %v6842_v7 = vcombine.low %v574_v56, %v578_v57  ;;  %v7855_v15 = vld [vmem:[%s9044_s14 + $0x18] ss:$0 sps:$4 sm:$0xff]   ;;  %v6828_v57 = vcombine.low %v559_v46, %v563_v47 }
 0x11b   : > { %v958_v59 = vld [vmem:[#allocation5 + $0xdc0] sm:$0xff]  ;;  %v9072_v61 = vcombine.high %v9068_v58, %v9068_v58  ;;  %3409 = vmatpush1.bf16.msra.mxu1 %v7218_v63  ;;  %v571_v55 = vld [vmem:[#allocation5 + $0x1a8] sm:$0xff] }
 0x11c   : > { %v962_v60 = vld [vmem:[#allocation5 + $0xde0] sm:$0xff]  ;;  %3287 = vmatprep.subr.bf16.mxu0 %v6843_v0  ;;  %v575_v0 = vld [vmem:[#allocation5 + $0x1c8] sm:$0xff] }
 0x11d   : > { %v7227_v2 = vcombine.high %v958_v59, %v962_v60  ;;  %v582_v3 = vld [vmem:[#allocation5 + $0x200] sm:$0xff]  ;;  %3305 = vmatprep.mubr.bf16.mxu0 %v9072_v61  ;;  %v7226_v8 = vcombine.low %v958_v59, %v962_v60  ;;  %3288 = vmatpush1.bf16.msra.mxu0 %v6842_v7  ;;  %v6837_v60 = vcombine.high %v567_v54, %v571_v55 }
 0x11e   : > { %v586_v4 = vld [vmem:[#allocation5 + $0x220] sm:$0xff] }
 0x11f   : > { %v6851_v9 = vcombine.high %v582_v3, %v586_v4  ;;  %3410 = vmatprep.subr.bf16.mxu1 %v7227_v2  ;;  %v590_v11 = vld [vmem:[#allocation5 + $0x240] sm:$0xff]  ;;  %v6850_v16 = vcombine.low %v582_v3, %v586_v4  ;;  %v579_v2 = vld [vmem:[#allocation5 + $0x1e8] sm:$0xff]  ;;  %v6836_v4 = vcombine.low %v567_v54, %v571_v55 }
 0x120   : > { %v594_v12 = vld [vmem:[#allocation5 + $0x260] sm:$0xff]  ;;  %3411 = vmatpush1.bf16.msra.mxu1 %v7226_v8  ;;  %v6845_v6 = vcombine.high %v575_v0, %v579_v2 }
 0x121   : > { %3289 = vmatprep.subr.bf16.mxu0 %v6851_v9  ;;  %v6859_v18 = vcombine.high %v590_v11, %v594_v12  ;;  %3437 = vmatprep.subr.bf16.mxu1 %v6789_v10  ;;  %v598_v20 = vld [vmem:[#allocation5 + $0x280] sm:$0xff]  ;;  %v6858_v24 = vcombine.low %v590_v11, %v594_v12  ;;  %v583_v9 = vld [vmem:[#allocation5 + $0x208] sm:$0xff]  ;;  %v6844_v12 = vcombine.low %v575_v0, %v579_v2 }
 0x122   : > { %v602_v21 = vld [vmem:[#allocation5 + $0x2a0] sm:$0xff]  ;;  %3290 = vmatpush1.bf16.msra.mxu0 %v6850_v16  ;;  %v587_v10 = vld [vmem:[#allocation5 + $0x228] sm:$0xff] }
 0x123   : > { %3429 = vmatmul.mubr.bf16.vlgmr.msra.gmra.mrb[0].mxu1 %v7855_v15  ;;  %3291 = vmatprep.subr.bf16.mxu0 %v6859_v18  ;;  %v6867_v26 = vcombine.high %v598_v20, %v602_v21  ;;  %v606_v28 = vld [vmem:[#allocation5 + $0x2c0] sm:$0xff]  ;;  %v6866_v32 = vcombine.low %v598_v20, %v602_v21  ;;  %v6853_v15 = vcombine.high %v583_v9, %v587_v10  ;;  %v595_v20 = vld [vmem:[#allocation5 + $0x268] sm:$0xff] }
 0x124   : > { %3438 = vmatpush1.bf16.msra.mxu1 %v6788_v17  ;;  %v610_v29 = vld [vmem:[#allocation5 + $0x2e0] sm:$0xff]  ;;  %3469 = vmatprep.mubr.bf16.mxu1 %v9072_v61  ;;  %v9082_v18 = vcombine.low %v9068_v58, %v9068_v58  ;;  %v6852_v23 = vcombine.low %v583_v9, %v587_v10 }
 0x125   : > { %3439 = vmatprep.subr.bf16.mxu1 %v6797_v19  ;;  %v6875_v34 = vcombine.high %v606_v28, %v610_v29  ;;  %v614_v36 = vld [vmem:[#allocation5 + $0x300] sm:$0xff]  ;;  %v6874_v40 = vcombine.low %v606_v28, %v610_v29  ;;  %v591_v19 = vld [vmem:[#allocation5 + $0x248] sm:$0xff] }
 0x126   : > { %3292 = vmatpush1.bf16.msra.mxu0 %v6858_v24  ;;  %v618_v37 = vld [vmem:[#allocation5 + $0x320] sm:$0xff]  ;;  %v599_v28 = vld [vmem:[#allocation5 + $0x288] sm:$0xff]  ;;  %v6860_v30 = vcombine.low %v591_v19, %v595_v20 }
 0x127   : > { %3293 = vmatprep.subr.bf16.mxu0 %v6867_v26  ;;  %v6883_v42 = vcombine.high %v614_v36, %v618_v37  ;;  %v622_v44 = vld [vmem:[#allocation5 + $0x340] sm:$0xff]  ;;  %v6882_v48 = vcombine.low %v614_v36, %v618_v37  ;;  %v6861_v26 = vcombine.high %v591_v19, %v595_v20  ;;  %v603_v29 = vld [vmem:[#allocation5 + $0x2a8] sm:$0xff] }
 0x128   : > { %3440 = vmatpush1.bf16.msra.mxu1 %v6796_v25  ;;  %v626_v45 = vld [vmem:[#allocation5 + $0x360] sm:$0xff]  ;;  %v611_v36 = vld [vmem:[#allocation5 + $0x2e8] sm:$0xff]  ;;  %v6868_v38 = vcombine.low %v599_v28, %v603_v29 }
 0x129   : > { %3441 = vmatprep.subr.bf16.mxu1 %v6805_v27  ;;  %v6891_v50 = vcombine.high %v622_v44, %v626_v45  ;;  %v630_v52 = vld [vmem:[#allocation5 + $0x380] sm:$0xff]  ;;  %v6890_v56 = vcombine.low %v622_v44, %v626_v45  ;;  %v619_v44 = vld [vmem:[#allocation5 + $0x328] sm:$0xff] }
 0x12a   : > { %3294 = vmatpush1.bf16.msra.mxu0 %v6866_v32  ;;  %v634_v53 = vld [vmem:[#allocation5 + $0x3a0] sm:$0xff] }
 0x12b   : > { %3295 = vmatprep.subr.bf16.mxu0 %v6875_v34  ;;  %v6899_v59 = vcombine.high %v630_v52, %v634_v53  ;;  %v638_v62 = vld [vmem:[#allocation5 + $0x3c0] sm:$0xff]  ;;  %v6898_v3 = vcombine.low %v630_v52, %v634_v53  ;;  %v607_v34 = vld [vmem:[#allocation5 + $0x2c8] sm:$0xff] }
 0x12c   : > { %3442 = vmatpush1.bf16.msra.mxu1 %v6804_v33  ;;  %v642_v63 = vld [vmem:[#allocation5 + $0x3e0] sm:$0xff]  ;;  %v6876_v46 = vcombine.low %v607_v34, %v611_v36  ;;  %v627_v52 = vld [vmem:[#allocation5 + $0x368] sm:$0xff] }
 0x12d   : > { %3443 = vmatprep.subr.bf16.mxu1 %v6813_v35  ;;  %v6907_v5 = vcombine.high %v638_v62, %v642_v63  ;;  %v646_v7 = vld [vmem:[#allocation5 + $0x400] sm:$0xff]  ;;  %v6906_v11 = vcombine.low %v638_v62, %v642_v63  ;;  %v6869_v35 = vcombine.high %v599_v28, %v603_v29  ;;  %v635_v62 = vld [vmem:[#allocation5 + $0x3a8] sm:$0xff] }
 0x12e   : > { %3296 = vmatpush1.bf16.msra.mxu0 %v6874_v40  ;;  %v650_v8 = vld [vmem:[#allocation5 + $0x420] sm:$0xff] }
 0x12f   : > { %3297 = vmatprep.subr.bf16.mxu0 %v6883_v42  ;;  %v6915_v13 = vcombine.high %v646_v7, %v650_v8  ;;  %v654_v16 = vld [vmem:[#allocation5 + $0x440] sm:$0xff]  ;;  %v6914_v21 = vcombine.low %v646_v7, %v650_v8  ;;  %v615_v42 = vld [vmem:[#allocation5 + $0x308] sm:$0xff] }
 0x130   : > { %3444 = vmatpush1.bf16.msra.mxu1 %v6812_v41  ;;  %v658_v17 = vld [vmem:[#allocation5 + $0x460] sm:$0xff]  ;;  %v6884_v54 = vcombine.low %v615_v42, %v619_v44  ;;  %v643_v7 = vld [vmem:[#allocation5 + $0x3e8] sm:$0xff] }
 0x131   : > { %3445 = vmatprep.subr.bf16.mxu1 %v6821_v43  ;;  %v6923_v24 = vcombine.high %v654_v16, %v658_v17  ;;  %v662_v25 = vld [vmem:[#allocation5 + $0x480] sm:$0xff]  ;;  %v6922_v58 = vcombine.low %v654_v16, %v658_v17  ;;  %v6877_v43 = vcombine.high %v607_v34, %v611_v36  ;;  %v651_v16 = vld [vmem:[#allocation5 + $0x428] sm:$0xff] }
 0x132   : > { %3298 = vmatpush1.bf16.msra.mxu0 %v6882_v48  ;;  %v666_v27 = vld [vmem:[#allocation5 + $0x4a0] sm:$0xff] }
 0x133   : > { %3299 = vmatprep.subr.bf16.mxu0 %v6891_v50  ;;  %v6931_v31 = vcombine.high %v662_v25, %v666_v27  ;;  %v670_v32 = vld [vmem:[#allocation5 + $0x4c0] sm:$0xff]  ;;  %v6930_v37 = vcombine.low %v662_v25, %v666_v27  ;;  %v623_v50 = vld [vmem:[#allocation5 + $0x348] sm:$0xff] }
 0x134   : > { %3446 = vmatpush1.bf16.msra.mxu1 %v6820_v49  ;;  %v674_v33 = vld [vmem:[#allocation5 + $0x4e0] sm:$0xff]  ;;  %v6892_v0 = vcombine.low %v623_v50, %v627_v52 }
 0x135   : > { %3447 = vmatprep.subr.bf16.mxu1 %v6829_v51  ;;  %v6939_v39 = vcombine.high %v670_v32, %v674_v33  ;;  %v678_v40 = vld [vmem:[#allocation5 + $0x500] sm:$0xff]  ;;  %v6938_v45 = vcombine.low %v670_v32, %v674_v33  ;;  %v6885_v51 = vcombine.high %v615_v42, %v619_v44  ;;  %v667_v33 = vld [vmem:[#allocation5 + $0x4a8] sm:$0xff] }
 0x136   : > { %3300 = vmatpush1.bf16.msra.mxu0 %v6890_v56  ;;  %v682_v41 = vld [vmem:[#allocation5 + $0x520] sm:$0xff] }
 0x137   : > { %3301 = vmatprep.subr.bf16.mxu0 %v6899_v59  ;;  %v6947_v47 = vcombine.high %v678_v40, %v682_v41  ;;  %v686_v48 = vld [vmem:[#allocation5 + $0x540] sm:$0xff]  ;;  %v6946_v53 = vcombine.low %v678_v40, %v682_v41  ;;  %v631_v59 = vld [vmem:[#allocation5 + $0x388] sm:$0xff] }
 0x138   : > { %3448 = vmatpush1.bf16.msra.mxu1 %v6828_v57  ;;  %v690_v49 = vld [vmem:[#allocation5 + $0x560] sm:$0xff]  ;;  %v6900_v9 = vcombine.low %v631_v59, %v635_v62  ;;  %v675_v41 = vld [vmem:[#allocation5 + $0x4e8] sm:$0xff] }
 0x139   : > { %3449 = vmatprep.subr.bf16.mxu1 %v6837_v60  ;;  %v6955_v55 = vcombine.high %v686_v48, %v690_v49  ;;  %v694_v56 = vld [vmem:[#allocation5 + $0x580] sm:$0xff]  ;;  %v6893_v60 = vcombine.high %v623_v50, %v627_v52  ;;  %v6954_v63 = vcombine.low %v686_v48, %v690_v49  ;;  %v683_v49 = vld [vmem:[#allocation5 + $0x528] sm:$0xff] }
 0x13a   : > { %3302 = vmatpush1.bf16.msra.mxu0 %v6898_v3  ;;  %v698_v57 = vld [vmem:[#allocation5 + $0x5a0] sm:$0xff] }
 0x13b   : > { %3303 = vmatprep.subr.bf16.mxu0 %v6907_v5  ;;  %v6963_v2 = vcombine.high %v694_v56, %v698_v57  ;;  %v702_v3 = vld [vmem:[#allocation5 + $0x5c0] sm:$0xff]  ;;  %v639_v5 = vld [vmem:[#allocation5 + $0x3c8] sm:$0xff]  ;;  %v6962_v8 = vcombine.low %v694_v56, %v698_v57 }
 0x13c   : > { %3450 = vmatpush1.bf16.msra.mxu1 %v6836_v4  ;;  %v706_v4 = vld [vmem:[#allocation5 + $0x5e0] sm:$0xff]  ;;  %v6908_v19 = vcombine.low %v639_v5, %v643_v7  ;;  %v691_v57 = vld [vmem:[#allocation5 + $0x568] sm:$0xff] }
 0x13d   : > { %3451 = vmatprep.subr.bf16.mxu1 %v6845_v6  ;;  %v6901_v6 = vcombine.high %v631_v59, %v635_v62  ;;  %v6971_v10 = vcombine.high %v702_v3, %v706_v4  ;;  %v6970_v17 = vcombine.low %v702_v3, %v706_v4  ;;  %v699_v4 = vld [vmem:[#allocation5 + $0x5a8] sm:$0xff] }
 0x13e   : > { %3304 = vmatpush1.bf16.msra.mxu0 %v6906_v11  ;;  %v710_v11 = vld [vmem:[#allocation5 + $0x600] sm:$0xff] }
 0x13f   : > { %3314 = vmatprep.subr.bf16.mxu0 %v6915_v13  ;;  %v647_v13 = vld [vmem:[#allocation5 + $0x408] sm:$0xff] }
 0x140   : > { %3452 = vmatpush1.bf16.msra.mxu1 %v6844_v12  ;;  %v714_v12 = vld [vmem:[#allocation5 + $0x620] sm:$0xff]  ;;  %v6917_v25 = vcombine.high %v647_v13, %v651_v16  ;;  %v6916_v28 = vcombine.low %v647_v13, %v651_v16 }
 0x141   : > { %3453 = vmatprep.subr.bf16.mxu1 %v6853_v15  ;;  %3306 = vmatmul.mubr.bf16.vlgmr.msra.gmra.mrb[0].mxu0 %v9082_v18  ;;  %v6909_v15 = vcombine.high %v639_v5, %v643_v7  ;;  %v6979_v20 = vcombine.high %v710_v11, %v714_v12  ;;  %v6978_v27 = vcombine.low %v710_v11, %v714_v12  ;;  %v707_v12 = vld [vmem:[#allocation5 + $0x5e8] sm:$0xff] }
 0x142   : > { %3315 = vmatpush1.bf16.msra.mxu0 %v6914_v21  ;;  %3346 = vmatprep.mubr.bf16.mxu0 %v9086_v22  ;;  %v718_v21 = vld [vmem:[#allocation5 + $0x640] sm:$0xff] }
 0x143   : > { %3316 = vmatprep.subr.bf16.mxu0 %v6923_v24  ;;  %v655_v24 = vld [vmem:[#allocation5 + $0x448] sm:$0xff] }
 0x144   : > { %3454 = vmatpush1.bf16.msra.mxu1 %v6852_v23  ;;  %v722_v23 = vld [vmem:[#allocation5 + $0x660] sm:$0xff] }
 0x145   : > { %3455 = vmatprep.subr.bf16.mxu1 %v6861_v26  ;;  %v659_v26 = vld [vmem:[#allocation5 + $0x468] sm:$0xff]  ;;  %v6987_v29 = vcombine.high %v718_v21, %v722_v23  ;;  %v6986_v34 = vcombine.low %v718_v21, %v722_v23 }
 0x146   : > { %3317 = vmatpush1.bf16.msra.mxu0 %v6922_v58  ;;  %v726_v58 = vld [vmem:[#allocation5 + $0x680] sm:$0xff]  ;;  %v6925_v32 = vcombine.high %v655_v24, %v659_v26  ;;  %v715_v23 = vld [vmem:[#allocation5 + $0x628] sm:$0xff] }
 0x147   : > { %3318 = vmatprep.subr.bf16.mxu0 %v6931_v31  ;;  %v663_v31 = vld [vmem:[#allocation5 + $0x488] sm:$0xff] }
 0x148   : > { %3456 = vmatpush1.bf16.msra.mxu1 %v6860_v30  ;;  %v730_v30 = vld [vmem:[#allocation5 + $0x6a0] sm:$0xff]  ;;  %v6933_v40 = vcombine.high %v663_v31, %v667_v33 }
 0x149   : > { %3457 = vmatprep.subr.bf16.mxu1 %v6869_v35  ;;  %v6924_v35 = vcombine.low %v655_v24, %v659_v26  ;;  %v6995_v36 = vcombine.high %v726_v58, %v730_v30  ;;  %v6994_v42 = vcombine.low %v726_v58, %v730_v30  ;;  %v9093_v58 = vld [vmem:[%s9044_s14 + $0x10] sm:$0xff] }
 0x14a   : > { %3319 = vmatpush1.bf16.msra.mxu0 %v6930_v37  ;;  %v734_v37 = vld [vmem:[#allocation5 + $0x6c0] sm:$0xff] }
 0x14b   : > { %3320 = vmatprep.subr.bf16.mxu0 %v6939_v39  ;;  %v671_v39 = vld [vmem:[#allocation5 + $0x4c8] sm:$0xff] }
 0x14c   : > { %3458 = vmatpush1.bf16.msra.mxu1 %v6868_v38  ;;  %v738_v38 = vld [vmem:[#allocation5 + $0x6e0] sm:$0xff]  ;;  %v6941_v48 = vcombine.high %v671_v39, %v675_v41 }
 0x14d   : > { %3459 = vmatprep.subr.bf16.mxu1 %v6877_v43  ;;  %v6932_v43 = vcombine.low %v663_v31, %v667_v33  ;;  %v7003_v44 = vcombine.high %v734_v37, %v738_v38  ;;  %v7002_v50 = vcombine.low %v734_v37, %v738_v38  ;;  %v723_v31 = vld [vmem:[#allocation5 + $0x668] sm:$0xff]  ;;  %v790_v37 = vld [vmem:[#allocation5 + $0x880] sm:$0xff] }
 0x14e   : > { %3321 = vmatpush1.bf16.msra.mxu0 %v6938_v45  ;;  %v742_v45 = vld [vmem:[#allocation5 + $0x700] sm:$0xff] }
 0x14f   : > { %3322 = vmatprep.subr.bf16.mxu0 %v6947_v47  ;;  %v679_v47 = vld [vmem:[#allocation5 + $0x508] sm:$0xff]  ;;  %v794_v38 = vld [vmem:[#allocation5 + $0x8a0] sm:$0xff] }
 0x150   : > { %3460 = vmatpush1.bf16.msra.mxu1 %v6876_v46  ;;  %v746_v46 = vld [vmem:[#allocation5 + $0x720] sm:$0xff]  ;;  %v6949_v56 = vcombine.high %v679_v47, %v683_v49 }
 0x151   : > { %3461 = vmatprep.subr.bf16.mxu1 %v6885_v51  ;;  %v6940_v51 = vcombine.low %v671_v39, %v675_v41  ;;  %v7011_v52 = vcombine.high %v742_v45, %v746_v46  ;;  %v7010_v59 = vcombine.low %v742_v45, %v746_v46  ;;  %v727_v39 = vld [vmem:[#allocation5 + $0x688] sm:$0xff]  ;;  %v802_v45 = vld [vmem:[#allocation5 + $0x8e0] sm:$0xff] }
 0x152   : > { %3323 = vmatpush1.bf16.msra.mxu0 %v6946_v53  ;;  %v750_v53 = vld [vmem:[#allocation5 + $0x740] sm:$0xff]  ;;  %v731_v41 = vld [vmem:[#allocation5 + $0x6a8] sm:$0xff] }
 0x153   : > { %3324 = vmatprep.subr.bf16.mxu0 %v6955_v55  ;;  %v687_v55 = vld [vmem:[#allocation5 + $0x548] sm:$0xff] }
 0x154   : > { %3462 = vmatpush1.bf16.msra.mxu1 %v6884_v54  ;;  %v754_v54 = vld [vmem:[#allocation5 + $0x760] sm:$0xff]  ;;  %v6957_v3 = vcombine.high %v687_v55, %v691_v57  ;;  %v735_v46 = vld [vmem:[#allocation5 + $0x6c8] sm:$0xff] }
 0x155   : > { %3463 = vmatprep.subr.bf16.mxu1 %v6893_v60  ;;  %v6948_v60 = vcombine.low %v679_v47, %v683_v49  ;;  %v7019_v62 = vcombine.high %v750_v53, %v754_v54  ;;  %v7018_v5 = vcombine.low %v750_v53, %v754_v54  ;;  %v6997_v47 = vcombine.high %v727_v39, %v731_v41  ;;  %v810_v53 = vld [vmem:[#allocation5 + $0x920] sm:$0xff]  ;;  %v743_v54 = vld [vmem:[#allocation5 + $0x708] sm:$0xff] }
 0x156   : > { %3325 = vmatpush1.bf16.msra.mxu0 %v6954_v63  ;;  %v758_v63 = vld [vmem:[#allocation5 + $0x780] sm:$0xff]  ;;  %v7058_v49 = vcombine.low %v790_v37, %v794_v38 }
 0x157   : > { %3326 = vmatprep.subr.bf16.mxu0 %v6963_v2  ;;  %v695_v2 = vld [vmem:[#allocation5 + $0x588] sm:$0xff] }
 0x158   : > { %3464 = vmatpush1.bf16.msra.mxu1 %v6892_v0  ;;  %v762_v0 = vld [vmem:[#allocation5 + $0x7a0] sm:$0xff]  ;;  %v6965_v11 = vcombine.high %v695_v2, %v699_v4 }
 0x159   : > { %3465 = vmatprep.subr.bf16.mxu1 %v6901_v6  ;;  %v6956_v6 = vcombine.low %v687_v55, %v691_v57  ;;  %v7027_v7 = vcombine.high %v758_v63, %v762_v0  ;;  %v7026_v13 = vcombine.low %v758_v63, %v762_v0  ;;  %v818_v63 = vld [vmem:[#allocation5 + $0x960] sm:$0xff]  ;;  %v751_v0 = vld [vmem:[#allocation5 + $0x748] sm:$0xff] }
 0x15a   : > { %3327 = vmatpush1.bf16.msra.mxu0 %v6962_v8  ;;  %v766_v8 = vld [vmem:[#allocation5 + $0x7c0] sm:$0xff] }
 0x15b   : > { %3328 = vmatprep.subr.bf16.mxu0 %v6971_v10  ;;  %v703_v10 = vld [vmem:[#allocation5 + $0x5c8] sm:$0xff] }
 0x15c   : > { %3466 = vmatpush1.bf16.msra.mxu1 %v6900_v9  ;;  %v770_v9 = vld [vmem:[#allocation5 + $0x7e0] sm:$0xff]  ;;  %v6973_v21 = vcombine.high %v703_v10, %v707_v12  ;;  %v6972_v26 = vcombine.low %v703_v10, %v707_v12 }
 0x15d   : > { %3467 = vmatprep.subr.bf16.mxu1 %v6909_v15  ;;  %v6964_v15 = vcombine.low %v695_v2, %v699_v4  ;;  %v7035_v16 = vcombine.high %v766_v8, %v770_v9  ;;  %v7034_v24 = vcombine.low %v766_v8, %v770_v9  ;;  %v826_v8 = vld [vmem:[#allocation5 + $0x9a0] sm:$0xff]  ;;  %v759_v9 = vld [vmem:[#allocation5 + $0x788] sm:$0xff] }
 0x15e   : > { %3329 = vmatpush1.bf16.msra.mxu0 %v6970_v17  ;;  %v774_v17 = vld [vmem:[#allocation5 + $0x800] sm:$0xff] }
 0x15f   : > { %3330 = vmatprep.subr.bf16.mxu0 %v6979_v20  ;;  %v711_v20 = vld [vmem:[#allocation5 + $0x608] sm:$0xff] }
 0x160   : > { %3468 = vmatpush1.bf16.msra.mxu1 %v6908_v19  ;;  %v778_v19 = vld [vmem:[#allocation5 + $0x820] sm:$0xff]  ;;  %v6981_v30 = vcombine.high %v711_v20, %v715_v23 }
 0x161   : > { %3478 = vmatprep.subr.bf16.mxu1 %v6917_v25  ;;  %v782_v25 = vld [vmem:[#allocation5 + $0x840] sm:$0xff]  ;;  %v7042_v33 = vcombine.low %v774_v17, %v778_v19 }
 0x162   : > { %3331 = vmatpush1.bf16.msra.mxu0 %v6978_v27  ;;  %v7043_v27 = vcombine.high %v774_v17, %v778_v19  ;;  %v834_v17 = vld [vmem:[#allocation5 + $0x9e0] sm:$0xff]  ;;  %v767_v19 = vld [vmem:[#allocation5 + $0x7c8] sm:$0xff] }
 0x163   : > { %3470 = vmatmul.mubr.bf16.vlgmr.msra.gmra.mrb[4].mxu1 %v9082_v18  ;;  %3332 = vmatprep.subr.bf16.mxu0 %v6987_v29  ;;  %v719_v29 = vld [vmem:[#allocation5 + $0x648] sm:$0xff] }
 0x164   : > { %3479 = vmatpush1.bf16.msra.mxu1 %v6916_v28  ;;  %3510 = vmatprep.mubr.bf16.mxu1 %v9086_v22  ;;  %v786_v28 = vld [vmem:[#allocation5 + $0x860] sm:$0xff] }
 0x165   : > { %3480 = vmatprep.subr.bf16.mxu1 %v6925_v32  ;;  %v9097_v32 = vcombine.low %v9078_v14, %v9078_v14  ;;  %v7050_v14 = vcombine.low %v782_v25, %v786_v28 }
 0x166   : > { %3333 = vmatpush1.bf16.msra.mxu0 %v6986_v34  ;;  %v9101_v34 = vcombine.high %v9093_v58, %v9093_v58 }
 0x167   : > { %3334 = vmatprep.subr.bf16.mxu0 %v6995_v36  ;;  %v7051_v36 = vcombine.high %v782_v25, %v786_v28  ;;  %v775_v28 = vld [vmem:[#allocation5 + $0x808] sm:$0xff] }
 0x168   : > { %3481 = vmatpush1.bf16.msra.mxu1 %v6924_v35  ;;  %v6980_v35 = vcombine.low %v711_v20, %v715_v23 }
 0x169   : > { %3482 = vmatprep.subr.bf16.mxu1 %v6933_v40  ;;  %v6989_v40 = vcombine.high %v719_v29, %v723_v31 }
 0x16a   : > { %3335 = vmatpush1.bf16.msra.mxu0 %v6994_v42  ;;  %v6988_v42 = vcombine.low %v719_v29, %v723_v31 }
 0x16b   : > { %3336 = vmatprep.subr.bf16.mxu0 %v7003_v44  ;;  %v798_v44 = vld [vmem:[#allocation5 + $0x8c0] sm:$0xff] }
 0x16c   : > { %3483 = vmatpush1.bf16.msra.mxu1 %v6932_v43  ;;  %v7059_v43 = vcombine.high %v790_v37, %v794_v38  ;;  %v7066_v57 = vcombine.low %v798_v44, %v802_v45  ;;  %v850_v37 = vld [vmem:[#allocation5 + $0xa60] sm:$0xff]  ;;  %v783_v38 = vld [vmem:[#allocation5 + $0x848] sm:$0xff] }
 0x16d   : > { %3484 = vmatprep.subr.bf16.mxu1 %v6941_v48  ;;  %v739_v48 = vld [vmem:[#allocation5 + $0x6e8] sm:$0xff] }
 0x16e   : > { %3337 = vmatpush1.bf16.msra.mxu0 %v7002_v50  ;;  %v6996_v50 = vcombine.low %v727_v39, %v731_v41  ;;  %v7005_v55 = vcombine.high %v735_v46, %v739_v48 }
 0x16f   : > { %3338 = vmatprep.subr.bf16.mxu0 %v7011_v52  ;;  %v806_v52 = vld [vmem:[#allocation5 + $0x900] sm:$0xff] }
 0x170   : > { %3485 = vmatpush1.bf16.msra.mxu1 %v6940_v51  ;;  %v7067_v51 = vcombine.high %v798_v44, %v802_v45  ;;  %v7074_v4 = vcombine.low %v806_v52, %v810_v53  ;;  %v858_v44 = vld [vmem:[#allocation5 + $0xaa0] sm:$0xff]  ;;  %v791_v45 = vld [vmem:[#allocation5 + $0x888] sm:$0xff] }
 0x171   : > { %3486 = vmatprep.subr.bf16.mxu1 %v6949_v56  ;;  %v747_v56 = vld [vmem:[#allocation5 + $0x728] sm:$0xff] }
 0x172   : > { %3339 = vmatpush1.bf16.msra.mxu0 %v7010_v59  ;;  %v7004_v59 = vcombine.low %v735_v46, %v739_v48  ;;  %v7013_v2 = vcombine.high %v743_v54, %v747_v56 }
 0x173   : > { %3340 = vmatprep.subr.bf16.mxu0 %v7019_v62  ;;  %v814_v62 = vld [vmem:[#allocation5 + $0x940] sm:$0xff] }
 0x174   : > { %3487 = vmatpush1.bf16.msra.mxu1 %v6948_v60  ;;  %v7075_v60 = vcombine.high %v806_v52, %v810_v53  ;;  %v7082_v12 = vcombine.low %v814_v62, %v818_v63  ;;  %v866_v52 = vld [vmem:[#allocation5 + $0xae0] sm:$0xff]  ;;  %v799_v53 = vld [vmem:[#allocation5 + $0x8c8] sm:$0xff] }
 0x175   : > { %3488 = vmatprep.subr.bf16.mxu1 %v6957_v3  ;;  %v755_v3 = vld [vmem:[#allocation5 + $0x768] sm:$0xff] }
 0x176   : > { %3341 = vmatpush1.bf16.msra.mxu0 %v7018_v5  ;;  %v7012_v5 = vcombine.low %v743_v54, %v747_v56  ;;  %v7021_v10 = vcombine.high %v751_v0, %v755_v3 }
 0x177   : > { %3342 = vmatprep.subr.bf16.mxu0 %v7027_v7  ;;  %v822_v7 = vld [vmem:[#allocation5 + $0x980] sm:$0xff] }
 0x178   : > { %3489 = vmatpush1.bf16.msra.mxu1 %v6956_v6  ;;  %v7083_v6 = vcombine.high %v814_v62, %v818_v63  ;;  %v7090_v23 = vcombine.low %v822_v7, %v826_v8  ;;  %v874_v62 = vld [vmem:[#allocation5 + $0xb20] sm:$0xff]  ;;  %v807_v63 = vld [vmem:[#allocation5 + $0x908] sm:$0xff] }
 0x179   : > { %3490 = vmatprep.subr.bf16.mxu1 %v6965_v11  ;;  %v763_v11 = vld [vmem:[#allocation5 + $0x7a8] sm:$0xff] }
 0x17a   : > { %3343 = vmatpush1.bf16.msra.mxu0 %v7026_v13  ;;  %v7020_v13 = vcombine.low %v751_v0, %v755_v3  ;;  %v7029_v20 = vcombine.high %v759_v9, %v763_v11 }
 0x17b   : > { %3344 = vmatprep.subr.bf16.mxu0 %v7035_v16  ;;  %v830_v16 = vld [vmem:[#allocation5 + $0x9c0] sm:$0xff] }
 0x17c   : > { %3491 = vmatpush1.bf16.msra.mxu1 %v6964_v15  ;;  %v7091_v15 = vcombine.high %v822_v7, %v826_v8  ;;  %v7099_v25 = vcombine.high %v830_v16, %v834_v17  ;;  %v7098_v31 = vcombine.low %v830_v16, %v834_v17  ;;  %v882_v7 = vld [vmem:[#allocation5 + $0xb60] sm:$0xff]  ;;  %v815_v8 = vld [vmem:[#allocation5 + $0x948] sm:$0xff] }
 0x17d   : > { %3492 = vmatprep.subr.bf16.mxu1 %v6973_v21  ;;  %v771_v21 = vld [vmem:[#allocation5 + $0x7e8] sm:$0xff]  ;;  %v890_v16 = vld [vmem:[#allocation5 + $0xba0] sm:$0xff] }
 0x17e   : > { %3345 = vmatpush1.bf16.msra.mxu0 %v7034_v24  ;;  %v7028_v24 = vcombine.low %v759_v9, %v763_v11  ;;  %v7037_v29 = vcombine.high %v767_v19, %v771_v21  ;;  %v823_v17 = vld [vmem:[#allocation5 + $0x988] sm:$0xff] }
 0x17f   : > { %3355 = vmatprep.subr.bf16.mxu0 %v7043_v27  ;;  %v842_v27 = vld [vmem:[#allocation5 + $0xa20] sm:$0xff] }
 0x180   : > { %3493 = vmatpush1.bf16.msra.mxu1 %v6972_v26  ;;  %v838_v26 = vld [vmem:[#allocation5 + $0xa00] sm:$0xff] }
 0x181   : > { %3494 = vmatprep.subr.bf16.mxu1 %v6981_v30  ;;  %3347 = vmatmul.mubr.bf16.vlgmr.msra.gmra.mrb[0].mxu0 %v9097_v32  ;;  %v779_v30 = vld [vmem:[#allocation5 + $0x828] sm:$0xff]  ;;  %v7106_v41 = vcombine.low %v838_v26, %v842_v27 }
 0x182   : > { %3356 = vmatpush1.bf16.msra.mxu0 %v7042_v33  ;;  %3387 = vmatprep.mubr.bf16.mxu0 %v9101_v34  ;;  %v7036_v33 = vcombine.low %v767_v19, %v771_v21  ;;  %v7045_v39 = vcombine.high %v775_v28, %v779_v30 }
 0x183   : > { %3357 = vmatprep.subr.bf16.mxu0 %v7051_v36  ;;  %v846_v36 = vld [vmem:[#allocation5 + $0xa40] sm:$0xff] }
 0x184   : > { %3495 = vmatpush1.bf16.msra.mxu1 %v6980_v35  ;;  %v7107_v35 = vcombine.high %v838_v26, %v842_v27  ;;  %v7114_v48 = vcombine.low %v846_v36, %v850_v37  ;;  %v898_v26 = vld [vmem:[#allocation5 + $0xbe0] sm:$0xff]  ;;  %v831_v27 = vld [vmem:[#allocation5 + $0x9c8] sm:$0xff] }
 0x185   : > { %3496 = vmatprep.subr.bf16.mxu1 %v6989_v40  ;;  %v787_v40 = vld [vmem:[#allocation5 + $0x868] sm:$0xff] }
 0x186   : > { %3358 = vmatpush1.bf16.msra.mxu0 %v7050_v14  ;;  %v7044_v14 = vcombine.low %v775_v28, %v779_v30  ;;  %v7053_v46 = vcombine.high %v783_v38, %v787_v40 }
 0x187   : > { %3359 = vmatprep.subr.bf16.mxu0 %v7059_v43  ;;  %v854_v43 = vld [vmem:[#allocation5 + $0xa80] sm:$0xff] }
 0x188   : > { %3497 = vmatpush1.bf16.msra.mxu1 %v6988_v42  ;;  %v7115_v42 = vcombine.high %v846_v36, %v850_v37  ;;  %v7122_v56 = vcombine.low %v854_v43, %v858_v44  ;;  %v843_v36 = vld [vmem:[#allocation5 + $0xa28] sm:$0xff]  ;;  %v520_v37 = vld [vmem:[#allocation5 + $0x10] sm:$0xff] }
 0x189   : > { %3498 = vmatprep.subr.bf16.mxu1 %v6997_v47  ;;  %v795_v47 = vld [vmem:[#allocation5 + $0x8a8] sm:$0xff] }
 0x18a   : > { %3360 = vmatpush1.bf16.msra.mxu0 %v7058_v49  ;;  %v7052_v49 = vcombine.low %v783_v38, %v787_v40  ;;  %v7061_v54 = vcombine.high %v791_v45, %v795_v47 }
 0x18b   : > { %3361 = vmatprep.subr.bf16.mxu0 %v7067_v51  ;;  %v862_v51 = vld [vmem:[#allocation5 + $0xac0] sm:$0xff] }
 0x18c   : > { %3499 = vmatpush1.bf16.msra.mxu1 %v6996_v50  ;;  %v7123_v50 = vcombine.high %v854_v43, %v858_v44  ;;  %v7130_v3 = vcombine.low %v862_v51, %v866_v52  ;;  %v851_v43 = vld [vmem:[#allocation5 + $0xa68] sm:$0xff]  ;;  %v528_v44 = vld [vmem:[#allocation5 + $0x50] sm:$0xff] }
 0x18d   : > { %3500 = vmatprep.subr.bf16.mxu1 %v7005_v55  ;;  %v803_v55 = vld [vmem:[#allocation5 + $0x8e8] sm:$0xff] }
 0x18e   : > { %3362 = vmatpush1.bf16.msra.mxu0 %v7066_v57  ;;  %v7060_v57 = vcombine.low %v791_v45, %v795_v47  ;;  %v7069_v0 = vcombine.high %v799_v53, %v803_v55  ;;  %v9109_v47 = vcombine.low %v9093_v58, %v9093_v58 }
 0x18f   : > { %3363 = vmatprep.subr.bf16.mxu0 %v7075_v60  ;;  %v870_v60 = vld [vmem:[#allocation5 + $0xb00] sm:$0xff] }
 0x190   : > { %3501 = vmatpush1.bf16.msra.mxu1 %v7004_v59  ;;  %v7131_v59 = vcombine.high %v862_v51, %v866_v52  ;;  %v7138_v11 = vcombine.low %v870_v60, %v874_v62  ;;  %v855_v51 = vld [vmem:[#allocation5 + $0xa88] sm:$0xff] }
 0x191   : > { %3502 = vmatprep.subr.bf16.mxu1 %v7013_v2  ;;  %v811_v2 = vld [vmem:[#allocation5 + $0x928] sm:$0xff] }
 0x192   : > { %3364 = vmatpush1.bf16.msra.mxu0 %v7074_v4  ;;  %v7068_v4 = vcombine.low %v799_v53, %v803_v55  ;;  %v7077_v9 = vcombine.high %v807_v63, %v811_v2  ;;  %v859_v52 = vld [vmem:[#allocation5 + $0xaa8] sm:$0xff]  ;;  %v536_v53 = vld [vmem:[#allocation5 + $0x90] sm:$0xff] }
 0x193   : > { %3365 = vmatprep.subr.bf16.mxu0 %v7083_v6  ;;  %v878_v6 = vld [vmem:[#allocation5 + $0xb40] sm:$0xff]  ;;  %v540_v55 = vld [vmem:[#allocation5 + $0xb0] sm:$0xff] }
 0x194   : > { %3503 = vmatpush1.bf16.msra.mxu1 %v7012_v5  ;;  %v7139_v5 = vcombine.high %v870_v60, %v874_v62  ;;  %v7146_v21 = vcombine.low %v878_v6, %v882_v7  ;;  %v867_v60 = vld [vmem:[#allocation5 + $0xae8] sm:$0xff]  ;;  %v544_v62 = vld [vmem:[#allocation5 + $0xd0] sm:$0xff] }
 0x195   : > { %3504 = vmatprep.subr.bf16.mxu1 %v7021_v10  ;;  %v819_v10 = vld [vmem:[#allocation5 + $0x968] sm:$0xff] }
 0x196   : > { %3366 = vmatpush1.bf16.msra.mxu0 %v7082_v12  ;;  %v7076_v12 = vcombine.low %v807_v63, %v811_v2  ;;  %v7085_v19 = vcombine.high %v815_v8, %v819_v10  ;;  %v7125_v63 = vcombine.high %v855_v51, %v859_v52  ;;  %v6806_v2 = vcombine.low %v536_v53, %v540_v55 }
 0x197   : > { %3367 = vmatprep.subr.bf16.mxu0 %v7091_v15  ;;  %v886_v15 = vld [vmem:[#allocation5 + $0xb80] sm:$0xff] }
 0x198   : > { %3505 = vmatpush1.bf16.msra.mxu1 %v7020_v13  ;;  %v7147_v13 = vcombine.high %v878_v6, %v882_v7  ;;  %v7154_v30 = vcombine.low %v886_v15, %v890_v16  ;;  %v875_v6 = vld [vmem:[#allocation5 + $0xb28] sm:$0xff]  ;;  %v552_v7 = vld [vmem:[#allocation5 + $0x110] sm:$0xff] }
 0x199   : > { %3506 = vmatprep.subr.bf16.mxu1 %v7029_v20  ;;  %v827_v20 = vld [vmem:[#allocation5 + $0x9a8] sm:$0xff] }
 0x19a   : > { %3368 = vmatpush1.bf16.msra.mxu0 %v7090_v23  ;;  %v7084_v23 = vcombine.low %v815_v8, %v819_v10  ;;  %v7093_v28 = vcombine.high %v823_v17, %v827_v20 }
 0x19b   : > { %3369 = vmatprep.subr.bf16.mxu0 %v7099_v25  ;;  %v894_v25 = vld [vmem:[#allocation5 + $0xbc0] sm:$0xff] }
 0x19c   : > { %3507 = vmatpush1.bf16.msra.mxu1 %v7028_v24  ;;  %v7155_v24 = vcombine.high %v886_v15, %v890_v16  ;;  %v7162_v40 = vcombine.low %v894_v25, %v898_v26  ;;  %v883_v15 = vld [vmem:[#allocation5 + $0xb68] sm:$0xff]  ;;  %v560_v16 = vld [vmem:[#allocation5 + $0x150] sm:$0xff] }
 0x19d   : > { %3508 = vmatprep.subr.bf16.mxu1 %v7037_v29  ;;  %v835_v29 = vld [vmem:[#allocation5 + $0x9e8] sm:$0xff] }
 0x19e   : > { %3370 = vmatpush1.bf16.msra.mxu0 %v7098_v31  ;;  %v7092_v31 = vcombine.low %v823_v17, %v827_v20  ;;  %v7101_v38 = vcombine.high %v831_v27, %v835_v29 }
 0x19f   : > { %3371 = vmatprep.subr.bf16.mxu0 %v7107_v35  ;;  %v839_v35 = vld [vmem:[#allocation5 + $0xa08] sm:$0xff] }
 0x1a0   : > { %3509 = vmatpush1.bf16.msra.mxu1 %v7036_v33  ;;  %v7163_v33 = vcombine.high %v894_v25, %v898_v26  ;;  %v7109_v45 = vcombine.high %v839_v35, %v843_v36  ;;  %v891_v25 = vld [vmem:[#allocation5 + $0xba8] sm:$0xff]  ;;  %v568_v26 = vld [vmem:[#allocation5 + $0x190] sm:$0xff] }
 0x1a1   : > { %3519 = vmatprep.subr.bf16.mxu1 %v7045_v39  ;;  %v524_v39 = vld [vmem:[#allocation5 + $0x30] sm:$0xff] }
 0x1a2   : > { %3372 = vmatpush1.bf16.msra.mxu0 %v7106_v41  ;;  %v7100_v41 = vcombine.low %v831_v27, %v835_v29 }
 0x1a3   : > { %3511 = vmatmul.mubr.bf16.vlgmr.msra.gmra.mrb[4].mxu1 %v9097_v32  ;;  %3373 = vmatprep.subr.bf16.mxu0 %v7115_v42  ;;  %v847_v42 = vld [vmem:[#allocation5 + $0xa48] sm:$0xff] }
 0x1a4   : > { %3520 = vmatpush1.bf16.msra.mxu1 %v7044_v14  ;;  %3551 = vmatprep.mubr.bf16.mxu1 %v9101_v34  ;;  %v6791_v14 = vcombine.high %v520_v37, %v524_v39  ;;  %v7116_v58 = vcombine.low %v847_v42, %v851_v43 }
 0x1a5   : > { %3521 = vmatprep.subr.bf16.mxu1 %v7053_v46  ;;  %v532_v46 = vld [vmem:[#allocation5 + $0x70] sm:$0xff] }
 0x1a6   : > { %3374 = vmatpush1.bf16.msra.mxu0 %v7114_v48  ;;  %v6790_v48 = vcombine.low %v520_v37, %v524_v39 }
 0x1a7   : > { %3375 = vmatprep.subr.bf16.mxu0 %v7123_v50  ;;  %v6799_v50 = vcombine.high %v528_v44, %v532_v46 }
 0x1a8   : > { %3522 = vmatpush1.bf16.msra.mxu1 %v7052_v49  ;;  %v7108_v49 = vcombine.low %v839_v35, %v843_v36  ;;  %v899_v35 = vld [vmem:[#allocation5 + $0xbe8] sm:$0xff]  ;;  %v576_v36 = vld [vmem:[#allocation5 + $0x1d0] sm:$0xff] }
 0x1a9   : > { %3523 = vmatprep.subr.bf16.mxu1 %v7061_v54  ;;  %v7117_v54 = vcombine.high %v847_v42, %v851_v43  ;;  %v907_v42 = vld [vmem:[#allocation5 + $0xc28] sm:$0xff]  ;;  %v584_v43 = vld [vmem:[#allocation5 + $0x210] sm:$0xff] }
 0x1aa   : > { %3376 = vmatpush1.bf16.msra.mxu0 %v7122_v56  ;;  %v6798_v56 = vcombine.low %v528_v44, %v532_v46 }
 0x1ab   : > { %3377 = vmatprep.subr.bf16.mxu0 %v7131_v59  ;;  %v863_v59 = vld [vmem:[#allocation5 + $0xac8] sm:$0xff] }
 0x1ac   : > { %3524 = vmatpush1.bf16.msra.mxu1 %v7060_v57  ;;  %v6807_v57 = vcombine.high %v536_v53, %v540_v55  ;;  %v7133_v8 = vcombine.high %v863_v59, %v867_v60 }
 0x1ad   : > { %3525 = vmatprep.subr.bf16.mxu1 %v7069_v0  ;;  %v548_v0 = vld [vmem:[#allocation5 + $0xf0] sm:$0xff] }
 0x1ae   : > { %3378 = vmatpush1.bf16.msra.mxu0 %v7130_v3  ;;  %v7124_v3 = vcombine.low %v855_v51, %v859_v52  ;;  %v6814_v10 = vcombine.low %v544_v62, %v548_v0  ;;  %v915_v51 = vld [vmem:[#allocation5 + $0xc68] sm:$0xff]  ;;  %v592_v52 = vld [vmem:[#allocation5 + $0x250] sm:$0xff] }
 0x1af   : > { %3379 = vmatprep.subr.bf16.mxu0 %v7139_v5  ;;  %v871_v5 = vld [vmem:[#allocation5 + $0xb08] sm:$0xff] }
 0x1b0   : > { %3526 = vmatpush1.bf16.msra.mxu1 %v7068_v4  ;;  %v6815_v4 = vcombine.high %v544_v62, %v548_v0  ;;  %v7141_v17 = vcombine.high %v871_v5, %v875_v6 }
 0x1b1   : > { %3527 = vmatprep.subr.bf16.mxu1 %v7077_v9  ;;  %v556_v9 = vld [vmem:[#allocation5 + $0x130] sm:$0xff] }
 0x1b2   : > { %3380 = vmatpush1.bf16.msra.mxu0 %v7138_v11  ;;  %v7132_v11 = vcombine.low %v863_v59, %v867_v60  ;;  %v6822_v20 = vcombine.low %v552_v7, %v556_v9  ;;  %v923_v59 = vld [vmem:[#allocation5 + $0xca8] sm:$0xff]  ;;  %v600_v60 = vld [vmem:[#allocation5 + $0x290] sm:$0xff] }
 0x1b3   : > { %3381 = vmatprep.subr.bf16.mxu0 %v7147_v13  ;;  %v879_v13 = vld [vmem:[#allocation5 + $0xb48] sm:$0xff] }
 0x1b4   : > { %3528 = vmatpush1.bf16.msra.mxu1 %v7076_v12  ;;  %v6823_v12 = vcombine.high %v552_v7, %v556_v9  ;;  %v7149_v27 = vcombine.high %v879_v13, %v883_v15 }
 0x1b5   : > { %3529 = vmatprep.subr.bf16.mxu1 %v7085_v19  ;;  %v564_v19 = vld [vmem:[#allocation5 + $0x170] sm:$0xff] }
 0x1b6   : > { %3382 = vmatpush1.bf16.msra.mxu0 %v7146_v21  ;;  %v7140_v21 = vcombine.low %v871_v5, %v875_v6  ;;  %v6830_v29 = vcombine.low %v560_v16, %v564_v19  ;;  %v931_v5 = vld [vmem:[#allocation5 + $0xce8] sm:$0xff]  ;;  %v608_v6 = vld [vmem:[#allocation5 + $0x2d0] sm:$0xff] }
 0x1b7   : > { %3383 = vmatprep.subr.bf16.mxu0 %v7155_v24  ;;  %v887_v24 = vld [vmem:[#allocation5 + $0xb88] sm:$0xff] }
 0x1b8   : > { %3530 = vmatpush1.bf16.msra.mxu1 %v7084_v23  ;;  %v6831_v23 = vcombine.high %v560_v16, %v564_v19  ;;  %v7157_v37 = vcombine.high %v887_v24, %v891_v25 }
 0x1b9   : > { %3531 = vmatprep.subr.bf16.mxu1 %v7093_v28  ;;  %v572_v28 = vld [vmem:[#allocation5 + $0x1b0] sm:$0xff] }
 0x1ba   : > { %3384 = vmatpush1.bf16.msra.mxu0 %v7154_v30  ;;  %v7148_v30 = vcombine.low %v879_v13, %v883_v15  ;;  %v6838_v39 = vcombine.low %v568_v26, %v572_v28  ;;  %v939_v13 = vld [vmem:[#allocation5 + $0xd28] sm:$0xff]  ;;  %v616_v15 = vld [vmem:[#allocation5 + $0x310] sm:$0xff] }
 0x1bb   : > { %3385 = vmatprep.subr.bf16.mxu0 %v7163_v33  ;;  %v895_v33 = vld [vmem:[#allocation5 + $0xbc8] sm:$0xff] }
 0x1bc   : > { %3532 = vmatpush1.bf16.msra.mxu1 %v7092_v31  ;;  %v6839_v31 = vcombine.high %v568_v26, %v572_v28  ;;  %v7165_v44 = vcombine.high %v895_v33, %v899_v35 }
 0x1bd   : > { %3533 = vmatprep.subr.bf16.mxu1 %v7101_v38  ;;  %v580_v38 = vld [vmem:[#allocation5 + $0x1f0] sm:$0xff] }
 0x1be   : > { %3386 = vmatpush1.bf16.msra.mxu0 %v7162_v40  ;;  %v7156_v40 = vcombine.low %v887_v24, %v891_v25  ;;  %v6846_v46 = vcombine.low %v576_v36, %v580_v38  ;;  %v947_v24 = vld [vmem:[#allocation5 + $0xd68] sm:$0xff]  ;;  %v624_v25 = vld [vmem:[#allocation5 + $0x350] sm:$0xff] }
 0x1bf   : > { %3601 = vmatprep.subr.bf16.mxu0 %v6791_v14  ;;  %v903_v14 = vld [vmem:[#allocation5 + $0xc08] sm:$0xff] }
 0x1c0   : > { %3534 = vmatpush1.bf16.msra.mxu1 %v7100_v41  ;;  %v6847_v41 = vcombine.high %v576_v36, %v580_v38  ;;  %v7173_v53 = vcombine.high %v903_v14, %v907_v42 }
 0x1c1   : > { %3535 = vmatprep.subr.bf16.mxu1 %v7109_v45  ;;  %3388 = vmatmul.mubr.bf16.vlgmr.msra.gmra.mrb[0].mxu0 %v9109_v47  ;;  %v588_v45 = vld [vmem:[#allocation5 + $0x230] sm:$0xff] }
 0x1c2   : > { %3602 = vmatpush1.bf16.msra.mxu0 %v6790_v48  ;;  %3633 = vmatprep.mubr.bf16.mxu0 %v9072_v61  ;;  %v7164_v48 = vcombine.low %v895_v33, %v899_v35  ;;  %v6854_v55 = vcombine.low %v584_v43, %v588_v45  ;;  %v955_v33 = vld [vmem:[#allocation5 + $0xda8] sm:$0xff]  ;;  %v632_v35 = vld [vmem:[#allocation5 + $0x390] sm:$0xff] }
 0x1c3   : > { %3603 = vmatprep.subr.bf16.mxu0 %v6799_v50  ;;  %v911_v50 = vld [vmem:[#allocation5 + $0xc48] sm:$0xff] }
 0x1c4   : > { %3536 = vmatpush1.bf16.msra.mxu1 %v7108_v49  ;;  %v6855_v49 = vcombine.high %v584_v43, %v588_v45  ;;  %v7181_v62 = vcombine.high %v911_v50, %v915_v51  ;;  %v644_v43 = vld [vmem:[#allocation5 + $0x3f0] sm:$0xff]  ;;  %v963_v45 = vld [vmem:[#allocation5 + $0xde8] sm:$0xff] }
 0x1c5   : > { %3537 = vmatprep.subr.bf16.mxu1 %v7117_v54  ;;  %v596_v54 = vld [vmem:[#allocation5 + $0x270] sm:$0xff] }
 0x1c6   : > { %3604 = vmatpush1.bf16.msra.mxu0 %v6798_v56  ;;  %v7172_v56 = vcombine.low %v903_v14, %v907_v42  ;;  %v6862_v0 = vcombine.low %v592_v52, %v596_v54  ;;  %v640_v14 = vld [vmem:[#allocation5 + $0x3d0] sm:$0xff] }
 0x1c7   : > { %3605 = vmatprep.subr.bf16.mxu0 %v6807_v57  ;;  %v919_v57 = vld [vmem:[#allocation5 + $0xc88] sm:$0xff] }
 0x1c8   : > { %3538 = vmatpush1.bf16.msra.mxu1 %v7116_v58  ;;  %v6863_v58 = vcombine.high %v592_v52, %v596_v54  ;;  %v7189_v7 = vcombine.high %v919_v57, %v923_v59  ;;  %v648_v52 = vld [vmem:[#allocation5 + $0x410] sm:$0xff] }
 0x1c9   : > { %3539 = vmatprep.subr.bf16.mxu1 %v7125_v63  ;;  %v604_v63 = vld [vmem:[#allocation5 + $0x2b0] sm:$0xff] }
 0x1ca   : > { %3606 = vmatpush1.bf16.msra.mxu0 %v6806_v2  ;;  %v7180_v2 = vcombine.low %v911_v50, %v915_v51  ;;  %v6870_v9 = vcombine.low %v600_v60, %v604_v63  ;;  %v6911_v51 = vcombine.high %v640_v14, %v644_v43 }
 0x1cb   : > { %3607 = vmatprep.subr.bf16.mxu0 %v6815_v4  ;;  %v927_v4 = vld [vmem:[#allocation5 + $0xcc8] sm:$0xff] }
 0x1cc   : > { %3540 = vmatpush1.bf16.msra.mxu1 %v7124_v3  ;;  %v6871_v3 = vcombine.high %v600_v60, %v604_v63  ;;  %v7197_v16 = vcombine.high %v927_v4, %v931_v5  ;;  %v656_v63 = vld [vmem:[#allocation5 + $0x450] sm:$0xff] }
 0x1cd   : > { %3541 = vmatprep.subr.bf16.mxu1 %v7133_v8  ;;  %v612_v8 = vld [vmem:[#allocation5 + $0x2f0] sm:$0xff] }
 0x1ce   : > { %3608 = vmatpush1.bf16.msra.mxu0 %v6814_v10  ;;  %v7188_v10 = vcombine.low %v919_v57, %v923_v59  ;;  %v6878_v19 = vcombine.low %v608_v6, %v612_v8  ;;  %v6910_v57 = vcombine.low %v640_v14, %v644_v43 }
 0x1cf   : > { %3609 = vmatprep.subr.bf16.mxu0 %v6823_v12  ;;  %v935_v12 = vld [vmem:[#allocation5 + $0xd08] sm:$0xff] }
 0x1d0   : > { %3542 = vmatpush1.bf16.msra.mxu1 %v7132_v11  ;;  %v6879_v11 = vcombine.high %v608_v6, %v612_v8  ;;  %v7205_v26 = vcombine.high %v935_v12, %v939_v13  ;;  %v664_v8 = vld [vmem:[#allocation5 + $0x490] sm:$0xff] }
 0x1d1   : > { %3543 = vmatprep.subr.bf16.mxu1 %v7141_v17  ;;  %v620_v17 = vld [vmem:[#allocation5 + $0x330] sm:$0xff] }
 0x1d2   : > { %3610 = vmatpush1.bf16.msra.mxu0 %v6822_v20  ;;  %v7196_v20 = vcombine.low %v927_v4, %v931_v5  ;;  %v6886_v28 = vcombine.low %v616_v15, %v620_v17 }
 0x1d3   : > { %3611 = vmatprep.subr.bf16.mxu0 %v6831_v23  ;;  %v943_v23 = vld [vmem:[#allocation5 + $0xd48] sm:$0xff] }
 0x1d4   : > { %3544 = vmatpush1.bf16.msra.mxu1 %v7140_v21  ;;  %v6887_v21 = vcombine.high %v616_v15, %v620_v17  ;;  %v7213_v36 = vcombine.high %v943_v23, %v947_v24 }
 0x1d5   : > { %3545 = vmatprep.subr.bf16.mxu1 %v7149_v27  ;;  %v628_v27 = vld [vmem:[#allocation5 + $0x370] sm:$0xff] }
 0x1d6   : > { %3612 = vmatpush1.bf16.msra.mxu0 %v6830_v29  ;;  %v7204_v29 = vcombine.low %v935_v12, %v939_v13  ;;  %v6894_v38 = vcombine.low %v624_v25, %v628_v27  ;;  %v9121_v12 = vld [vmem:[%s9044_s14 + $0x18] ss:$0 sps:$4 sm:$0xff]  }
 0x1d7   : > { %3613 = vmatprep.subr.bf16.mxu0 %v6839_v31  ;;  %v951_v31 = vld [vmem:[#allocation5 + $0xd88] sm:$0xff] }
 0x1d8   : > { %3546 = vmatpush1.bf16.msra.mxu1 %v7148_v30  ;;  %v6895_v30 = vcombine.high %v624_v25, %v628_v27  ;;  %v7221_v42 = vcombine.high %v951_v31, %v955_v33  ;;  %v7220_v50 = vcombine.low %v951_v31, %v955_v33  ;;  %v557_v31 = vld [vmem:[#allocation5 + $0x138] sm:$0xff] }
 0x1d9   : > { %3547 = vmatprep.subr.bf16.mxu1 %v7157_v37  ;;  %v636_v37 = vld [vmem:[#allocation5 + $0x3b0] sm:$0xff] }
 0x1da   : > { %3614 = vmatpush1.bf16.msra.mxu0 %v6838_v39  ;;  %v7212_v39 = vcombine.low %v943_v23, %v947_v24  ;;  %v549_v23 = vld [vmem:[#allocation5 + $0xf8] sm:$0xff] }
 0x1db   : > { %3615 = vmatprep.subr.bf16.mxu0 %v6847_v41  ;;  %v959_v41 = vld [vmem:[#allocation5 + $0xdc8] sm:$0xff] }
 0x1dc   : > { %3548 = vmatpush1.bf16.msra.mxu1 %v7156_v40  ;;  %v6903_v40 = vcombine.high %v632_v35, %v636_v37  ;;  %v7228_v59 = vcombine.low %v959_v41, %v963_v45 }
 0x1dd   : > { %3549 = vmatprep.subr.bf16.mxu1 %v7165_v44 }
 0x1de   : > { %3616 = vmatpush1.bf16.msra.mxu0 %v6846_v46 }
 0x1df   : > { %3617 = vmatprep.subr.bf16.mxu0 %v6855_v49 }
 0x1e0   : > { %3550 = vmatpush1.bf16.msra.mxu1 %v7164_v48  ;;  %v6902_v48 = vcombine.low %v632_v35, %v636_v37  ;;  %v688_v37 = vld [vmem:[#allocation5 + $0x550] sm:$0xff] }
 0x1e1   : > { %3560 = vmatprep.subr.bf16.mxu1 %v7173_v53  ;;  %v652_v53 = vld [vmem:[#allocation5 + $0x430] sm:$0xff] }
 0x1e2   : > { %3618 = vmatpush1.bf16.msra.mxu0 %v6854_v55  ;;  %v7229_v55 = vcombine.high %v959_v41, %v963_v45  ;;  %v6919_v60 = vcombine.high %v648_v52, %v652_v53  ;;  %v6918_v4 = vcombine.low %v648_v52, %v652_v53  ;;  %v696_v45 = vld [vmem:[#allocation5 + $0x590] sm:$0xff] }
 0x1e3   : > { %3552 = vmatmul.mubr.bf16.vlgmr.msra.gmra.mrb[4].mxu1 %v9109_v47  ;;  %3619 = vmatprep.subr.bf16.mxu0 %v6863_v58  ;;  %v525_v58 = vld [vmem:[#allocation5 + $0x38] sm:$0xff] }
 0x1e4   : > { %3561 = vmatpush1.bf16.msra.mxu1 %v7172_v56  ;;  %3592 = vmatprep.mubr.bf16.mxu1 %v8696_v1  ;;  %v521_v56 = vld [vmem:[#allocation5 + $0x18] sm:$0xff] }
 0x1e5   : > { %3562 = vmatprep.subr.bf16.mxu1 %v7181_v62  ;;  %v6793_v62 = vcombine.high %v521_v56, %v525_v58  ;;  %v6792_v5 = vcombine.low %v521_v56, %v525_v58  ;;  %v708_v56 = vld [vmem:[#allocation5 + $0x5f0] sm:$0xff]  ;;  %v577_v58 = vld [vmem:[#allocation5 + $0x1d8] sm:$0xff] }
 0x1e6   : > { %3620 = vmatpush1.bf16.msra.mxu0 %v6862_v0  ;;  %v660_v0 = vld [vmem:[#allocation5 + $0x470] sm:$0xff] }
 0x1e7   : > { %3621 = vmatprep.subr.bf16.mxu0 %v6871_v3  ;;  %v533_v3 = vld [vmem:[#allocation5 + $0x78] sm:$0xff]  ;;  %v6927_v6 = vcombine.high %v656_v63, %v660_v0  ;;  %v6926_v13 = vcombine.low %v656_v63, %v660_v0  ;;  %v712_v0 = vld [vmem:[#allocation5 + $0x610] sm:$0xff] }
 0x1e8   : > { %3563 = vmatpush1.bf16.msra.mxu1 %v7180_v2  ;;  %v529_v2 = vld [vmem:[#allocation5 + $0x58] sm:$0xff] }
 0x1e9   : > { %3564 = vmatprep.subr.bf16.mxu1 %v7189_v7  ;;  %v6801_v7 = vcombine.high %v529_v2, %v533_v3  ;;  %v6800_v15 = vcombine.low %v529_v2, %v533_v3  ;;  %v716_v2 = vld [vmem:[#allocation5 + $0x630] sm:$0xff]  ;;  %v585_v3 = vld [vmem:[#allocation5 + $0x218] sm:$0xff] }
 0x1ea   : > { %3622 = vmatpush1.bf16.msra.mxu0 %v6870_v9  ;;  %v668_v9 = vld [vmem:[#allocation5 + $0x4b0] sm:$0xff] }
 0x1eb   : > { %3623 = vmatprep.subr.bf16.mxu0 %v6879_v11  ;;  %v541_v11 = vld [vmem:[#allocation5 + $0xb8] sm:$0xff]  ;;  %v6934_v24 = vcombine.low %v664_v8, %v668_v9 }
 0x1ec   : > { %3565 = vmatpush1.bf16.msra.mxu1 %v7188_v10  ;;  %v537_v10 = vld [vmem:[#allocation5 + $0x98] sm:$0xff] }
 0x1ed   : > { %3566 = vmatprep.subr.bf16.mxu1 %v7197_v16  ;;  %v6935_v16 = vcombine.high %v664_v8, %v668_v9  ;;  %v6809_v17 = vcombine.high %v537_v10, %v541_v11  ;;  %v6808_v25 = vcombine.low %v537_v10, %v541_v11  ;;  %v720_v9 = vld [vmem:[#allocation5 + $0x650] sm:$0xff]  ;;  %v593_v11 = vld [vmem:[#allocation5 + $0x258] sm:$0xff] }
 0x1ee   : > { %3624 = vmatpush1.bf16.msra.mxu0 %v6878_v19  ;;  %v672_v19 = vld [vmem:[#allocation5 + $0x4d0] sm:$0xff] }
 0x1ef   : > { %3625 = vmatprep.subr.bf16.mxu0 %v6887_v21  ;;  %v545_v21 = vld [vmem:[#allocation5 + $0xd8] sm:$0xff]  ;;  %v724_v10 = vld [vmem:[#allocation5 + $0x670] sm:$0xff] }
 0x1f0   : > { %3567 = vmatpush1.bf16.msra.mxu1 %v7196_v20  ;;  %v676_v20 = vld [vmem:[#allocation5 + $0x4f0] sm:$0xff]  ;;  %v6817_v27 = vcombine.high %v545_v21, %v549_v23  ;;  %v6816_v35 = vcombine.low %v545_v21, %v549_v23  ;;  %v601_v23 = vld [vmem:[#allocation5 + $0x298] sm:$0xff] }
 0x1f1   : > { %3568 = vmatprep.subr.bf16.mxu1 %v7205_v26  ;;  %v6943_v26 = vcombine.high %v672_v19, %v676_v20  ;;  %v6942_v33 = vcombine.low %v672_v19, %v676_v20  ;;  %v728_v20 = vld [vmem:[#allocation5 + $0x690] sm:$0xff] }
 0x1f2   : > { %3626 = vmatpush1.bf16.msra.mxu0 %v6886_v28  ;;  %v680_v28 = vld [vmem:[#allocation5 + $0x510] sm:$0xff] }
 0x1f3   : > { %3627 = vmatprep.subr.bf16.mxu0 %v6895_v30  ;;  %v553_v30 = vld [vmem:[#allocation5 + $0x118] sm:$0xff]  ;;  %v732_v21 = vld [vmem:[#allocation5 + $0x6b0] sm:$0xff] }
 0x1f4   : > { %3569 = vmatpush1.bf16.msra.mxu1 %v7204_v29  ;;  %v684_v29 = vld [vmem:[#allocation5 + $0x530] sm:$0xff]  ;;  %v6824_v14 = vcombine.low %v553_v30, %v557_v31 }
 0x1f5   : > { %3570 = vmatprep.subr.bf16.mxu1 %v7213_v36  ;;  %v6951_v36 = vcombine.high %v680_v28, %v684_v29  ;;  %v6950_v41 = vcombine.low %v680_v28, %v684_v29  ;;  %v736_v29 = vld [vmem:[#allocation5 + $0x6d0] sm:$0xff] }
 0x1f6   : > { %v9115_v44 = vpop.f32.mrb[0].mxu1  ;;  %3628 = vmatpush1.bf16.msra.mxu0 %v6894_v38  ;;  %v692_v38 = vld [vmem:[#allocation5 + $0x570] sm:$0xff] }
 0x1f7   : > { %v9117_v46 = vpop.f32.mrb[1].mxu1  ;;  %3629 = vmatprep.subr.bf16.mxu0 %v6903_v40  ;;  %v565_v40 = vld [vmem:[#allocation5 + $0x178] sm:$0xff] }
 0x1f8   : > { %v3434_v49 = vpop.f32.mrb[2].mxu1  ;;  %3571 = vmatpush1.bf16.msra.mxu1 %v7212_v39  ;;  %v561_v39 = vld [vmem:[#allocation5 + $0x158] sm:$0xff] }
 0x1f9   : > { %v3435_v54 = vpop.f32.mrb[3].mxu1  ;;  %3572 = vmatprep.subr.bf16.mxu1 %v7221_v42  ;;  %v6959_v42 = vcombine.high %v688_v37, %v692_v38  ;;  %v6833_v43 = vcombine.high %v561_v39, %v565_v40  ;;  %v569_v49 = vld [vmem:[#allocation5 + $0x198] sm:$0xff]  ;;  %v6832_v52 = vcombine.low %v561_v39, %v565_v40  ;;  %v748_v39 = vld [vmem:[#allocation5 + $0x730] sm:$0xff] }
 0x1fa   : > { %3630 = vmatpush1.bf16.msra.mxu0 %v6902_v48  ;;  %v700_v48 = vld [vmem:[#allocation5 + $0x5b0] sm:$0xff]  ;;  %v617_v40 = vld [vmem:[#allocation5 + $0x318] sm:$0xff] }
 0x1fb   : > { %3631 = vmatprep.subr.bf16.mxu0 %v6911_v51  ;;  %v6958_v51 = vcombine.low %v688_v37, %v692_v38  ;;  %v6967_v53 = vcombine.high %v696_v45, %v700_v48  ;;  %v744_v38 = vld [vmem:[#allocation5 + $0x710] sm:$0xff] }
 0x1fc   : > { %3573 = vmatpush1.bf16.msra.mxu1 %v7220_v50  ;;  %v573_v50 = vld [vmem:[#allocation5 + $0x1b8] sm:$0xff] }
 0x1fd   : > { %3574 = vmatprep.subr.bf16.mxu1 %v7229_v55  ;;  %v6841_v54 = vcombine.high %v569_v49, %v573_v50  ;;  %v704_v55 = vld [vmem:[#allocation5 + $0x5d0] sm:$0xff] }
 0x1fe   : > { %3632 = vmatpush1.bf16.msra.mxu0 %v6910_v57  ;;  %v581_v57 = vld [vmem:[#allocation5 + $0x1f8] sm:$0xff] }
 0x1ff   : > { %3642 = vmatprep.subr.bf16.mxu0 %v6919_v60  ;;  %v6840_v60 = vcombine.low %v569_v49, %v573_v50  ;;  %v6849_v63 = vcombine.high %v577_v58, %v581_v57  ;;  %v756_v49 = vld [vmem:[#allocation5 + $0x770] sm:$0xff]  ;;  %v625_v50 = vld [vmem:[#allocation5 + $0x358] sm:$0xff] }
 0x200   : > { %3575 = vmatpush1.bf16.msra.mxu1 %v7228_v59  ;;  %v6966_v59 = vcombine.low %v696_v45, %v700_v48  ;;  %v752_v48 = vld [vmem:[#allocation5 + $0x750] sm:$0xff] }
 0x201   : > { %3765 = vmatprep.subr.bf16.mxu1 %v6793_v62  ;;  %3634 = vmatmul.mubr.bf16.vlgmr.msra.gmra.mrb[4].mxu0 %v9082_v18  ;;  %v6975_v62 = vcombine.high %v704_v55, %v708_v56 }
 0x202   : > { %3643 = vmatpush1.bf16.msra.mxu0 %v6918_v4  ;;  %3674 = vmatprep.mubr.bf16.mxu0 %v9086_v22  ;;  %v589_v4 = vld [vmem:[#allocation5 + $0x238] sm:$0xff] }
 0x203   : > { %3593 = vmatmul.mubr.bf16.vlgmr.msra.gmra.mrb[4].mxu1 %v9121_v12  ;;  %3644 = vmatprep.subr.bf16.mxu0 %v6927_v6  ;;  %v6848_v6 = vcombine.low %v577_v58, %v581_v57  ;;  %v6857_v8 = vcombine.high %v585_v3, %v589_v4  ;;  %v764_v58 = vld [vmem:[#allocation5 + $0x7b0] sm:$0xff]  ;;  %v633_v57 = vld [vmem:[#allocation5 + $0x398] sm:$0xff] }
 0x204   : > { %3766 = vmatpush1.bf16.msra.mxu1 %v6792_v5  ;;  %3797 = vmatprep.mubr.bf16.mxu1 %v9072_v61  ;;  %v6825_v61 = vcombine.high %v553_v30, %v557_v31  ;;  %v6974_v5 = vcombine.low %v704_v55, %v708_v56  ;;  %v740_v30 = vld [vmem:[#allocation5 + $0x6f0] sm:$0xff]  ;;  %v609_v31 = vld [vmem:[#allocation5 + $0x2d8] sm:$0xff] }
 0x205   : > { %3767 = vmatprep.subr.bf16.mxu1 %v6801_v7  ;;  %v6983_v7 = vcombine.high %v712_v0, %v716_v2  ;;  %v760_v56 = vld [vmem:[#allocation5 + $0x790] sm:$0xff] }
 0x206   : > { %3645 = vmatpush1.bf16.msra.mxu0 %v6926_v13  ;;  %v597_v13 = vld [vmem:[#allocation5 + $0x278] sm:$0xff] }
 0x207   : > { %3646 = vmatprep.subr.bf16.mxu0 %v6935_v16  ;;  %v6856_v16 = vcombine.low %v585_v3, %v589_v4  ;;  %v6865_v19 = vcombine.high %v593_v11, %v597_v13  ;;  %v772_v3 = vld [vmem:[#allocation5 + $0x7f0] sm:$0xff]  ;;  %v641_v4 = vld [vmem:[#allocation5 + $0x3d8] sm:$0xff] }
 0x208   : > { %3768 = vmatpush1.bf16.msra.mxu1 %v6800_v15  ;;  %v6982_v15 = vcombine.low %v712_v0, %v716_v2  ;;  %v768_v2 = vld [vmem:[#allocation5 + $0x7d0] sm:$0xff] }
 0x209   : > { %3769 = vmatprep.subr.bf16.mxu1 %v6809_v17  ;;  %v6991_v17 = vcombine.high %v720_v9, %v724_v10 }
 0x20a   : > { %3647 = vmatpush1.bf16.msra.mxu0 %v6934_v24  ;;  %v605_v24 = vld [vmem:[#allocation5 + $0x2b8] sm:$0xff] }
 0x20b   : > { %3648 = vmatprep.subr.bf16.mxu0 %v6943_v26  ;;  %v6864_v26 = vcombine.low %v593_v11, %v597_v13  ;;  %v6873_v28 = vcombine.high %v601_v23, %v605_v24  ;;  %v780_v11 = vld [vmem:[#allocation5 + $0x830] sm:$0xff]  ;;  %v649_v13 = vld [vmem:[#allocation5 + $0x418] sm:$0xff] }
 0x20c   : > { %3770 = vmatpush1.bf16.msra.mxu1 %v6808_v25  ;;  %v6990_v25 = vcombine.low %v720_v9, %v724_v10  ;;  %v776_v10 = vld [vmem:[#allocation5 + $0x810] sm:$0xff] }
 0x20d   : > { %3771 = vmatprep.subr.bf16.mxu1 %v6817_v27  ;;  %v6999_v27 = vcombine.high %v728_v20, %v732_v21 }
 0x20e   : > { %3649 = vmatpush1.bf16.msra.mxu0 %v6942_v33  ;;  %v613_v33 = vld [vmem:[#allocation5 + $0x2f8] sm:$0xff] }
 0x20f   : > { %3650 = vmatprep.subr.bf16.mxu0 %v6951_v36  ;;  %v6872_v36 = vcombine.low %v601_v23, %v605_v24  ;;  %v6881_v37 = vcombine.high %v609_v31, %v613_v33  ;;  %v788_v23 = vld [vmem:[#allocation5 + $0x870] sm:$0xff]  ;;  %v657_v24 = vld [vmem:[#allocation5 + $0x458] sm:$0xff] }
 0x210   : > { %3772 = vmatpush1.bf16.msra.mxu1 %v6816_v35  ;;  %v6998_v35 = vcombine.low %v728_v20, %v732_v21  ;;  %v784_v21 = vld [vmem:[#allocation5 + $0x850] sm:$0xff] }
 0x211   : > { %3773 = vmatprep.subr.bf16.mxu1 %v6825_v61  ;;  %v7007_v61 = vcombine.high %v736_v29, %v740_v30 }
 0x212   : > { %3651 = vmatpush1.bf16.msra.mxu0 %v6950_v41  ;;  %v621_v41 = vld [vmem:[#allocation5 + $0x338] sm:$0xff] }
 0x213   : > { %3652 = vmatprep.subr.bf16.mxu0 %v6959_v42  ;;  %v6880_v42 = vcombine.low %v609_v31, %v613_v33  ;;  %v6889_v45 = vcombine.high %v617_v40, %v621_v41  ;;  %v796_v31 = vld [vmem:[#allocation5 + $0x8b0] sm:$0xff]  ;;  %v665_v33 = vld [vmem:[#allocation5 + $0x498] sm:$0xff] }
 0x214   : > { %3774 = vmatpush1.bf16.msra.mxu1 %v6824_v14  ;;  %v7006_v14 = vcombine.low %v736_v29, %v740_v30  ;;  %v792_v30 = vld [vmem:[#allocation5 + $0x890] sm:$0xff] }
 0x215   : > { %3775 = vmatprep.subr.bf16.mxu1 %v6833_v43  ;;  %v7015_v43 = vcombine.high %v744_v38, %v748_v39 }
 0x216   : > { %3653 = vmatpush1.bf16.msra.mxu0 %v6958_v51  ;;  %v629_v51 = vld [vmem:[#allocation5 + $0x378] sm:$0xff] }
 0x217   : > { %3654 = vmatprep.subr.bf16.mxu0 %v6967_v53  ;;  %v6888_v53 = vcombine.low %v617_v40, %v621_v41  ;;  %v6897_v55 = vcombine.high %v625_v50, %v629_v51  ;;  %v804_v40 = vld [vmem:[#allocation5 + $0x8f0] sm:$0xff]  ;;  %v673_v41 = vld [vmem:[#allocation5 + $0x4d8] sm:$0xff] }
 0x218   : > { %3776 = vmatpush1.bf16.msra.mxu1 %v6832_v52  ;;  %v7014_v52 = vcombine.low %v744_v38, %v748_v39  ;;  %v800_v39 = vld [vmem:[#allocation5 + $0x8d0] sm:$0xff] }
 0x219   : > { %3777 = vmatprep.subr.bf16.mxu1 %v6841_v54  ;;  %v7023_v54 = vcombine.high %v752_v48, %v756_v49 }
 0x21a   : > { %3655 = vmatpush1.bf16.msra.mxu0 %v6966_v59  ;;  %v637_v59 = vld [vmem:[#allocation5 + $0x3b8] sm:$0xff] }
 0x21b   : > { %3656 = vmatprep.subr.bf16.mxu0 %v6975_v62  ;;  %v6896_v62 = vcombine.low %v625_v50, %v629_v51  ;;  %v6905_v0 = vcombine.high %v633_v57, %v637_v59  ;;  %v681_v50 = vld [vmem:[#allocation5 + $0x518] sm:$0xff] }
 0x21c   : > { %3778 = vmatpush1.bf16.msra.mxu1 %v6840_v60  ;;  %v7022_v60 = vcombine.low %v752_v48, %v756_v49  ;;  %v808_v48 = vld [vmem:[#allocation5 + $0x910] sm:$0xff]  ;;  %v685_v51 = vld [vmem:[#allocation5 + $0x538] sm:$0xff] }
 0x21d   : > { %3779 = vmatprep.subr.bf16.mxu1 %v6849_v63  ;;  %v7031_v63 = vcombine.high %v760_v56, %v764_v58  ;;  %v812_v49 = vld [vmem:[#allocation5 + $0x930] sm:$0xff] }
 0x21e   : > { %3657 = vmatpush1.bf16.msra.mxu0 %v6974_v5  ;;  %v645_v5 = vld [vmem:[#allocation5 + $0x3f8] sm:$0xff] }
 0x21f   : > { %3658 = vmatprep.subr.bf16.mxu0 %v6983_v7  ;;  %v6904_v7 = vcombine.low %v633_v57, %v637_v59  ;;  %v6913_v9 = vcombine.high %v641_v4, %v645_v5  ;;  %v693_v57 = vld [vmem:[#allocation5 + $0x578] sm:$0xff]  ;;  %v7078_v59 = vcombine.low %v808_v48, %v812_v49 }
 0x220   : > { %3780 = vmatpush1.bf16.msra.mxu1 %v6848_v6  ;;  %v7030_v6 = vcombine.low %v760_v56, %v764_v58  ;;  %v820_v56 = vld [vmem:[#allocation5 + $0x970] sm:$0xff]  ;;  %v689_v58 = vld [vmem:[#allocation5 + $0x558] sm:$0xff] }
 0x221   : > { %3781 = vmatprep.subr.bf16.mxu1 %v6857_v8  ;;  %v7039_v8 = vcombine.high %v768_v2, %v772_v3 }
 0x222   : > { %3659 = vmatpush1.bf16.msra.mxu0 %v6982_v15  ;;  %v653_v15 = vld [vmem:[#allocation5 + $0x438] sm:$0xff] }
 0x223   : > { %3660 = vmatprep.subr.bf16.mxu0 %v6991_v17  ;;  %v6912_v17 = vcombine.low %v641_v4, %v645_v5  ;;  %v6921_v20 = vcombine.high %v649_v13, %v653_v15  ;;  %v701_v4 = vld [vmem:[#allocation5 + $0x5b8] sm:$0xff] }
 0x224   : > { %3782 = vmatpush1.bf16.msra.mxu1 %v6856_v16  ;;  %v7038_v16 = vcombine.low %v768_v2, %v772_v3  ;;  %v828_v2 = vld [vmem:[#allocation5 + $0x9b0] sm:$0xff]  ;;  %v697_v3 = vld [vmem:[#allocation5 + $0x598] sm:$0xff] }
 0x225   : > { %3783 = vmatprep.subr.bf16.mxu1 %v6865_v19  ;;  %v7047_v19 = vcombine.high %v776_v10, %v780_v11 }
 0x226   : > { %3661 = vmatpush1.bf16.msra.mxu0 %v6990_v25  ;;  %v661_v25 = vld [vmem:[#allocation5 + $0x478] sm:$0xff] }
 0x227   : > { %3662 = vmatprep.subr.bf16.mxu0 %v6999_v27  ;;  %v6920_v27 = vcombine.low %v649_v13, %v653_v15  ;;  %v6929_v29 = vcombine.high %v657_v24, %v661_v25  ;;  %v709_v13 = vld [vmem:[#allocation5 + $0x5f8] sm:$0xff] }
 0x228   : > { %3784 = vmatpush1.bf16.msra.mxu1 %v6864_v26  ;;  %v7046_v26 = vcombine.low %v776_v10, %v780_v11  ;;  %v836_v10 = vld [vmem:[#allocation5 + $0x9f0] sm:$0xff]  ;;  %v705_v11 = vld [vmem:[#allocation5 + $0x5d8] sm:$0xff] }
 0x229   : > { %3785 = vmatprep.subr.bf16.mxu1 %v6873_v28  ;;  %v7055_v28 = vcombine.high %v784_v21, %v788_v23 }
 0x22a   : > { %3663 = vmatpush1.bf16.msra.mxu0 %v6998_v35  ;;  %v669_v35 = vld [vmem:[#allocation5 + $0x4b8] sm:$0xff] }
 0x22b   : > { %3664 = vmatprep.subr.bf16.mxu0 %v7007_v61  ;;  %v6928_v61 = vcombine.low %v657_v24, %v661_v25  ;;  %v6937_v38 = vcombine.high %v665_v33, %v669_v35  ;;  %v717_v24 = vld [vmem:[#allocation5 + $0x638] sm:$0xff] }
 0x22c   : > { %3786 = vmatpush1.bf16.msra.mxu1 %v6872_v36  ;;  %v7054_v36 = vcombine.low %v784_v21, %v788_v23  ;;  %v844_v21 = vld [vmem:[#allocation5 + $0xa30] sm:$0xff]  ;;  %v713_v23 = vld [vmem:[#allocation5 + $0x618] sm:$0xff] }
 0x22d   : > { %3787 = vmatprep.subr.bf16.mxu1 %v6881_v37  ;;  %v7063_v37 = vcombine.high %v792_v30, %v796_v31 }
 0x22e   : > { %3665 = vmatpush1.bf16.msra.mxu0 %v7006_v14  ;;  %v677_v14 = vld [vmem:[#allocation5 + $0x4f8] sm:$0xff] }
 0x22f   : > { %3666 = vmatprep.subr.bf16.mxu0 %v7015_v43  ;;  %v7071_v43 = vcombine.high %v800_v39, %v804_v40 }
 0x230   : > { %3788 = vmatpush1.bf16.msra.mxu1 %v6880_v42  ;;  %v7062_v42 = vcombine.low %v792_v30, %v796_v31  ;;  %v852_v30 = vld [vmem:[#allocation5 + $0xa70] sm:$0xff]  ;;  %v721_v31 = vld [vmem:[#allocation5 + $0x658] sm:$0xff] }
 0x231   : > { %3789 = vmatprep.subr.bf16.mxu1 %v6889_v45  ;;  %v6945_v45 = vcombine.high %v673_v41, %v677_v14 }
 0x232   : > { %3667 = vmatpush1.bf16.msra.mxu0 %v7014_v52  ;;  %v7070_v52 = vcombine.low %v800_v39, %v804_v40  ;;  %v860_v39 = vld [vmem:[#allocation5 + $0xab0] sm:$0xff]  ;;  %v729_v40 = vld [vmem:[#allocation5 + $0x698] sm:$0xff] }
 0x233   : > { %3668 = vmatprep.subr.bf16.mxu0 %v7023_v54  ;;  %v7079_v54 = vcombine.high %v808_v48, %v812_v49  ;;  %v868_v48 = vld [vmem:[#allocation5 + $0xaf0] sm:$0xff]  ;;  %v737_v49 = vld [vmem:[#allocation5 + $0x6d8] sm:$0xff] }
 0x234   : > { %3790 = vmatpush1.bf16.msra.mxu1 %v6888_v53  ;;  %v6944_v53 = vcombine.low %v673_v41, %v677_v14  ;;  %v733_v41 = vld [vmem:[#allocation5 + $0x6b8] sm:$0xff] }
 0x235   : > { %3791 = vmatprep.subr.bf16.mxu1 %v6897_v55  ;;  %v816_v55 = vld [vmem:[#allocation5 + $0x950] sm:$0xff] }
 0x236   : > { %3669 = vmatpush1.bf16.msra.mxu0 %v7022_v60  ;;  %v6952_v60 = vcombine.low %v681_v50, %v685_v51  ;;  %v7086_v5 = vcombine.low %v816_v55, %v820_v56 }
 0x237   : > { %3670 = vmatprep.subr.bf16.mxu0 %v7031_v63  ;;  %v6961_v63 = vcombine.high %v689_v58, %v693_v57 }
 0x238   : > { %3792 = vmatpush1.bf16.msra.mxu1 %v6896_v62  ;;  %v7087_v62 = vcombine.high %v816_v55, %v820_v56  ;;  %v876_v55 = vld [vmem:[#allocation5 + $0xb30] sm:$0xff]  ;;  %v745_v56 = vld [vmem:[#allocation5 + $0x718] sm:$0xff] }
 0x239   : > { %3793 = vmatprep.subr.bf16.mxu1 %v6905_v0  ;;  %v824_v0 = vld [vmem:[#allocation5 + $0x990] sm:$0xff] }
 0x23a   : > { %3671 = vmatpush1.bf16.msra.mxu0 %v7030_v6  ;;  %v6960_v6 = vcombine.low %v689_v58, %v693_v57  ;;  %v7094_v15 = vcombine.low %v824_v0, %v828_v2  ;;  %v749_v58 = vld [vmem:[#allocation5 + $0x738] sm:$0xff] }
 0x23b   : > { %3672 = vmatprep.subr.bf16.mxu0 %v7039_v8  ;;  %v6969_v8 = vcombine.high %v697_v3, %v701_v4 }
 0x23c   : > { %3794 = vmatpush1.bf16.msra.mxu1 %v6904_v7  ;;  %v7095_v7 = vcombine.high %v824_v0, %v828_v2  ;;  %v884_v0 = vld [vmem:[#allocation5 + $0xb70] sm:$0xff]  ;;  %v753_v2 = vld [vmem:[#allocation5 + $0x758] sm:$0xff] }
 0x23d   : > { %3795 = vmatprep.subr.bf16.mxu1 %v6913_v9  ;;  %v832_v9 = vld [vmem:[#allocation5 + $0x9d0] sm:$0xff] }
 0x23e   : > { %3673 = vmatpush1.bf16.msra.mxu0 %v7038_v16  ;;  %v6968_v16 = vcombine.low %v697_v3, %v701_v4  ;;  %v7102_v25 = vcombine.low %v832_v9, %v836_v10  ;;  %v757_v3 = vld [vmem:[#allocation5 + $0x778] sm:$0xff] }
 0x23f   : > { %3683 = vmatprep.subr.bf16.mxu0 %v7047_v19  ;;  %v6977_v19 = vcombine.high %v705_v11, %v709_v13 }
 0x240   : > { %3796 = vmatpush1.bf16.msra.mxu1 %v6912_v17  ;;  %v7103_v17 = vcombine.high %v832_v9, %v836_v10  ;;  %v892_v9 = vld [vmem:[#allocation5 + $0xbb0] sm:$0xff]  ;;  %v761_v10 = vld [vmem:[#allocation5 + $0x798] sm:$0xff] }
 0x241   : > { %3806 = vmatprep.subr.bf16.mxu1 %v6921_v20  ;;  %3675 = vmatmul.mubr.bf16.vlgmr.msra.gmra.mrb[4].mxu0 %v9097_v32  ;;  %v840_v20 = vld [vmem:[#allocation5 + $0xa10] sm:$0xff] }
 0x242   : > { %3684 = vmatpush1.bf16.msra.mxu0 %v7046_v26  ;;  %3715 = vmatprep.mubr.bf16.mxu0 %v9101_v34  ;;  %v6976_v26 = vcombine.low %v705_v11, %v709_v13  ;;  %v765_v11 = vld [vmem:[#allocation5 + $0x7b8] sm:$0xff] }
 0x243   : > { %3798 = vmatmul.mubr.bf16.vlgmr.msra.gmra.mrb[8].mxu1 %v9082_v18  ;;  %3685 = vmatprep.subr.bf16.mxu0 %v7055_v28  ;;  %v6936_v18 = vcombine.low %v665_v33, %v669_v35  ;;  %v6985_v28 = vcombine.high %v713_v23, %v717_v24  ;;  %v725_v33 = vld [vmem:[#allocation5 + $0x678] sm:$0xff]  ;;  %v7110_v35 = vcombine.low %v840_v20, %v844_v21 }
 0x244   : > { %3807 = vmatpush1.bf16.msra.mxu1 %v6920_v27  ;;  %3838 = vmatprep.mubr.bf16.mxu1 %v9086_v22  ;;  %v6953_v22 = vcombine.high %v681_v50, %v685_v51  ;;  %v7111_v27 = vcombine.high %v840_v20, %v844_v21  ;;  %v741_v50 = vld [vmem:[#allocation5 + $0x6f8] sm:$0xff]  ;;  %v900_v20 = vld [vmem:[#allocation5 + $0xbf0] sm:$0xff] }
 0x245   : > { %3808 = vmatprep.subr.bf16.mxu1 %v6929_v29  ;;  %v848_v29 = vld [vmem:[#allocation5 + $0xa50] sm:$0xff]  ;;  %v769_v21 = vld [vmem:[#allocation5 + $0x7d8] sm:$0xff] }
 0x246   : > { %3686 = vmatpush1.bf16.msra.mxu0 %v7054_v36  ;;  %v6984_v36 = vcombine.low %v713_v23, %v717_v24  ;;  %v7118_v14 = vcombine.low %v848_v29, %v852_v30  ;;  %v773_v23 = vld [vmem:[#allocation5 + $0x7f8] sm:$0xff] }
 0x247   : > { %3687 = vmatprep.subr.bf16.mxu0 %v7063_v37  ;;  %v6993_v37 = vcombine.high %v721_v31, %v725_v33 }
 0x248   : > { %3809 = vmatpush1.bf16.msra.mxu1 %v6928_v61  ;;  %v7119_v61 = vcombine.high %v848_v29, %v852_v30  ;;  %v908_v29 = vld [vmem:[#allocation5 + $0xc30] sm:$0xff]  ;;  %v777_v30 = vld [vmem:[#allocation5 + $0x818] sm:$0xff] }
 0x249   : > { %3810 = vmatprep.subr.bf16.mxu1 %v6937_v38  ;;  %v856_v38 = vld [vmem:[#allocation5 + $0xa90] sm:$0xff] }
 0x24a   : > { %3688 = vmatpush1.bf16.msra.mxu0 %v7062_v42  ;;  %v6992_v42 = vcombine.low %v721_v31, %v725_v33  ;;  %v7126_v51 = vcombine.low %v856_v38, %v860_v39  ;;  %v781_v31 = vld [vmem:[#allocation5 + $0x838] sm:$0xff] }
 0x24b   : > { %3689 = vmatprep.subr.bf16.mxu0 %v7071_v43  ;;  %v7001_v43 = vcombine.high %v729_v40, %v733_v41 }
 0x24c   : > { %3811 = vmatpush1.bf16.msra.mxu1 %v6936_v18  ;;  %v7127_v18 = vcombine.high %v856_v38, %v860_v39  ;;  %v916_v38 = vld [vmem:[#allocation5 + $0xc70] sm:$0xff]  ;;  %v785_v39 = vld [vmem:[#allocation5 + $0x858] sm:$0xff] }
 0x24d   : > { %3812 = vmatprep.subr.bf16.mxu1 %v6945_v45  ;;  %v864_v45 = vld [vmem:[#allocation5 + $0xad0] sm:$0xff] }
 0x24e   : > { %3690 = vmatpush1.bf16.msra.mxu0 %v7070_v52  ;;  %v7000_v52 = vcombine.low %v729_v40, %v733_v41  ;;  %v7134_v57 = vcombine.low %v864_v45, %v868_v48  ;;  %v789_v40 = vld [vmem:[#allocation5 + $0x878] sm:$0xff] }
 0x24f   : > { %3691 = vmatprep.subr.bf16.mxu0 %v7079_v54  ;;  %v7009_v54 = vcombine.high %v737_v49, %v741_v50 }
 0x250   : > { %3813 = vmatpush1.bf16.msra.mxu1 %v6944_v53  ;;  %v7135_v53 = vcombine.high %v864_v45, %v868_v48  ;;  %v924_v45 = vld [vmem:[#allocation5 + $0xcb0] sm:$0xff]  ;;  %v793_v48 = vld [vmem:[#allocation5 + $0x898] sm:$0xff] }
 0x251   : > { %3814 = vmatprep.subr.bf16.mxu1 %v6953_v22  ;;  %v872_v22 = vld [vmem:[#allocation5 + $0xb10] sm:$0xff] }
 0x252   : > { %3692 = vmatpush1.bf16.msra.mxu0 %v7078_v59  ;;  %v7008_v59 = vcombine.low %v737_v49, %v741_v50  ;;  %v7142_v4 = vcombine.low %v872_v22, %v876_v55  ;;  %v797_v49 = vld [vmem:[#allocation5 + $0x8b8] sm:$0xff] }
 0x253   : > { %3693 = vmatprep.subr.bf16.mxu0 %v7087_v62  ;;  %v7017_v62 = vcombine.high %v745_v56, %v749_v58 }
 0x254   : > { %3815 = vmatpush1.bf16.msra.mxu1 %v6952_v60  ;;  %v7143_v60 = vcombine.high %v872_v22, %v876_v55  ;;  %v932_v22 = vld [vmem:[#allocation5 + $0xcf0] sm:$0xff]  ;;  %v801_v55 = vld [vmem:[#allocation5 + $0x8d8] sm:$0xff] }
 0x255   : > { %3816 = vmatprep.subr.bf16.mxu1 %v6961_v63  ;;  %v880_v63 = vld [vmem:[#allocation5 + $0xb50] sm:$0xff] }
 0x256   : > { %3694 = vmatpush1.bf16.msra.mxu0 %v7086_v5  ;;  %v7016_v5 = vcombine.low %v745_v56, %v749_v58  ;;  %v7150_v13 = vcombine.low %v880_v63, %v884_v0  ;;  %v805_v56 = vld [vmem:[#allocation5 + $0x8f8] sm:$0xff]  ;;  %v968_v58 = vlaneseq }
 0x257   : > { %3695 = vmatprep.subr.bf16.mxu0 %v7095_v7  ;;  %v7025_v7 = vcombine.high %v753_v2, %v757_v3 }
 0x258   : > { %3817 = vmatpush1.bf16.msra.mxu1 %v6960_v6  ;;  %v7151_v6 = vcombine.high %v880_v63, %v884_v0  ;;  %v940_v63 = vld [vmem:[#allocation5 + $0xd30] sm:$0xff]  ;;  %v809_v0 = vld [vmem:[#allocation5 + $0x918] sm:$0xff] }
 0x259   : > { %3818 = vmatprep.subr.bf16.mxu1 %v6969_v8  ;;  %v888_v8 = vld [vmem:[#allocation5 + $0xb90] sm:$0xff] }
 0x25a   : > { %3696 = vmatpush1.bf16.msra.mxu0 %v7094_v15  ;;  %v7024_v15 = vcombine.low %v753_v2, %v757_v3  ;;  %v7158_v24 = vcombine.low %v888_v8, %v892_v9  ;;  %v813_v2 = vld [vmem:[#allocation5 + $0x938] sm:$0xff]  ;;  %v9134_v3 = vshrl.u32 %v968_v58, 7 }
 0x25b   : > { %3697 = vmatprep.subr.bf16.mxu0 %v7103_v17  ;;  %v7033_v17 = vcombine.high %v761_v10, %v765_v11  ;;  %v7862_v58 = vld [vmem:[#allocation8] ss:$16 sps:$4 sm:$0xff]  }
 0x25c   : > { %3819 = vmatpush1.bf16.msra.mxu1 %v6968_v16  ;;  %v7159_v16 = vcombine.high %v888_v8, %v892_v9  ;;  %v948_v8 = vld [vmem:[#allocation5 + $0xd70] sm:$0xff]  ;;  %v9137_v9 = vsub.s32 0, %v9134_v3 }
 0x25d   : > { %3820 = vmatprep.subr.bf16.mxu1 %v6977_v19  ;;  %v896_v19 = vld [vmem:[#allocation5 + $0xbd0] sm:$0xff] }
 0x25e   : > { %3698 = vmatpush1.bf16.msra.mxu0 %v7102_v25  ;;  %v7032_v25 = vcombine.low %v761_v10, %v765_v11  ;;  %v7166_v33 = vcombine.low %v896_v19, %v900_v20  ;;  %v817_v10 = vld [vmem:[#allocation5 + $0x958] sm:$0xff] }
 0x25f   : > { %3699 = vmatprep.subr.bf16.mxu0 %v7111_v27  ;;  %v7041_v27 = vcombine.high %v769_v21, %v773_v23  ;;  %v821_v11 = vld [vmem:[#allocation5 + $0x978] sm:$0xff] }
 0x260   : > { %3821 = vmatpush1.bf16.msra.mxu1 %v6976_v26  ;;  %v7167_v26 = vcombine.high %v896_v19, %v900_v20  ;;  %v7089_v20 = vcombine.high %v817_v10, %v821_v11 }
 0x261   : > { %3822 = vmatprep.subr.bf16.mxu1 %v6985_v28  ;;  %v904_v28 = vld [vmem:[#allocation5 + $0xc10] sm:$0xff] }
 0x262   : > { %3700 = vmatpush1.bf16.msra.mxu0 %v7110_v35  ;;  %v7040_v35 = vcombine.low %v769_v21, %v773_v23  ;;  %v7174_v41 = vcombine.low %v904_v28, %v908_v29  ;;  %v952_v21 = vld [vmem:[#allocation5 + $0xd90] sm:$0xff] }
 0x263   : > { %3701 = vmatprep.subr.bf16.mxu0 %v7119_v61  ;;  %v7049_v61 = vcombine.high %v777_v30, %v781_v31  ;;  %v956_v23 = vld [vmem:[#allocation5 + $0xdb0] sm:$0xff] }
 0x264   : > { %3823 = vmatpush1.bf16.msra.mxu1 %v6984_v36  ;;  %v7175_v36 = vcombine.high %v904_v28, %v908_v29  ;;  %v7088_v29 = vcombine.low %v817_v10, %v821_v11  ;;  %v873_v10 = vld [vmem:[#allocation5 + $0xb18] sm:$0xff] }
 0x265   : > { %3824 = vmatprep.subr.bf16.mxu1 %v6993_v37  ;;  %v912_v37 = vld [vmem:[#allocation5 + $0xc50] sm:$0xff]  ;;  %v877_v11 = vld [vmem:[#allocation5 + $0xb38] sm:$0xff] }
 0x266   : > { %3702 = vmatpush1.bf16.msra.mxu0 %v7118_v14  ;;  %v7048_v14 = vcombine.low %v777_v30, %v781_v31  ;;  %v7182_v50 = vcombine.low %v912_v37, %v916_v38  ;;  %v7223_v30 = vcombine.high %v952_v21, %v956_v23 }
 0x267   : > { %3703 = vmatprep.subr.bf16.mxu0 %v7127_v18  ;;  %v7057_v18 = vcombine.high %v785_v39, %v789_v40 }
 0x268   : > { %3825 = vmatpush1.bf16.msra.mxu1 %v6992_v42  ;;  %v7183_v42 = vcombine.high %v912_v37, %v916_v38  ;;  %v833_v38 = vld [vmem:[#allocation5 + $0x9d8] sm:$0xff] }
 0x269   : > { %3826 = vmatprep.subr.bf16.mxu1 %v7001_v43  ;;  %v920_v43 = vld [vmem:[#allocation5 + $0xc90] sm:$0xff] }
 0x26a   : > { %3704 = vmatpush1.bf16.msra.mxu0 %v7126_v51  ;;  %v7056_v51 = vcombine.low %v785_v39, %v789_v40  ;;  %v837_v39 = vld [vmem:[#allocation5 + $0x9f8] sm:$0xff] }
 0x26b   : > { %3705 = vmatprep.subr.bf16.mxu0 %v7135_v53  ;;  %v7065_v53 = vcombine.high %v793_v48, %v797_v49 }
 0x26c   : > { %3827 = vmatpush1.bf16.msra.mxu1 %v7000_v52  ;;  %v7191_v52 = vcombine.high %v920_v43, %v924_v45 }
 0x26d   : > { %3828 = vmatprep.subr.bf16.mxu1 %v7009_v54  ;;  %v928_v54 = vld [vmem:[#allocation5 + $0xcd0] sm:$0xff] }
 0x26e   : > { %3706 = vmatpush1.bf16.msra.mxu0 %v7134_v57  ;;  %v7190_v57 = vcombine.low %v920_v43, %v924_v45 }
 0x26f   : > { %3707 = vmatprep.subr.bf16.mxu0 %v7143_v60  ;;  %v7073_v60 = vcombine.high %v801_v55, %v805_v56 }
 0x270   : > { %3829 = vmatpush1.bf16.msra.mxu1 %v7008_v59  ;;  %v7199_v59 = vcombine.high %v928_v54, %v932_v22 }
 0x271   : > { %3830 = vmatprep.subr.bf16.mxu1 %v7017_v62  ;;  %v936_v62 = vld [vmem:[#allocation5 + $0xd10] sm:$0xff] }
 0x272   : > { %3708 = vmatpush1.bf16.msra.mxu0 %v7142_v4  ;;  %v7198_v4 = vcombine.low %v928_v54, %v932_v22  ;;  %v7864_v54 = vld [vmem:[#allocation8 + $0x4] ss:$16 sps:$4 sm:$0xff]  }
 0x273   : > { %3709 = vmatprep.subr.bf16.mxu0 %v7151_v6  ;;  %v7081_v6 = vcombine.high %v809_v0, %v813_v2 }
 0x274   : > { %3831 = vmatpush1.bf16.msra.mxu1 %v7016_v5  ;;  %v7072_v5 = vcombine.low %v801_v55, %v805_v56  ;;  %v849_v55 = vld [vmem:[#allocation5 + $0xa58] sm:$0xff] }
 0x275   : > { %3832 = vmatprep.subr.bf16.mxu1 %v7025_v7  ;;  %v944_v7 = vld [vmem:[#allocation5 + $0xd50] sm:$0xff]  ;;  %v853_v56 = vld [vmem:[#allocation5 + $0xa78] sm:$0xff] }
 0x276   : > { %3710 = vmatpush1.bf16.msra.mxu0 %v7150_v13  ;;  %v7206_v13 = vcombine.low %v936_v62, %v940_v63  ;;  %v7215_v19 = vcombine.high %v944_v7, %v948_v8  ;;  %v7214_v28 = vcombine.low %v944_v7, %v948_v8 }
 0x277   : > { %3711 = vmatprep.subr.bf16.mxu0 %v7159_v16  ;;  %v9142_v16 = vsub.s32 1, %v9134_v3 }
 0x278   : > { %3833 = vmatpush1.bf16.msra.mxu1 %v7024_v15  ;;  %v9139_v15 = vld [vmem:[#allocation7] sm:$0xff] }
 0x279   : > { %3834 = vmatprep.subr.bf16.mxu1 %v7033_v17  ;;  %v7080_v17 = vcombine.low %v809_v0, %v813_v2  ;;  %v7120_v0 = vcombine.low %v849_v55, %v853_v56  ;;  %v7870_v2 = vld [vmem:[#allocation8 + $0x44] ss:$16 sps:$4 sm:$0xff]  }
 0x27a   : > { %3712 = vmatpush1.bf16.msra.mxu0 %v7158_v24  ;;  %v971_v24 = vrot.slane %v9139_v15, %v9137_v9 }
 0x27b   : > { %3713 = vmatprep.subr.bf16.mxu0 %v7167_v26  ;;  %v829_v26 = vld [vmem:[#allocation5 + $0x9b8] sm:$0xff] }
 0x27c   : > { %3835 = vmatpush1.bf16.msra.mxu1 %v7032_v25  ;;  %v825_v25 = vld [vmem:[#allocation5 + $0x998] sm:$0xff] }
 0x27d   : > { %3836 = vmatprep.subr.bf16.mxu1 %v7041_v27  ;;  %v975_v27 = vrot.slane %v9139_v15, %v9142_v16  ;;  %v7096_v43 = vcombine.low %v825_v25, %v829_v26 }
 0x27e   : > { %3714 = vmatpush1.bf16.msra.mxu0 %v7166_v33  ;;  %v7097_v33 = vcombine.high %v825_v25, %v829_v26  ;;  %v7144_v25 = vcombine.low %v873_v10, %v877_v11  ;;  %v7879_v26 = vld [vmem:[#allocation8 + $0xa4] ss:$16 sps:$4 sm:$0xff]  }
 0x27f   : > { %3724 = vmatprep.subr.bf16.mxu0 %v7175_v36  ;;  %v964_v36 = vld [vmem:[#allocation5 + $0xdf0] sm:$0xff] }
 0x280   : > { %3837 = vmatpush1.bf16.msra.mxu1 %v7040_v35  ;;  %v960_v35 = vld [vmem:[#allocation5 + $0xdd0] sm:$0xff] }
 0x281   : > { %3847 = vmatprep.subr.bf16.mxu1 %v7049_v61  ;;  %3716 = vmatmul.mubr.bf16.vlgmr.msra.gmra.mrb[4].mxu0 %v9109_v47  ;;  %v7231_v45 = vcombine.high %v960_v35, %v964_v36 }
 0x282   : > { %3725 = vmatpush1.bf16.msra.mxu0 %v7174_v41  ;;  %3756 = vmatprep.mubr.bf16.mxu0 %v8696_v1 }
 0x283   : > { %3839 = vmatmul.mubr.bf16.vlgmr.msra.gmra.mrb[8].mxu1 %v9097_v32  ;;  %3726 = vmatprep.subr.bf16.mxu0 %v7183_v42  ;;  %v7064_v32 = vcombine.low %v793_v48, %v797_v49  ;;  %v7105_v49 = vcombine.high %v833_v38, %v837_v39 }
 0x284   : > { %3848 = vmatpush1.bf16.msra.mxu1 %v7048_v14  ;;  %3879 = vmatprep.mubr.bf16.mxu1 %v9101_v34  ;;  %v7207_v34 = vcombine.high %v936_v62, %v940_v63  ;;  %v7222_v14 = vcombine.low %v952_v21, %v956_v23  ;;  %v861_v62 = vld [vmem:[#allocation5 + $0xab8] sm:$0xff] }
 0x285   : > { %3849 = vmatprep.subr.bf16.mxu1 %v7057_v18  ;;  %v7865_v63 = vld [vmem:[#allocation8 + $0x20] ss:$16 sps:$4 sm:$0xff]  }
 0x286   : > { %3727 = vmatpush1.bf16.msra.mxu0 %v7182_v50  ;;  %v841_v50 = vld [vmem:[#allocation5 + $0xa18] sm:$0xff] }
 0x287   : > { %3728 = vmatprep.subr.bf16.mxu0 %v7191_v52  ;;  %v7230_v52 = vcombine.low %v960_v35, %v964_v36  ;;  %v881_v21 = vld [vmem:[#allocation5 + $0xb58] sm:$0xff] }
 0x288   : > { %3850 = vmatpush1.bf16.msra.mxu1 %v7056_v51  ;;  %v845_v51 = vld [vmem:[#allocation5 + $0xa38] sm:$0xff] }
 0x289   : > { %3851 = vmatprep.subr.bf16.mxu1 %v7065_v53  ;;  %v7104_v53 = vcombine.low %v833_v38, %v837_v39  ;;  %v885_v23 = vld [vmem:[#allocation5 + $0xb78] sm:$0xff] }
 0x28a   : > { %3729 = vmatpush1.bf16.msra.mxu0 %v7190_v57  ;;  %v7112_v57 = vcombine.low %v841_v50, %v845_v51  ;;  %v897_v36 = vld [vmem:[#allocation5 + $0xbd8] sm:$0xff] }
 0x28b   : > { %3730 = vmatprep.subr.bf16.mxu0 %v7199_v59  ;;  %v7121_v59 = vcombine.high %v849_v55, %v853_v56  ;;  %v7885_v39 = vld [vmem:[#allocation8 + $0xe4] ss:$16 sps:$4 sm:$0xff]   ;;  %v7889_v55 = vld [vmem:[#allocation8 + $0x120] ss:$16 sps:$4 sm:$0xff]  }
 0x28c   : > { %3852 = vmatpush1.bf16.msra.mxu1 %v7064_v32 }
 0x28d   : > { %3853 = vmatprep.subr.bf16.mxu1 %v7073_v60  ;;  %v857_v60 = vld [vmem:[#allocation5 + $0xa98] sm:$0xff] }
 0x28e   : > { %3731 = vmatpush1.bf16.msra.mxu0 %v7198_v4  ;;  %v7129_v4 = vcombine.high %v857_v60, %v861_v62  ;;  %v7128_v7 = vcombine.low %v857_v60, %v861_v62  ;;  %v7892_v60 = vld [vmem:[#allocation8 + $0x140] ss:$16 sps:$4 sm:$0xff]  }
 0x28f   : > { %3732 = vmatprep.subr.bf16.mxu0 %v7207_v34  ;;  %v869_v34 = vld [vmem:[#allocation5 + $0xaf8] sm:$0xff] }
 0x290   : > { %3854 = vmatpush1.bf16.msra.mxu1 %v7072_v5  ;;  %v865_v5 = vld [vmem:[#allocation5 + $0xad8] sm:$0xff] }
 0x291   : > { %3855 = vmatprep.subr.bf16.mxu1 %v7081_v6  ;;  %v7868_v6 = vld [vmem:[#allocation8 + $0x40] ss:$16 sps:$4 sm:$0xff]   ;;  %v7137_v8 = vcombine.high %v865_v5, %v869_v34 }
 0x292   : > { %3733 = vmatpush1.bf16.msra.mxu0 %v7206_v13  ;;  %v7871_v13 = vld [vmem:[#allocation8 + $0x60] ss:$16 sps:$4 sm:$0xff]  }
 0x293   : > { %3734 = vmatprep.subr.bf16.mxu0 %v7215_v19  ;;  %v7876_v19 = vld [vmem:[#allocation8 + $0x84] ss:$16 sps:$4 sm:$0xff]  }
 0x294   : > { %3856 = vmatpush1.bf16.msra.mxu1 %v7080_v17  ;;  %v3389_v31 = vpop.f32.mrb[0].mxu0  ;;  %v7136_v17 = vcombine.low %v865_v5, %v869_v34  ;;  %v7900_v34 = vld [vmem:[#allocation8 + $0x184] ss:$16 sps:$4 sm:$0xff]  }
 0x295   : > { %3857 = vmatprep.subr.bf16.mxu1 %v7089_v20  ;;  %v7633_v61 = vadd.f32 %v3389_v31, %v971_v24  ;;  %v3391_v37 = vpop.f32.mrb[1].mxu0  ;;  %v7145_v20 = vcombine.high %v873_v10, %v877_v11  ;;  %v7874_v24 = vld [vmem:[#allocation8 + $0x80] ss:$16 sps:$4 sm:$0xff]   ;;  %v7152_v31 = vcombine.low %v881_v21, %v885_v23  ;;  %v7903_v10 = vld [vmem:[#allocation8 + $0x1a4] ss:$16 sps:$4 sm:$0xff]  }
 0x296   : > { %v7635_v40 = vadd.f32 %v3391_v37, %v975_v27  ;;  %v3393_v41 = vpop.f32.mrb[2].mxu0  ;;  %3735 = vmatpush1.bf16.msra.mxu0 %v7214_v28  ;;  %v7153_v27 = vcombine.high %v881_v21, %v885_v23  ;;  %v889_v28 = vld [vmem:[#allocation5 + $0xb98] sm:$0xff] }
 0x297   : > { %v9149_v42 = vadd.f32 %v7633_v61, %v9115_v44  ;;  %v3394_v18 = vpop.f32.mrb[3].mxu0  ;;  %3736 = vmatprep.subr.bf16.mxu0 %v7223_v30  ;;  %v7113_v44 = vcombine.high %v841_v50, %v845_v51  ;;  %v7877_v30 = vld [vmem:[#allocation8 + $0xa0] ss:$16 sps:$4 sm:$0xff]   ;;  %v7906_v23 = vld [vmem:[#allocation8 + $0x1c4] ss:$16 sps:$4 sm:$0xff]  }
 0x298   : > { %3858 = vmatpush1.bf16.msra.mxu1 %v7088_v29  ;;  %v7636_v48 = vadd.f32 %v7635_v40, %v9117_v46  ;;  %v7867_v46 = vld [vmem:[#allocation8 + $0x24] ss:$16 sps:$4 sm:$0xff]   ;;  %v7880_v37 = vld [vmem:[#allocation8 + $0xc0] ss:$16 sps:$4 sm:$0xff]  }
 0x299   : > { %3859 = vmatprep.subr.bf16.mxu1 %v7097_v33  ;;  %v893_v29 = vld [vmem:[#allocation5 + $0xbb8] sm:$0xff] }
 0x29a   : > { %3737 = vmatpush1.bf16.msra.mxu0 %v7222_v14  ;;  %v3930_v22 = vmax.f32 %v7636_v48, 0.0  ;;  %v7882_v33 = vld [vmem:[#allocation8 + $0xc4] ss:$16 sps:$4 sm:$0xff]   ;;  %v7161_v35 = vcombine.high %v889_v28, %v893_v29  ;;  %v7160_v38 = vcombine.low %v889_v28, %v893_v29  ;;  %v7883_v18 = vld [vmem:[#allocation8 + $0xe0] ss:$16 sps:$4 sm:$0xff]  }
 0x29b   : > { %3738 = vmatprep.subr.bf16.mxu0 %v7231_v45  ;;  %v901_v61 = vld [vmem:[#allocation5 + $0xbf8] sm:$0xff] }
 0x29c   : > { %3860 = vmatpush1.bf16.msra.mxu1 %v7096_v43  ;;  %v9152_v32 = vpack.c.bf16 %v3930_v22, %v3930_v22  ;;  %v7169_v40 = vcombine.high %v897_v36, %v901_v61  ;;  %v905_v41 = vld [vmem:[#allocation5 + $0xc18] sm:$0xff]  ;;  %v7168_v43 = vcombine.low %v897_v36, %v901_v61 }
 0x29d   : > { %3861 = vmatprep.subr.bf16.mxu1 %v7105_v49  ;;  %v909_v14 = vld [vmem:[#allocation5 + $0xc38] sm:$0xff] }
 0x29e   : > { %3739 = vmatpush1.bf16.msra.mxu0 %v7230_v52  ;;  %v7888_v45 = vld [vmem:[#allocation8 + $0x104] ss:$16 sps:$4 sm:$0xff]   ;;  %v7177_v48 = vcombine.high %v905_v41, %v909_v14  ;;  %v7886_v51 = vld [vmem:[#allocation8 + $0x100] ss:$16 sps:$4 sm:$0xff]   ;;  %v7176_v52 = vcombine.low %v905_v41, %v909_v14  ;;  %v7915_v14 = vld [vmem:[#allocation8 + $0xc] ss:$16 sps:$4 sm:$0xff]  }
 0x29f   : > { %5503 = vmatprep.subr.bf16.mxu0 %v7864_v54  ;;  %v913_v49 = vld [vmem:[#allocation5 + $0xc58] sm:$0xff] }
 0x2a0   : > { %3862 = vmatpush1.bf16.msra.mxu1 %v7104_v53  ;;  %v917_v50 = vld [vmem:[#allocation5 + $0xc78] sm:$0xff] }
 0x2a1   : > { %3863 = vmatprep.subr.bf16.mxu1 %v7113_v44  ;;  %3757 = vmatmul.mubr.bf16.vlgmr.msra.gmra.mrb[4].mxu0 %v9121_v12  ;;  %v7873_v12 = vld [vmem:[#allocation8 + $0x64] ss:$16 sps:$4 sm:$0xff]   ;;  %v7185_v54 = vcombine.high %v913_v49, %v917_v50  ;;  %v7184_v56 = vcombine.low %v913_v49, %v917_v50 }
 0x2a2   : > { %5504 = vmatpush1.bf16.msra.mxu0 %v7862_v58  ;;  %5535 = vmatprep.mubr.bf16.mxu0 %v9152_v32  ;;  %v7891_v53 = vld [vmem:[#allocation8 + $0x124] ss:$16 sps:$4 sm:$0xff]  }
 0x2a3   : > { %5505 = vmatprep.subr.bf16.mxu0 %v7867_v46  ;;  %v921_v22 = vld [vmem:[#allocation5 + $0xc98] sm:$0xff] }
 0x2a4   : > { %3864 = vmatpush1.bf16.msra.mxu1 %v7112_v57  ;;  %v925_v44 = vld [vmem:[#allocation5 + $0xcb8] sm:$0xff] }
 0x2a5   : > { %3865 = vmatprep.subr.bf16.mxu1 %v7121_v59  ;;  %v7894_v58 = vld [vmem:[#allocation8 + $0x144] ss:$16 sps:$4 sm:$0xff]   ;;  %v7193_v57 = vcombine.high %v921_v22, %v925_v44  ;;  %v7192_v62 = vcombine.low %v921_v22, %v925_v44  ;;  %v7927_v22 = vld [vmem:[#allocation8 + $0x4c] ss:$16 sps:$4 sm:$0xff]   ;;  %v7922_v44 = vld [vmem:[#allocation8 + $0x240] ss:$16 sps:$4 sm:$0xff]  }
 0x2a6   : > { %5506 = vmatpush1.bf16.msra.mxu0 %v7865_v63  ;;  %v929_v46 = vld [vmem:[#allocation5 + $0xcd8] sm:$0xff] }
 0x2a7   : > { %5507 = vmatprep.subr.bf16.mxu0 %v7870_v2  ;;  %v933_v59 = vld [vmem:[#allocation5 + $0xcf8] sm:$0xff] }
 0x2a8   : > { %3866 = vmatpush1.bf16.msra.mxu1 %v7120_v0  ;;  %v7897_v63 = vld [vmem:[#allocation8 + $0x164] ss:$16 sps:$4 sm:$0xff]   ;;  %v7200_v5 = vcombine.low %v929_v46, %v933_v59 }
 0x2a9   : > { %3867 = vmatprep.subr.bf16.mxu1 %v7129_v4  ;;  %v937_v0 = vld [vmem:[#allocation5 + $0xd18] sm:$0xff] }
 0x2aa   : > { %5508 = vmatpush1.bf16.msra.mxu0 %v7868_v6  ;;  %v941_v2 = vld [vmem:[#allocation5 + $0xd38] sm:$0xff] }
 0x2ab   : > { %5509 = vmatprep.subr.bf16.mxu0 %v7873_v12  ;;  %v7895_v4 = vld [vmem:[#allocation8 + $0x160] ss:$16 sps:$4 sm:$0xff]   ;;  %v7912_v41 = vld [vmem:[#allocation8 + $0x204] ss:$16 sps:$4 sm:$0xff]  }
 0x2ac   : > { %3868 = vmatpush1.bf16.msra.mxu1 %v7128_v7  ;;  %v945_v6 = vld [vmem:[#allocation5 + $0xd58] sm:$0xff] }
 0x2ad   : > { %3869 = vmatprep.subr.bf16.mxu1 %v7137_v8  ;;  %v949_v7 = vld [vmem:[#allocation5 + $0xd78] sm:$0xff]  ;;  %v7208_v8 = vcombine.low %v937_v0, %v941_v2 }
 0x2ae   : > { %5510 = vmatpush1.bf16.msra.mxu0 %v7871_v13  ;;  %v7898_v12 = vld [vmem:[#allocation8 + $0x180] ss:$16 sps:$4 sm:$0xff]   ;;  %v7217_v11 = vcombine.high %v945_v6, %v949_v7  ;;  %v982_v13 = vsub.s32 3, %v9134_v3  ;;  %v7216_v21 = vcombine.low %v945_v6, %v949_v7  ;;  %v7918_v49 = vld [vmem:[#allocation8 + $0x224] ss:$16 sps:$4 sm:$0xff]  }
 0x2af   : > { %5511 = vmatprep.subr.bf16.mxu0 %v7876_v19  ;;  %v957_v19 = vld [vmem:[#allocation5 + $0xdb8] sm:$0xff]  ;;  %v7957_v7 = vld [vmem:[#allocation8 + $0xec] ss:$16 sps:$4 sm:$0xff]  }
 0x2b0   : > { %3870 = vmatpush1.bf16.msra.mxu1 %v7136_v17  ;;  %v953_v17 = vld [vmem:[#allocation5 + $0xd98] sm:$0xff] }
 0x2b1   : > { %3871 = vmatprep.subr.bf16.mxu1 %v7145_v20  ;;  %v7901_v20 = vld [vmem:[#allocation8 + $0x1a0] ss:$16 sps:$4 sm:$0xff]   ;;  %v7954_v6 = vld [vmem:[#allocation8 + $0x2e4] ss:$16 sps:$4 sm:$0xff]  }
 0x2b2   : > { %5512 = vmatpush1.bf16.msra.mxu0 %v7874_v24  ;;  %v7225_v24 = vcombine.high %v953_v17, %v957_v19  ;;  %v965_v28 = vld [vmem:[#allocation5 + $0xdf8] sm:$0xff] }
 0x2b3   : > { %5513 = vmatprep.subr.bf16.mxu0 %v7879_v26  ;;  %v983_v26 = vrot.slane %v9139_v15, %v982_v13 }
 0x2b4   : > { %3872 = vmatpush1.bf16.msra.mxu1 %v7144_v25 }
 0x2b5   : > { %3873 = vmatprep.subr.bf16.mxu1 %v7153_v27  ;;  %v961_v27 = vld [vmem:[#allocation5 + $0xdd8] sm:$0xff] }
 0x2b6   : > { %5514 = vmatpush1.bf16.msra.mxu0 %v7877_v30  ;;  %v7904_v30 = vld [vmem:[#allocation8 + $0x1c0] ss:$16 sps:$4 sm:$0xff]   ;;  %v7233_v61 = vcombine.high %v961_v27, %v965_v28 }
 0x2b7   : > { %5515 = vmatprep.subr.bf16.mxu0 %v7882_v33  ;;  %v7224_v33 = vcombine.low %v953_v17, %v957_v19  ;;  %v7958_v17 = vld [vmem:[#allocation8 + $0x300] ss:$16 sps:$4 sm:$0xff]   ;;  %v7961_v19 = vld [vmem:[#allocation8 + $0x108] ss:$16 sps:$4 sm:$0xff]  }
 0x2b8   : > { %3874 = vmatpush1.bf16.msra.mxu1 %v7152_v31 }
 0x2b9   : > { %3875 = vmatprep.subr.bf16.mxu1 %v7161_v35  ;;  %v7909_v35 = vld [vmem:[#allocation8 + $0x1e4] ss:$16 sps:$4 sm:$0xff]  }
 0x2ba   : > { %5516 = vmatpush1.bf16.msra.mxu0 %v7880_v37 }
 0x2bb   : > { %5517 = vmatprep.subr.bf16.mxu0 %v7885_v39  ;;  %v3929_v39 = vmax.f32 %v9149_v42, 0.0  ;;  %v7921_v42 = vld [vmem:[#allocation8 + $0x2c] ss:$16 sps:$4 sm:$0xff]  }
 0x2bc   : > { %3876 = vmatpush1.bf16.msra.mxu1 %v7160_v38  ;;  %v7907_v38 = vld [vmem:[#allocation8 + $0x1e0] ss:$16 sps:$4 sm:$0xff]  }
 0x2bd   : > { %3877 = vmatprep.subr.bf16.mxu1 %v7169_v40  ;;  %v7232_v40 = vcombine.low %v961_v27, %v965_v28  ;;  %v7975_v27 = vld [vmem:[#allocation8 + $0x14c] ss:$16 sps:$4 sm:$0xff]   ;;  %v7970_v28 = vld [vmem:[#allocation8 + $0x340] ss:$16 sps:$4 sm:$0xff]  }
 0x2be   : > { %5518 = vmatpush1.bf16.msra.mxu0 %v7883_v18 }
 0x2bf   : > { %5519 = vmatprep.subr.bf16.mxu0 %v7888_v45  ;;  %v9165_v45 = vpack.c.bf16 %v3929_v39, %v3929_v39  ;;  %v7985_v39 = vld [vmem:[#allocation8 + $0x188] ss:$16 sps:$4 sm:$0xff]  }
 0x2c0   : > { %3878 = vmatpush1.bf16.msra.mxu1 %v7168_v43  ;;  %v7910_v43 = vld [vmem:[#allocation8 + $0x200] ss:$16 sps:$4 sm:$0xff]  }
 0x2c1   : > { %3888 = vmatprep.subr.bf16.mxu1 %v7177_v48  ;;  %v7913_v48 = vld [vmem:[#allocation8 + $0x8] ss:$16 sps:$4 sm:$0xff]  }
 0x2c2   : > { %5520 = vmatpush1.bf16.msra.mxu0 %v7886_v51  ;;  %v8371_v51 = vld [vmem:[%s9044_s14 + $0x18] ss:$0 sps:$4 sm:$0xff]  }
 0x2c3   : > { %3880 = vmatmul.mubr.bf16.vlgmr.msra.gmra.mrb[8].mxu1 %v9109_v47  ;;  %5521 = vmatprep.subr.bf16.mxu0 %v7891_v53  ;;  %v7201_v47 = vcombine.high %v929_v46, %v933_v59  ;;  %v7919_v53 = vld [vmem:[#allocation8 + $0x28] ss:$16 sps:$4 sm:$0xff]   ;;  %v7936_v59 = vld [vmem:[#allocation8 + $0x284] ss:$16 sps:$4 sm:$0xff]  }
 0x2c4   : > { %3889 = vmatpush1.bf16.msra.mxu1 %v7176_v52  ;;  %3920 = vmatprep.mubr.bf16.mxu1 %v8696_v1  ;;  %v7209_v1 = vcombine.high %v937_v0, %v941_v2  ;;  %v7916_v52 = vld [vmem:[#allocation8 + $0x220] ss:$16 sps:$4 sm:$0xff]   ;;  %v7931_v46 = vld [vmem:[#allocation8 + $0x68] ss:$16 sps:$4 sm:$0xff]  }
 0x2c5   : > { %3890 = vmatprep.subr.bf16.mxu1 %v7185_v54  ;;  %v7924_v54 = vld [vmem:[#allocation8 + $0x244] ss:$16 sps:$4 sm:$0xff]   ;;  %v7940_v0 = vld [vmem:[#allocation8 + $0x2a0] ss:$16 sps:$4 sm:$0xff]   ;;  %v7943_v2 = vld [vmem:[#allocation8 + $0xa8] ss:$16 sps:$4 sm:$0xff]  }
 0x2c6   : > { %5522 = vmatpush1.bf16.msra.mxu0 %v7889_v55  ;;  %v7925_v55 = vld [vmem:[#allocation8 + $0x48] ss:$16 sps:$4 sm:$0xff]  }
 0x2c7   : > { %5523 = vmatprep.subr.bf16.mxu0 %v7894_v58  ;;  %v7933_v58 = vld [vmem:[#allocation8 + $0x6c] ss:$16 sps:$4 sm:$0xff]  }
 0x2c8   : > { %3891 = vmatpush1.bf16.msra.mxu1 %v7184_v56  ;;  %v7930_v56 = vld [vmem:[#allocation8 + $0x264] ss:$16 sps:$4 sm:$0xff]  }
 0x2c9   : > { %3892 = vmatprep.subr.bf16.mxu1 %v7193_v57  ;;  %v7928_v57 = vld [vmem:[#allocation8 + $0x260] ss:$16 sps:$4 sm:$0xff]  }
 0x2ca   : > { %5524 = vmatpush1.bf16.msra.mxu0 %v7892_v60  ;;  %v7939_v60 = vld [vmem:[#allocation8 + $0x8c] ss:$16 sps:$4 sm:$0xff]  }
 0x2cb   : > { %5525 = vmatprep.subr.bf16.mxu0 %v7897_v63  ;;  %v7942_v63 = vld [vmem:[#allocation8 + $0x2a4] ss:$16 sps:$4 sm:$0xff]  }
 0x2cc   : > { %3893 = vmatpush1.bf16.msra.mxu1 %v7192_v62  ;;  %v7937_v62 = vld [vmem:[#allocation8 + $0x88] ss:$16 sps:$4 sm:$0xff]  }
 0x2cd   : > { %3894 = vmatprep.subr.bf16.mxu1 %v7201_v47  ;;  %v7945_v47 = vld [vmem:[#allocation8 + $0xac] ss:$16 sps:$4 sm:$0xff]  }
 0x2ce   : > { %5526 = vmatpush1.bf16.msra.mxu0 %v7895_v4  ;;  %v7948_v4 = vld [vmem:[#allocation8 + $0x2c4] ss:$16 sps:$4 sm:$0xff]  }
 0x2cf   : > { %5527 = vmatprep.subr.bf16.mxu0 %v7900_v34  ;;  %v7946_v34 = vld [vmem:[#allocation8 + $0x2c0] ss:$16 sps:$4 sm:$0xff]  }
 0x2d0   : > { %3895 = vmatpush1.bf16.msra.mxu1 %v7200_v5  ;;  %v7951_v5 = vld [vmem:[#allocation8 + $0xcc] ss:$16 sps:$4 sm:$0xff]  }
 0x2d1   : > { %3896 = vmatprep.subr.bf16.mxu1 %v7209_v1  ;;  %v7949_v1 = vld [vmem:[#allocation8 + $0xc8] ss:$16 sps:$4 sm:$0xff]  }
 0x2d2   : > { %5528 = vmatpush1.bf16.msra.mxu0 %v7898_v12  ;;  %v7952_v12 = vld [vmem:[#allocation8 + $0x2e0] ss:$16 sps:$4 sm:$0xff]  }
 0x2d3   : > { %5529 = vmatprep.subr.bf16.mxu0 %v7903_v10  ;;  %v7960_v10 = vld [vmem:[#allocation8 + $0x304] ss:$16 sps:$4 sm:$0xff]  }
 0x2d4   : > { %3897 = vmatpush1.bf16.msra.mxu1 %v7208_v8  ;;  %v7955_v8 = vld [vmem:[#allocation8 + $0xe8] ss:$16 sps:$4 sm:$0xff]  }
 0x2d5   : > { %3898 = vmatprep.subr.bf16.mxu1 %v7217_v11  ;;  %v7963_v11 = vld [vmem:[#allocation8 + $0x10c] ss:$16 sps:$4 sm:$0xff]  }
 0x2d6   : > { %v9159_v25 = vpop.f32.mrb[4].mxu1  ;;  %5530 = vmatpush1.bf16.msra.mxu0 %v7901_v20  ;;  %v7966_v20 = vld [vmem:[#allocation8 + $0x324] ss:$16 sps:$4 sm:$0xff]  }
 0x2d7   : > { %v3596_v29 = vpop.f32.mrb[5].mxu1  ;;  %5531 = vmatprep.subr.bf16.mxu0 %v7906_v23  ;;  %v7964_v23 = vld [vmem:[#allocation8 + $0x320] ss:$16 sps:$4 sm:$0xff]  }
 0x2d8   : > { %v3598_v31 = vpop.f32.mrb[6].mxu1  ;;  %3899 = vmatpush1.bf16.msra.mxu1 %v7216_v21  ;;  %v7638_v37 = vadd.f32 %v3596_v29, %v983_v26  ;;  %v7969_v21 = vld [vmem:[#allocation8 + $0x12c] ss:$16 sps:$4 sm:$0xff]   ;;  %v7972_v26 = vld [vmem:[#allocation8 + $0x344] ss:$16 sps:$4 sm:$0xff]  }
 0x2d9   : > { %v3599_v36 = vpop.f32.mrb[7].mxu1  ;;  %3900 = vmatprep.subr.bf16.mxu1 %v7225_v24  ;;  %v7967_v24 = vld [vmem:[#allocation8 + $0x128] ss:$16 sps:$4 sm:$0xff]   ;;  %v7981_v31 = vld [vmem:[#allocation8 + $0x16c] ss:$16 sps:$4 sm:$0xff]  }
 0x2da   : > { %5532 = vmatpush1.bf16.msra.mxu0 %v7904_v30  ;;  %v3932_v18 = vmax.f32 %v7638_v37, 0.0  ;;  %v7973_v29 = vld [vmem:[#allocation8 + $0x148] ss:$16 sps:$4 sm:$0xff]   ;;  %v7978_v30 = vld [vmem:[#allocation8 + $0x364] ss:$16 sps:$4 sm:$0xff]  }
 0x2db   : > { %5533 = vmatprep.subr.bf16.mxu0 %v7909_v35  ;;  %v7979_v35 = vld [vmem:[#allocation8 + $0x168] ss:$16 sps:$4 sm:$0xff]   ;;  %v7984_v36 = vld [vmem:[#allocation8 + $0x384] ss:$16 sps:$4 sm:$0xff]   ;;  %v7982_v37 = vld [vmem:[#allocation8 + $0x380] ss:$16 sps:$4 sm:$0xff]  }
 0x2dc   : > { %3901 = vmatpush1.bf16.msra.mxu1 %v7224_v33  ;;  %v9167_v50 = vpack.c.bf16 %v3932_v18, %v3932_v18  ;;  %v7976_v33 = vld [vmem:[#allocation8 + $0x360] ss:$16 sps:$4 sm:$0xff]  }
 0x2dd   : > { %3902 = vmatprep.subr.bf16.mxu1 %v7233_v61  ;;  %v7987_v61 = vld [vmem:[#allocation8 + $0x18c] ss:$16 sps:$4 sm:$0xff]  }
 0x2de   : > { %5534 = vmatpush1.bf16.msra.mxu0 %v7907_v38  ;;  %v978_v38 = vsub.s32 2, %v9134_v3 }
 0x2df   : > { %5544 = vmatprep.subr.bf16.mxu0 %v7912_v41  ;;  %v7993_v41 = vld [vmem:[#allocation8 + $0x1ac] ss:$16 sps:$4 sm:$0xff]  }
 0x2e0   : > { %3903 = vmatpush1.bf16.msra.mxu1 %v7232_v40  ;;  %v7990_v40 = vld [vmem:[#allocation8 + $0x3a4] ss:$16 sps:$4 sm:$0xff]   ;;  %v979_v18 = vrot.slane %v9139_v15, %v978_v38  ;;  %v8003_v15 = vld [vmem:[#allocation8 + $0x1e8] ss:$16 sps:$4 sm:$0xff]  }
 0x2e1   : > { %5667 = vmatprep.subr.bf16.mxu1 %v7915_v14  ;;  %5536 = vmatmul.mubr.bf16.vlgmr.msra.gmra.mrb[8].mxu0 %v9165_v45  ;;  %v7988_v14 = vld [vmem:[#allocation8 + $0x3a0] ss:$16 sps:$4 sm:$0xff]  }
 0x2e2   : > { %5545 = vmatpush1.bf16.msra.mxu0 %v7910_v43  ;;  %5576 = vmatprep.mubr.bf16.mxu0 %v9167_v50  ;;  %v7991_v43 = vld [vmem:[#allocation8 + $0x1a8] ss:$16 sps:$4 sm:$0xff]  }
 0x2e3   : > { %3921 = vmatmul.mubr.bf16.vlgmr.msra.gmra.mrb[8].mxu1 %v8371_v51  ;;  %5546 = vmatprep.subr.bf16.mxu0 %v7918_v49  ;;  %v7999_v49 = vld [vmem:[#allocation8 + $0x1cc] ss:$16 sps:$4 sm:$0xff]   ;;  %v7637_v51 = vadd.f32 %v9159_v25, %v979_v18  ;;  %v8006_v25 = vld [vmem:[#allocation8 + $0x208] ss:$16 sps:$4 sm:$0xff]   ;;  %v8093_v18 = vld [vmem:[#allocation8 + $0x560] ss:$16 sps:$4 sm:$0xff]  }
 0x2e4   : > { %5668 = vmatpush1.bf16.msra.mxu1 %v7913_v48  ;;  %5699 = vmatprep.mubr.bf16.mxu1 %v9152_v32  ;;  %v7934_v32 = vld [vmem:[#allocation8 + $0x280] ss:$16 sps:$4 sm:$0xff]   ;;  %v7996_v48 = vld [vmem:[#allocation8 + $0x3c4] ss:$16 sps:$4 sm:$0xff]  }
 0x2e5   : > { %5669 = vmatprep.subr.bf16.mxu1 %v7921_v42  ;;  %v7994_v42 = vld [vmem:[#allocation8 + $0x3c0] ss:$16 sps:$4 sm:$0xff]  }
 0x2e6   : > { %5547 = vmatpush1.bf16.msra.mxu0 %v7916_v52  ;;  %v7997_v52 = vld [vmem:[#allocation8 + $0x1c8] ss:$16 sps:$4 sm:$0xff]  }
 0x2e7   : > { %5548 = vmatprep.subr.bf16.mxu0 %v7924_v54  ;;  %v8005_v54 = vld [vmem:[#allocation8 + $0x1ec] ss:$16 sps:$4 sm:$0xff]  }
 0x2e8   : > { %5670 = vmatpush1.bf16.msra.mxu1 %v7919_v53  ;;  %v8002_v53 = vld [vmem:[#allocation8 + $0x3e4] ss:$16 sps:$4 sm:$0xff]  }
 0x2e9   : > { %5671 = vmatprep.subr.bf16.mxu1 %v7927_v22  ;;  %v8000_v22 = vld [vmem:[#allocation8 + $0x3e0] ss:$16 sps:$4 sm:$0xff]  }
 0x2ea   : > { %5549 = vmatpush1.bf16.msra.mxu0 %v7922_v44  ;;  %v3931_v44 = vmax.f32 %v7637_v51, 0.0  ;;  %v8060_v51 = vld [vmem:[#allocation8 + $0x388] ss:$16 sps:$4 sm:$0xff]  }
 0x2eb   : > { %5550 = vmatprep.subr.bf16.mxu0 %v7930_v56  ;;  %v8008_v56 = vld [vmem:[#allocation8 + $0x20c] ss:$16 sps:$4 sm:$0xff]  }
 0x2ec   : > { %5672 = vmatpush1.bf16.msra.mxu1 %v7925_v55  ;;  %v8029_v55 = vld [vmem:[#allocation8 + $0x404] ss:$16 sps:$4 sm:$0xff]  }
 0x2ed   : > { %5673 = vmatprep.subr.bf16.mxu1 %v7933_v58  ;;  %v8027_v58 = vld [vmem:[#allocation8 + $0x400] ss:$16 sps:$4 sm:$0xff]  }
 0x2ee   : > { %5551 = vmatpush1.bf16.msra.mxu0 %v7928_v57  ;;  %v9178_v57 = vpack.c.bf16 %v3931_v44, %v3931_v44  ;;  %v8113_v44 = vld [vmem:[#allocation8 + $0x5c4] ss:$16 sps:$4 sm:$0xff]  }
 0x2ef   : > { %5552 = vmatprep.subr.bf16.mxu0 %v7936_v59  ;;  %v8035_v59 = vld [vmem:[#allocation8 + $0x424] ss:$16 sps:$4 sm:$0xff]  }
 0x2f0   : > { %5674 = vmatpush1.bf16.msra.mxu1 %v7931_v46  ;;  %v8011_v46 = vld [vmem:[#allocation8 + $0x22c] ss:$16 sps:$4 sm:$0xff]  }
 0x2f1   : > { %5675 = vmatprep.subr.bf16.mxu1 %v7939_v60  ;;  %v8033_v60 = vld [vmem:[#allocation8 + $0x420] ss:$16 sps:$4 sm:$0xff]  }
 0x2f2   : > { %5553 = vmatpush1.bf16.msra.mxu0 %v7934_v32  ;;  %v8009_v32 = vld [vmem:[#allocation8 + $0x228] ss:$16 sps:$4 sm:$0xff]  }
 0x2f3   : > { %5554 = vmatprep.subr.bf16.mxu0 %v7942_v63  ;;  %v8014_v63 = vld [vmem:[#allocation8 + $0x24c] ss:$16 sps:$4 sm:$0xff]  }
 0x2f4   : > { %5676 = vmatpush1.bf16.msra.mxu1 %v7937_v62  ;;  %v8041_v62 = vld [vmem:[#allocation8 + $0x444] ss:$16 sps:$4 sm:$0xff]  }
 0x2f5   : > { %5677 = vmatprep.subr.bf16.mxu1 %v7945_v47  ;;  %v8039_v47 = vld [vmem:[#allocation8 + $0x440] ss:$16 sps:$4 sm:$0xff]  }
 0x2f6   : > { %5555 = vmatpush1.bf16.msra.mxu0 %v7940_v0  ;;  %v8012_v0 = vld [vmem:[#allocation8 + $0x248] ss:$16 sps:$4 sm:$0xff]  }
 0x2f7   : > { %5556 = vmatprep.subr.bf16.mxu0 %v7948_v4  ;;  %v8017_v4 = vld [vmem:[#allocation8 + $0x26c] ss:$16 sps:$4 sm:$0xff]  }
 0x2f8   : > { %5678 = vmatpush1.bf16.msra.mxu1 %v7943_v2  ;;  %v8047_v2 = vld [vmem:[#allocation8 + $0x464] ss:$16 sps:$4 sm:$0xff]  }
 0x2f9   : > { %5679 = vmatprep.subr.bf16.mxu1 %v7951_v5  ;;  %v8015_v5 = vld [vmem:[#allocation8 + $0x268] ss:$16 sps:$4 sm:$0xff]  }
 0x2fa   : > { %5557 = vmatpush1.bf16.msra.mxu0 %v7946_v34  ;;  %v8053_v34 = vld [vmem:[#allocation8 + $0x484] ss:$16 sps:$4 sm:$0xff]  }
 0x2fb   : > { %5558 = vmatprep.subr.bf16.mxu0 %v7954_v6  ;;  %v8018_v6 = vld [vmem:[#allocation8 + $0x288] ss:$16 sps:$4 sm:$0xff]  }
 0x2fc   : > { %5680 = vmatpush1.bf16.msra.mxu1 %v7949_v1  ;;  %v8051_v1 = vld [vmem:[#allocation8 + $0x480] ss:$16 sps:$4 sm:$0xff]  }
 0x2fd   : > { %5681 = vmatprep.subr.bf16.mxu1 %v7957_v7  ;;  %v8059_v7 = vld [vmem:[#allocation8 + $0x4a4] ss:$16 sps:$4 sm:$0xff]  }
 0x2fe   : > { %5559 = vmatpush1.bf16.msra.mxu0 %v7952_v12  ;;  %v8023_v12 = vld [vmem:[#allocation8 + $0x2ac] ss:$16 sps:$4 sm:$0xff]  }
 0x2ff   : > { %5560 = vmatprep.subr.bf16.mxu0 %v7960_v10  ;;  %v8021_v10 = vld [vmem:[#allocation8 + $0x2a8] ss:$16 sps:$4 sm:$0xff]  }
 0x300   : > { %5682 = vmatpush1.bf16.msra.mxu1 %v7955_v8  ;;  %v8057_v8 = vld [vmem:[#allocation8 + $0x4a0] ss:$16 sps:$4 sm:$0xff]  }
 0x301   : > { %5683 = vmatprep.subr.bf16.mxu1 %v7963_v11  ;;  %v8065_v11 = vld [vmem:[#allocation8 + $0x4c4] ss:$16 sps:$4 sm:$0xff]  }
 0x302   : > { %5561 = vmatpush1.bf16.msra.mxu0 %v7958_v17  ;;  %v8026_v17 = vld [vmem:[#allocation8 + $0x2cc] ss:$16 sps:$4 sm:$0xff]  }
 0x303   : > { %5562 = vmatprep.subr.bf16.mxu0 %v7966_v20  ;;  %v8024_v20 = vld [vmem:[#allocation8 + $0x2c8] ss:$16 sps:$4 sm:$0xff]  }
 0x304   : > { %5684 = vmatpush1.bf16.msra.mxu1 %v7961_v19  ;;  %v8063_v19 = vld [vmem:[#allocation8 + $0x4c0] ss:$16 sps:$4 sm:$0xff]  }
 0x305   : > { %5685 = vmatprep.subr.bf16.mxu1 %v7969_v21  ;;  %v8071_v21 = vld [vmem:[#allocation8 + $0x4e4] ss:$16 sps:$4 sm:$0xff]  }
 0x306   : > { %5563 = vmatpush1.bf16.msra.mxu0 %v7964_v23  ;;  %v8032_v23 = vld [vmem:[#allocation8 + $0x2ec] ss:$16 sps:$4 sm:$0xff]  }
 0x307   : > { %5564 = vmatprep.subr.bf16.mxu0 %v7972_v26  ;;  %v8030_v26 = vld [vmem:[#allocation8 + $0x2e8] ss:$16 sps:$4 sm:$0xff]  }
 0x308   : > { %5686 = vmatpush1.bf16.msra.mxu1 %v7967_v24  ;;  %v8069_v24 = vld [vmem:[#allocation8 + $0x4e0] ss:$16 sps:$4 sm:$0xff]  }
 0x309   : > { %5687 = vmatprep.subr.bf16.mxu1 %v7975_v27  ;;  %v8077_v27 = vld [vmem:[#allocation8 + $0x504] ss:$16 sps:$4 sm:$0xff]  }
 0x30a   : > { %5565 = vmatpush1.bf16.msra.mxu0 %v7970_v28  ;;  %v8038_v28 = vld [vmem:[#allocation8 + $0x30c] ss:$16 sps:$4 sm:$0xff]  }
 0x30b   : > { %5566 = vmatprep.subr.bf16.mxu0 %v7978_v30  ;;  %v8036_v30 = vld [vmem:[#allocation8 + $0x308] ss:$16 sps:$4 sm:$0xff]  }
 0x30c   : > { %5688 = vmatpush1.bf16.msra.mxu1 %v7973_v29  ;;  %v8075_v29 = vld [vmem:[#allocation8 + $0x500] ss:$16 sps:$4 sm:$0xff]  }
 0x30d   : > { %5689 = vmatprep.subr.bf16.mxu1 %v7981_v31  ;;  %v8083_v31 = vld [vmem:[#allocation8 + $0x524] ss:$16 sps:$4 sm:$0xff]  }
 0x30e   : > { %5567 = vmatpush1.bf16.msra.mxu0 %v7976_v33  ;;  %v8044_v33 = vld [vmem:[#allocation8 + $0x32c] ss:$16 sps:$4 sm:$0xff]  }
 0x30f   : > { %5568 = vmatprep.subr.bf16.mxu0 %v7984_v36  ;;  %v8042_v36 = vld [vmem:[#allocation8 + $0x328] ss:$16 sps:$4 sm:$0xff]  }
 0x310   : > { %5690 = vmatpush1.bf16.msra.mxu1 %v7979_v35  ;;  %v8081_v35 = vld [vmem:[#allocation8 + $0x520] ss:$16 sps:$4 sm:$0xff]  }
 0x311   : > { %5691 = vmatprep.subr.bf16.mxu1 %v7987_v61  ;;  %v8089_v61 = vld [vmem:[#allocation8 + $0x544] ss:$16 sps:$4 sm:$0xff]  }
 0x312   : > { %5569 = vmatpush1.bf16.msra.mxu0 %v7982_v37  ;;  %v8050_v37 = vld [vmem:[#allocation8 + $0x34c] ss:$16 sps:$4 sm:$0xff]  }
 0x313   : > { %5570 = vmatprep.subr.bf16.mxu0 %v7990_v40  ;;  %v8048_v40 = vld [vmem:[#allocation8 + $0x348] ss:$16 sps:$4 sm:$0xff]  }
 0x314   : > { %5692 = vmatpush1.bf16.msra.mxu1 %v7985_v39  ;;  %v8087_v39 = vld [vmem:[#allocation8 + $0x540] ss:$16 sps:$4 sm:$0xff]  }
 0x315   : > { %5693 = vmatprep.subr.bf16.mxu1 %v7993_v41  ;;  %v8095_v41 = vld [vmem:[#allocation8 + $0x564] ss:$16 sps:$4 sm:$0xff]  }
 0x316   : > { %5571 = vmatpush1.bf16.msra.mxu0 %v7988_v14  ;;  %v8056_v14 = vld [vmem:[#allocation8 + $0x36c] ss:$16 sps:$4 sm:$0xff]  }
 0x317   : > { %5572 = vmatprep.subr.bf16.mxu0 %v7996_v48  ;;  %v8101_v48 = vld [vmem:[#allocation8 + $0x584] ss:$16 sps:$4 sm:$0xff]  }
 0x318   : > { %5694 = vmatpush1.bf16.msra.mxu1 %v7991_v43  ;;  %v8054_v43 = vld [vmem:[#allocation8 + $0x368] ss:$16 sps:$4 sm:$0xff]  }
 0x319   : > { %5695 = vmatprep.subr.bf16.mxu1 %v7999_v49  ;;  %v8062_v49 = vld [vmem:[#allocation8 + $0x38c] ss:$16 sps:$4 sm:$0xff]  }
 0x31a   : > { %5573 = vmatpush1.bf16.msra.mxu0 %v7994_v42  ;;  %v8099_v42 = vld [vmem:[#allocation8 + $0x580] ss:$16 sps:$4 sm:$0xff]  }
 0x31b   : > { %5574 = vmatprep.subr.bf16.mxu0 %v8002_v53  ;;  %v8068_v53 = vld [vmem:[#allocation8 + $0x3ac] ss:$16 sps:$4 sm:$0xff]  }
 0x31c   : > { %5696 = vmatpush1.bf16.msra.mxu1 %v7997_v52  ;;  %v8107_v52 = vld [vmem:[#allocation8 + $0x5a4] ss:$16 sps:$4 sm:$0xff]  }
 0x31d   : > { %5697 = vmatprep.subr.bf16.mxu1 %v8005_v54  ;;  %v8105_v54 = vld [vmem:[#allocation8 + $0x5a0] ss:$16 sps:$4 sm:$0xff]  }
 0x31e   : > { %5575 = vmatpush1.bf16.msra.mxu0 %v8000_v22  ;;  %v8066_v22 = vld [vmem:[#allocation8 + $0x3a8] ss:$16 sps:$4 sm:$0xff]  }
 0x31f   : > { %5585 = vmatprep.subr.bf16.mxu0 %v8029_v55  ;;  %v8111_v55 = vld [vmem:[#allocation8 + $0x5c0] ss:$16 sps:$4 sm:$0xff]  }
 0x320   : > { %5698 = vmatpush1.bf16.msra.mxu1 %v8003_v15  ;;  %v8074_v15 = vld [vmem:[#allocation8 + $0x3cc] ss:$16 sps:$4 sm:$0xff]  }
 0x321   : > { %5708 = vmatprep.subr.bf16.mxu1 %v8008_v56  ;;  %5577 = vmatmul.mubr.bf16.vlgmr.msra.gmra.mrb[8].mxu0 %v9178_v57  ;;  %v8072_v56 = vld [vmem:[#allocation8 + $0x3c8] ss:$16 sps:$4 sm:$0xff]  }
 0x322   : > { %5586 = vmatpush1.bf16.msra.mxu0 %v8027_v58  ;;  %v8119_v58 = vld [vmem:[#allocation8 + $0x5e4] ss:$16 sps:$4 sm:$0xff]  }
 0x323   : > { %5700 = vmatmul.mubr.bf16.vlgmr.msra.gmra.mrb[12].mxu1 %v9165_v45  ;;  %5587 = vmatprep.subr.bf16.mxu0 %v8035_v59  ;;  %v8045_v45 = vld [vmem:[#allocation8 + $0x460] ss:$16 sps:$4 sm:$0xff]   ;;  %v8078_v59 = vld [vmem:[#allocation8 + $0x3e8] ss:$16 sps:$4 sm:$0xff]  }
 0x324   : > { %5709 = vmatpush1.bf16.msra.mxu1 %v8006_v25  ;;  %5740 = vmatprep.mubr.bf16.mxu1 %v9167_v50  ;;  %v8020_v50 = vld [vmem:[#allocation8 + $0x28c] ss:$16 sps:$4 sm:$0xff]  }
 0x325   : > { %5710 = vmatprep.subr.bf16.mxu1 %v8011_v46  ;;  %v8080_v25 = vld [vmem:[#allocation8 + $0x3ec] ss:$16 sps:$4 sm:$0xff]   ;;  %v8117_v46 = vld [vmem:[#allocation8 + $0x5e0] ss:$16 sps:$4 sm:$0xff]  }
 0x326   : > { %5588 = vmatpush1.bf16.msra.mxu0 %v8033_v60  ;;  %v8125_v60 = vld [vmem:[#allocation8 + $0x604] ss:$16 sps:$4 sm:$0xff]  }
 0x327   : > { %5589 = vmatprep.subr.bf16.mxu0 %v8041_v62  ;;  %v8084_v62 = vld [vmem:[#allocation8 + $0x408] ss:$16 sps:$4 sm:$0xff]  }
 0x328   : > { %5711 = vmatpush1.bf16.msra.mxu1 %v8009_v32  ;;  %v8086_v32 = vld [vmem:[#allocation8 + $0x40c] ss:$16 sps:$4 sm:$0xff]  }
 0x329   : > { %5712 = vmatprep.subr.bf16.mxu1 %v8014_v63  ;;  %v8092_v63 = vld [vmem:[#allocation8 + $0x42c] ss:$16 sps:$4 sm:$0xff]  }
 0x32a   : > { %5590 = vmatpush1.bf16.msra.mxu0 %v8039_v47  ;;  %v8090_v47 = vld [vmem:[#allocation8 + $0x428] ss:$16 sps:$4 sm:$0xff]  }
 0x32b   : > { %5591 = vmatprep.subr.bf16.mxu0 %v8047_v2  ;;  %v8096_v2 = vld [vmem:[#allocation8 + $0x448] ss:$16 sps:$4 sm:$0xff]  }
 0x32c   : > { %5713 = vmatpush1.bf16.msra.mxu1 %v8012_v0  ;;  %v8098_v0 = vld [vmem:[#allocation8 + $0x44c] ss:$16 sps:$4 sm:$0xff]  }
 0x32d   : > { %5714 = vmatprep.subr.bf16.mxu1 %v8017_v4  ;;  %v8104_v4 = vld [vmem:[#allocation8 + $0x46c] ss:$16 sps:$4 sm:$0xff]  }
 0x32e   : > { %5592 = vmatpush1.bf16.msra.mxu0 %v8045_v45  ;;  %v8102_v45 = vld [vmem:[#allocation8 + $0x468] ss:$16 sps:$4 sm:$0xff]  }
 0x32f   : > { %5593 = vmatprep.subr.bf16.mxu0 %v8053_v34  ;;  %v986_v34 = vsub.s32 4, %v9134_v3 }
 0x330   : > { %5715 = vmatpush1.bf16.msra.mxu1 %v8015_v5  ;;  %v8110_v5 = vld [vmem:[#allocation8 + $0x48c] ss:$16 sps:$4 sm:$0xff]  }
 0x331   : > { %5716 = vmatprep.subr.bf16.mxu1 %v8020_v50  ;;  %v990_v50 = vsub.s32 5, %v9134_v3 }
 0x332   : > { %5594 = vmatpush1.bf16.msra.mxu0 %v8051_v1  ;;  %v8108_v1 = vld [vmem:[#allocation8 + $0x488] ss:$16 sps:$4 sm:$0xff]  }
 0x333   : > { %5595 = vmatprep.subr.bf16.mxu0 %v8059_v7 }
 0x334   : > { %5717 = vmatpush1.bf16.msra.mxu1 %v8018_v6  ;;  %v9186_v6 = vld [vmem:[#allocation7] sm:$0xff] }
 0x335   : > { %5718 = vmatprep.subr.bf16.mxu1 %v8023_v12  ;;  %v987_v7 = vrot.slane %v9186_v6, %v986_v34  ;;  %v991_v12 = vrot.slane %v9186_v6, %v990_v50  ;;  %v8185_v34 = vld [vmem:[#allocation8 + $0x744] ss:$16 sps:$4 sm:$0xff]   ;;  %v8188_v50 = vld [vmem:[#allocation8 + $0x62c] ss:$16 sps:$4 sm:$0xff]  }
 0x336   : > { %5596 = vmatpush1.bf16.msra.mxu0 %v8057_v8  ;;  %v8114_v8 = vld [vmem:[#allocation8 + $0x4a8] ss:$16 sps:$4 sm:$0xff]  }
 0x337   : > { %5597 = vmatprep.subr.bf16.mxu0 %v8065_v11  ;;  %v8122_v11 = vld [vmem:[#allocation8 + $0x4cc] ss:$16 sps:$4 sm:$0xff]  }
 0x338   : > { %5719 = vmatpush1.bf16.msra.mxu1 %v8021_v10 }
 0x339   : > { %5720 = vmatprep.subr.bf16.mxu1 %v8026_v17 }
 0x33a   : > { %5598 = vmatpush1.bf16.msra.mxu0 %v8063_v19 }
 0x33b   : > { %5599 = vmatprep.subr.bf16.mxu0 %v8071_v21 }
 0x33c   : > { %5721 = vmatpush1.bf16.msra.mxu1 %v8024_v20 }
 0x33d   : > { %5722 = vmatprep.subr.bf16.mxu1 %v8032_v23 }
 0x33e   : > { %5600 = vmatpush1.bf16.msra.mxu0 %v8069_v24 }
 0x33f   : > { %5601 = vmatprep.subr.bf16.mxu0 %v8077_v27 }
 0x340   : > { %5723 = vmatpush1.bf16.msra.mxu1 %v8030_v26  ;;  %v8120_v26 = vld [vmem:[#allocation8 + $0x4c8] ss:$16 sps:$4 sm:$0xff]  }
 0x341   : > { %5724 = vmatprep.subr.bf16.mxu1 %v8038_v28  ;;  %v8128_v28 = vld [vmem:[#allocation8 + $0x4ec] ss:$16 sps:$4 sm:$0xff]  }
 0x342   : > { %5602 = vmatpush1.bf16.msra.mxu0 %v8075_v29 }
 0x343   : > { %5603 = vmatprep.subr.bf16.mxu0 %v8083_v31 }
 0x344   : > { %5725 = vmatpush1.bf16.msra.mxu1 %v8036_v30  ;;  %v8123_v30 = vld [vmem:[#allocation8 + $0x600] ss:$16 sps:$4 sm:$0xff]  }
 0x345   : > { %5726 = vmatprep.subr.bf16.mxu1 %v8044_v33  ;;  %v8126_v33 = vld [vmem:[#allocation8 + $0x4e8] ss:$16 sps:$4 sm:$0xff]  }
 0x346   : > { %5604 = vmatpush1.bf16.msra.mxu0 %v8081_v35  ;;  %v8131_v35 = vld [vmem:[#allocation8 + $0x624] ss:$16 sps:$4 sm:$0xff]  }
 0x347   : > { %5605 = vmatprep.subr.bf16.mxu0 %v8089_v61  ;;  %v8129_v61 = vld [vmem:[#allocation8 + $0x620] ss:$16 sps:$4 sm:$0xff]  }
 0x348   : > { %5727 = vmatpush1.bf16.msra.mxu1 %v8042_v36  ;;  %v8134_v36 = vld [vmem:[#allocation8 + $0x50c] ss:$16 sps:$4 sm:$0xff]  }
 0x349   : > { %5728 = vmatprep.subr.bf16.mxu1 %v8050_v37  ;;  %v8132_v37 = vld [vmem:[#allocation8 + $0x508] ss:$16 sps:$4 sm:$0xff]  }
 0x34a   : > { %5606 = vmatpush1.bf16.msra.mxu0 %v8087_v39  ;;  %v8137_v39 = vld [vmem:[#allocation8 + $0x644] ss:$16 sps:$4 sm:$0xff]  }
 0x34b   : > { %5607 = vmatprep.subr.bf16.mxu0 %v8095_v41  ;;  %v8135_v41 = vld [vmem:[#allocation8 + $0x640] ss:$16 sps:$4 sm:$0xff]  }
 0x34c   : > { %5729 = vmatpush1.bf16.msra.mxu1 %v8048_v40  ;;  %v8140_v40 = vld [vmem:[#allocation8 + $0x52c] ss:$16 sps:$4 sm:$0xff]  }
 0x34d   : > { %5730 = vmatprep.subr.bf16.mxu1 %v8056_v14  ;;  %v8138_v14 = vld [vmem:[#allocation8 + $0x528] ss:$16 sps:$4 sm:$0xff]  }
 0x34e   : > { %5608 = vmatpush1.bf16.msra.mxu0 %v8093_v18  ;;  %v8143_v18 = vld [vmem:[#allocation8 + $0x664] ss:$16 sps:$4 sm:$0xff]  }
 0x34f   : > { %5609 = vmatprep.subr.bf16.mxu0 %v8101_v48  ;;  %v8141_v48 = vld [vmem:[#allocation8 + $0x660] ss:$16 sps:$4 sm:$0xff]  }
 0x350   : > { %5731 = vmatpush1.bf16.msra.mxu1 %v8054_v43  ;;  %v8146_v43 = vld [vmem:[#allocation8 + $0x54c] ss:$16 sps:$4 sm:$0xff]  }
 0x351   : > { %5732 = vmatprep.subr.bf16.mxu1 %v8062_v49  ;;  %v8144_v49 = vld [vmem:[#allocation8 + $0x548] ss:$16 sps:$4 sm:$0xff]  }
 0x352   : > { %5610 = vmatpush1.bf16.msra.mxu0 %v8099_v42  ;;  %v8149_v42 = vld [vmem:[#allocation8 + $0x684] ss:$16 sps:$4 sm:$0xff]  }
 0x353   : > { %5611 = vmatprep.subr.bf16.mxu0 %v8107_v52  ;;  %v8147_v52 = vld [vmem:[#allocation8 + $0x680] ss:$16 sps:$4 sm:$0xff]  }
 0x354   : > { %5733 = vmatpush1.bf16.msra.mxu1 %v8060_v51  ;;  %v8152_v51 = vld [vmem:[#allocation8 + $0x56c] ss:$16 sps:$4 sm:$0xff]  }
 0x355   : > { %5734 = vmatprep.subr.bf16.mxu1 %v8068_v53  ;;  %v8150_v53 = vld [vmem:[#allocation8 + $0x568] ss:$16 sps:$4 sm:$0xff]  }
 0x356   : > { %5612 = vmatpush1.bf16.msra.mxu0 %v8105_v54  ;;  %v8155_v54 = vld [vmem:[#allocation8 + $0x6a4] ss:$16 sps:$4 sm:$0xff]  }
 0x357   : > { %5613 = vmatprep.subr.bf16.mxu0 %v8113_v44  ;;  %v8153_v44 = vld [vmem:[#allocation8 + $0x6a0] ss:$16 sps:$4 sm:$0xff]  }
 0x358   : > { %5735 = vmatpush1.bf16.msra.mxu1 %v8066_v22  ;;  %v8158_v22 = vld [vmem:[#allocation8 + $0x58c] ss:$16 sps:$4 sm:$0xff]  }
 0x359   : > { %5736 = vmatprep.subr.bf16.mxu1 %v8074_v15  ;;  %v8156_v15 = vld [vmem:[#allocation8 + $0x588] ss:$16 sps:$4 sm:$0xff]  }
 0x35a   : > { %5614 = vmatpush1.bf16.msra.mxu0 %v8111_v55  ;;  %v8161_v55 = vld [vmem:[#allocation8 + $0x6c4] ss:$16 sps:$4 sm:$0xff]  }
 0x35b   : > { %5615 = vmatprep.subr.bf16.mxu0 %v8119_v58  ;;  %v8159_v58 = vld [vmem:[#allocation8 + $0x6c0] ss:$16 sps:$4 sm:$0xff]  }
 0x35c   : > { %5737 = vmatpush1.bf16.msra.mxu1 %v8072_v56  ;;  %v8164_v56 = vld [vmem:[#allocation8 + $0x5ac] ss:$16 sps:$4 sm:$0xff]  }
 0x35d   : > { %5738 = vmatprep.subr.bf16.mxu1 %v8080_v25  ;;  %v8162_v25 = vld [vmem:[#allocation8 + $0x5a8] ss:$16 sps:$4 sm:$0xff]  }
 0x35e   : > { %5616 = vmatpush1.bf16.msra.mxu0 %v8117_v46  ;;  %v8167_v46 = vld [vmem:[#allocation8 + $0x6e4] ss:$16 sps:$4 sm:$0xff]  }
 0x35f   : > { %5626 = vmatprep.subr.bf16.mxu0 %v8125_v60  ;;  %v8165_v60 = vld [vmem:[#allocation8 + $0x6e0] ss:$16 sps:$4 sm:$0xff]  }
 0x360   : > { %5739 = vmatpush1.bf16.msra.mxu1 %v8078_v59  ;;  %v8170_v59 = vld [vmem:[#allocation8 + $0x5cc] ss:$16 sps:$4 sm:$0xff]  }
 0x361   : > { %5749 = vmatprep.subr.bf16.mxu1 %v8086_v32  ;;  %v8168_v32 = vld [vmem:[#allocation8 + $0x5c8] ss:$16 sps:$4 sm:$0xff]  }
 0x363   : > { %5741 = vmatmul.mubr.bf16.vlgmr.msra.gmra.mrb[12].mxu1 %v9178_v57  ;;  %v8116_v57 = vld [vmem:[#allocation8 + $0x4ac] ss:$16 sps:$4 sm:$0xff]  }
 0x364   : > { %5750 = vmatpush1.bf16.msra.mxu1 %v8084_v62  ;;  %v8173_v62 = vld [vmem:[#allocation8 + $0x704] ss:$16 sps:$4 sm:$0xff]  }
 0x365   : > { %5751 = vmatprep.subr.bf16.mxu1 %v8092_v63  ;;  %v8176_v63 = vld [vmem:[#allocation8 + $0x5ec] ss:$16 sps:$4 sm:$0xff]  }
 0x368   : > { %5752 = vmatpush1.bf16.msra.mxu1 %v8090_v47  ;;  %v8171_v47 = vld [vmem:[#allocation8 + $0x700] ss:$16 sps:$4 sm:$0xff]  }
 0x369   : > { %5753 = vmatprep.subr.bf16.mxu1 %v8098_v0  ;;  %v8174_v0 = vld [vmem:[#allocation8 + $0x5e8] ss:$16 sps:$4 sm:$0xff]  }
 0x36c   : > { %5754 = vmatpush1.bf16.msra.mxu1 %v8096_v2  ;;  %v8179_v2 = vld [vmem:[#allocation8 + $0x724] ss:$16 sps:$4 sm:$0xff]  }
 0x36d   : > { %5755 = vmatprep.subr.bf16.mxu1 %v8104_v4  ;;  %v8182_v4 = vld [vmem:[#allocation8 + $0x60c] ss:$16 sps:$4 sm:$0xff]  }
 0x370   : > { %5756 = vmatpush1.bf16.msra.mxu1 %v8102_v45  ;;  %v8177_v45 = vld [vmem:[#allocation8 + $0x720] ss:$16 sps:$4 sm:$0xff]  }
 0x371   : > { %5757 = vmatprep.subr.bf16.mxu1 %v8110_v5  ;;  %v8180_v5 = vld [vmem:[#allocation8 + $0x608] ss:$16 sps:$4 sm:$0xff]  }
 0x374   : > { %5758 = vmatpush1.bf16.msra.mxu1 %v8108_v1  ;;  %v3758_v10 = vpop.f32.mrb[4].mxu0  ;;  %v8183_v1 = vld [vmem:[#allocation8 + $0x740] ss:$16 sps:$4 sm:$0xff]  }
 0x375   : > { %5759 = vmatprep.subr.bf16.mxu1 %v8116_v57  ;;  %v7639_v17 = vadd.f32 %v3758_v10, %v987_v7  ;;  %v3760_v19 = vpop.f32.mrb[5].mxu0  ;;  %v8186_v57 = vld [vmem:[#allocation8 + $0x628] ss:$16 sps:$4 sm:$0xff]   ;;  %v8191_v7 = vld [vmem:[#allocation8 + $0x764] ss:$16 sps:$4 sm:$0xff]  }
 0x376   : > { %v7640_v20 = vadd.f32 %v3760_v19, %v991_v12  ;;  %v3762_v21 = vpop.f32.mrb[6].mxu0  ;;  %v8194_v12 = vld [vmem:[#allocation8 + $0x64c] ss:$16 sps:$4 sm:$0xff]   ;;  %v8192_v10 = vld [vmem:[#allocation8 + $0x648] ss:$16 sps:$4 sm:$0xff]  }
 0x377   : > { %v3933_v23 = vmax.f32 %v7639_v17, 0.0  ;;  %v3763_v24 = vpop.f32.mrb[7].mxu0  ;;  %v8200_v17 = vld [vmem:[#allocation8 + $0x66c] ss:$16 sps:$4 sm:$0xff]   ;;  %v8195_v19 = vld [vmem:[#allocation8 + $0x780] ss:$16 sps:$4 sm:$0xff]  }
 0x378   : > { %5760 = vmatpush1.bf16.msra.mxu1 %v8114_v8  ;;  %v3934_v27 = vmax.f32 %v7640_v20, 0.0  ;;  %v8189_v8 = vld [vmem:[#allocation8 + $0x760] ss:$16 sps:$4 sm:$0xff]   ;;  %v8198_v20 = vld [vmem:[#allocation8 + $0x668] ss:$16 sps:$4 sm:$0xff]  }
 0x379   : > { %5761 = vmatprep.subr.bf16.mxu1 %v8122_v11  ;;  %v9190_v31 = vpack.c.bf16 %v3933_v23, %v3933_v23  ;;  %v8197_v11 = vld [vmem:[#allocation8 + $0x784] ss:$16 sps:$4 sm:$0xff]   ;;  %v8206_v23 = vld [vmem:[#allocation8 + $0x68c] ss:$16 sps:$4 sm:$0xff]   ;;  %v8201_v24 = vld [vmem:[#allocation8 + $0x7a0] ss:$16 sps:$4 sm:$0xff]  }
 0x37a   : > { %v3942_v29 = vpack.c.bf16 %v3934_v27, %v3934_v27  ;;  %v8203_v21 = vld [vmem:[#allocation8 + $0x7a4] ss:$16 sps:$4 sm:$0xff]   ;;  %v8204_v27 = vld [vmem:[#allocation8 + $0x688] ss:$16 sps:$4 sm:$0xff]  }
 0x37c   : > { %5762 = vmatpush1.bf16.msra.mxu1 %v8120_v26  ;;  %5617 = vmatprep.mubr.bf16.mxu0 %v3942_v29  ;;  %v994_v26 = vsub.s32 6, %v9134_v3 }
 0x37d   : > { %5781 = vmatprep.mubr.bf16.mxu1 %v3942_v29  ;;  %5618 = vmatmul.mubr.bf16.vlgmr.msra.gmra.mrb[8].mxu0 %v9190_v31  ;;  %v8209_v29 = vld [vmem:[#allocation8 + $0x7c4] ss:$16 sps:$4 sm:$0xff]  }
 0x37e   : > { %5763 = vmatprep.subr.bf16.mxu1 %v8128_v28  ;;  %5627 = vmatpush1.bf16.msra.mxu0 %v8123_v30  ;;  %v998_v28 = vsub.s32 7, %v9134_v3  ;;  %v8212_v30 = vld [vmem:[#allocation8 + $0x6ac] ss:$16 sps:$4 sm:$0xff]  }
 0x37f   : > { %5628 = vmatprep.subr.bf16.mxu0 %v8131_v35  ;;  %v8356_v3 = vld [vmem:[#allocation14 + $0x78] sm:$0xff]  }
 0x380   : > { %5764 = vmatpush1.bf16.msra.mxu1 %v8126_v33  ;;  %v8207_v33 = vld [vmem:[#allocation8 + $0x7c0] ss:$16 sps:$4 sm:$0xff]   ;;  %v999_v35 = vrot.slane %v9186_v6, %v998_v28 }
 0x381   : > { %5765 = vmatprep.subr.bf16.mxu1 %v8134_v36  ;;  %v8210_v36 = vld [vmem:[#allocation8 + $0x6a8] ss:$16 sps:$4 sm:$0xff]  }
 0x382   : > { %5629 = vmatpush1.bf16.msra.mxu0 %v8129_v61  ;;  %v8215_v61 = vld [vmem:[#allocation8 + $0x7e4] ss:$16 sps:$4 sm:$0xff]   ;;  %v8278_v28 = vld [vmem:[#allocation11 + $0xa4] ss:$8 sps:$4 sm:$0xff]  }
 0x383   : > { %5630 = vmatprep.subr.bf16.mxu0 %v8137_v39 }
 0x384   : > { %5766 = vmatpush1.bf16.msra.mxu1 %v8132_v37  ;;  %v8218_v37 = vld [vmem:[#allocation8 + $0x6cc] ss:$16 sps:$4 sm:$0xff]  }
 0x385   : > { %5767 = vmatprep.subr.bf16.mxu1 %v8140_v40 }
 0x386   : > { %5631 = vmatpush1.bf16.msra.mxu0 %v8135_v41 }
 0x387   : > { %5632 = vmatprep.subr.bf16.mxu0 %v8143_v18 }
 0x388   : > { %5768 = vmatpush1.bf16.msra.mxu1 %v8138_v14  ;;  %v8213_v14 = vld [vmem:[#allocation8 + $0x7e0] ss:$16 sps:$4 sm:$0xff]  }
 0x389   : > { %5769 = vmatprep.subr.bf16.mxu1 %v8146_v43 }
 0x38a   : > { %5633 = vmatpush1.bf16.msra.mxu0 %v8141_v48  ;;  %v8216_v48 = vld [vmem:[#allocation8 + $0x6c8] ss:$16 sps:$4 sm:$0xff]  }
 0x38b   : > { %5634 = vmatprep.subr.bf16.mxu0 %v8149_v42 }
 0x38c   : > { %5770 = vmatpush1.bf16.msra.mxu1 %v8144_v49  ;;  %v8248_v49 = vld [vmem:[#allocation11 + $0x4] ss:$8 sps:$4 sm:$0xff]  }
 0x38d   : > { %5771 = vmatprep.subr.bf16.mxu1 %v8152_v51 }
 0x38e   : > { %5635 = vmatpush1.bf16.msra.mxu0 %v8147_v52 }
 0x38f   : > { %5636 = vmatprep.subr.bf16.mxu0 %v8155_v54  ;;  %v8219_v54 = vld [vmem:[#allocation8 + $0x6e8] ss:$16 sps:$4 sm:$0xff]  }
 0x390   : > { %5772 = vmatpush1.bf16.msra.mxu1 %v8150_v53 }
 0x391   : > { %5773 = vmatprep.subr.bf16.mxu1 %v8158_v22  ;;  %v8246_v22 = vld [vmem:[#allocation11] ss:$8 sps:$4 sm:$0xff]  }
 0x392   : > { %5637 = vmatpush1.bf16.msra.mxu0 %v8153_v44 }
 0x393   : > { %5638 = vmatprep.subr.bf16.mxu0 %v8161_v55  ;;  %v8251_v55 = vld [vmem:[#allocation11 + $0x14] ss:$8 sps:$4 sm:$0xff]  }
 0x394   : > { %5774 = vmatpush1.bf16.msra.mxu1 %v8156_v15  ;;  %v8224_v15 = vld [vmem:[#allocation8 + $0x70c] ss:$16 sps:$4 sm:$0xff]  }
 0x395   : > { %5775 = vmatprep.subr.bf16.mxu1 %v8164_v56  ;;  %v8222_v56 = vld [vmem:[#allocation8 + $0x708] ss:$16 sps:$4 sm:$0xff]  }
 0x396   : > { %5639 = vmatpush1.bf16.msra.mxu0 %v8159_v58  ;;  %v8249_v58 = vld [vmem:[#allocation11 + $0x10] ss:$8 sps:$4 sm:$0xff]  }
 0x397   : > { %5640 = vmatprep.subr.bf16.mxu0 %v8167_v46  ;;  %v8254_v46 = vld [vmem:[#allocation11 + $0x24] ss:$8 sps:$4 sm:$0xff]  }
 0x398   : > { %5776 = vmatpush1.bf16.msra.mxu1 %v8162_v25  ;;  %v8227_v25 = vld [vmem:[#allocation8 + $0x72c] ss:$16 sps:$4 sm:$0xff]  }
 0x399   : > { %5777 = vmatprep.subr.bf16.mxu1 %v8170_v59  ;;  %v8225_v59 = vld [vmem:[#allocation8 + $0x728] ss:$16 sps:$4 sm:$0xff]  }
 0x39a   : > { %5641 = vmatpush1.bf16.msra.mxu0 %v8165_v60  ;;  %v8252_v60 = vld [vmem:[#allocation11 + $0x20] ss:$8 sps:$4 sm:$0xff]  }
 0x39b   : > { %5642 = vmatprep.subr.bf16.mxu0 %v8173_v62  ;;  %v8257_v62 = vld [vmem:[#allocation11 + $0x34] ss:$8 sps:$4 sm:$0xff]  }
 0x39c   : > { %5778 = vmatpush1.bf16.msra.mxu1 %v8168_v32  ;;  %v8230_v32 = vld [vmem:[#allocation8 + $0x74c] ss:$16 sps:$4 sm:$0xff]  }
 0x39d   : > { %5779 = vmatprep.subr.bf16.mxu1 %v8176_v63  ;;  %v8228_v63 = vld [vmem:[#allocation8 + $0x748] ss:$16 sps:$4 sm:$0xff]  }
 0x39e   : > { %5643 = vmatpush1.bf16.msra.mxu0 %v8171_v47  ;;  %v8255_v47 = vld [vmem:[#allocation11 + $0x30] ss:$8 sps:$4 sm:$0xff]  }
 0x39f   : > { %5644 = vmatprep.subr.bf16.mxu0 %v8179_v2  ;;  %v8260_v2 = vld [vmem:[#allocation11 + $0x44] ss:$8 sps:$4 sm:$0xff]  }
 0x3a0   : > { %5780 = vmatpush1.bf16.msra.mxu1 %v8174_v0  ;;  %v8233_v0 = vld [vmem:[#allocation8 + $0x76c] ss:$16 sps:$4 sm:$0xff]  }
 0x3a1   : > { %5790 = vmatprep.subr.bf16.mxu1 %v8182_v4  ;;  %v8231_v4 = vld [vmem:[#allocation8 + $0x768] ss:$16 sps:$4 sm:$0xff]  }
 0x3a2   : > { %5645 = vmatpush1.bf16.msra.mxu0 %v8177_v45  ;;  %v8258_v45 = vld [vmem:[#allocation11 + $0x40] ss:$8 sps:$4 sm:$0xff]  }
 0x3a3   : > { %5782 = vmatmul.mubr.bf16.vlgmr.msra.gmra.mrb[12].mxu1 %v9190_v31  ;;  %5646 = vmatprep.subr.bf16.mxu0 %v8185_v34  ;;  %v995_v31 = vrot.slane %v9186_v6, %v994_v26  ;;  %v8221_v6 = vld [vmem:[#allocation8 + $0x6ec] ss:$16 sps:$4 sm:$0xff]   ;;  %v8263_v34 = vld [vmem:[#allocation11 + $0x54] ss:$8 sps:$4 sm:$0xff]  }
 0x3a4   : > { %5791 = vmatpush1.bf16.msra.mxu1 %v8180_v5  ;;  %v8236_v5 = vld [vmem:[#allocation8 + $0x78c] ss:$16 sps:$4 sm:$0xff]   ;;  %v8275_v26 = vld [vmem:[#allocation11 + $0x94] ss:$8 sps:$4 sm:$0xff]  }
 0x3a5   : > { %5792 = vmatprep.subr.bf16.mxu1 %v8188_v50  ;;  %v8234_v50 = vld [vmem:[#allocation8 + $0x788] ss:$16 sps:$4 sm:$0xff]  }
 0x3a6   : > { %5647 = vmatpush1.bf16.msra.mxu0 %v8183_v1  ;;  %v8261_v1 = vld [vmem:[#allocation11 + $0x50] ss:$8 sps:$4 sm:$0xff]  }
 0x3a7   : > { %5648 = vmatprep.subr.bf16.mxu0 %v8191_v7  ;;  %v8266_v7 = vld [vmem:[#allocation11 + $0x64] ss:$8 sps:$4 sm:$0xff]  }
 0x3a8   : > { %5793 = vmatpush1.bf16.msra.mxu1 %v8186_v57  ;;  %v8239_v57 = vld [vmem:[#allocation8 + $0x7ac] ss:$16 sps:$4 sm:$0xff]  }
 0x3a9   : > { %5794 = vmatprep.subr.bf16.mxu1 %v8194_v12  ;;  %v8237_v12 = vld [vmem:[#allocation8 + $0x7a8] ss:$16 sps:$4 sm:$0xff]  }
 0x3aa   : > { %5649 = vmatpush1.bf16.msra.mxu0 %v8189_v8  ;;  %v8264_v8 = vld [vmem:[#allocation11 + $0x60] ss:$8 sps:$4 sm:$0xff]  }
 0x3ab   : > { %5650 = vmatprep.subr.bf16.mxu0 %v8197_v11  ;;  %v8269_v11 = vld [vmem:[#allocation11 + $0x74] ss:$8 sps:$4 sm:$0xff]  }
 0x3ac   : > { %5795 = vmatpush1.bf16.msra.mxu1 %v8192_v10  ;;  %v8242_v10 = vld [vmem:[#allocation8 + $0x7cc] ss:$16 sps:$4 sm:$0xff]  }
 0x3ad   : > { %5796 = vmatprep.subr.bf16.mxu1 %v8200_v17  ;;  %v8240_v17 = vld [vmem:[#allocation8 + $0x7c8] ss:$16 sps:$4 sm:$0xff]  }
 0x3ae   : > { %5651 = vmatpush1.bf16.msra.mxu0 %v8195_v19  ;;  %v8267_v19 = vld [vmem:[#allocation11 + $0x70] ss:$8 sps:$4 sm:$0xff]  }
 0x3af   : > { %5652 = vmatprep.subr.bf16.mxu0 %v8203_v21  ;;  %v8272_v21 = vld [vmem:[#allocation11 + $0x84] ss:$8 sps:$4 sm:$0xff]  }
 0x3b0   : > { %5797 = vmatpush1.bf16.msra.mxu1 %v8198_v20  ;;  %v8245_v20 = vld [vmem:[#allocation8 + $0x7ec] ss:$16 sps:$4 sm:$0xff]  }
 0x3b1   : > { %5798 = vmatprep.subr.bf16.mxu1 %v8206_v23  ;;  %v8243_v23 = vld [vmem:[#allocation8 + $0x7e8] ss:$16 sps:$4 sm:$0xff]  }
 0x3b2   : > { %5653 = vmatpush1.bf16.msra.mxu0 %v8201_v24  ;;  %v8270_v24 = vld [vmem:[#allocation11 + $0x80] ss:$8 sps:$4 sm:$0xff]  }
 0x3b3   : > { %5654 = vmatprep.subr.bf16.mxu0 %v8209_v29  ;;  %v8276_v29 = vld [vmem:[#allocation11 + $0xa0] ss:$8 sps:$4 sm:$0xff]  }
 0x3b4   : > { %5799 = vmatpush1.bf16.msra.mxu1 %v8204_v27  ;;  %v8273_v27 = vld [vmem:[#allocation11 + $0x90] ss:$8 sps:$4 sm:$0xff]  }
 0x3b5   : > { %5800 = vmatprep.subr.bf16.mxu1 %v8212_v30  ;;  %v8281_v30 = vld [vmem:[#allocation11 + $0xb4] ss:$8 sps:$4 sm:$0xff]  }
 0x3b6   : > { %v3922_v39 = vpop.f32.mrb[8].mxu1  ;;  %5655 = vmatpush1.bf16.msra.mxu0 %v8207_v33  ;;  %v8284_v33 = vld [vmem:[#allocation11 + $0xc4] ss:$8 sps:$4 sm:$0xff]  }
 0x3b7   : > { %v7641_v40 = vadd.f32 %v3922_v39, %v995_v31  ;;  %v3924_v41 = vpop.f32.mrb[9].mxu1  ;;  %5656 = vmatprep.subr.bf16.mxu0 %v8215_v61  ;;  %v8279_v31 = vld [vmem:[#allocation11 + $0xb0] ss:$8 sps:$4 sm:$0xff]   ;;  %v8288_v39 = vld [vmem:[#allocation11 + $0xe0] ss:$8 sps:$4 sm:$0xff]  }
 0x3b8   : > { %v7642_v18 = vadd.f32 %v3924_v41, %v999_v35  ;;  %v3926_v43 = vpop.f32.mrb[10].mxu1  ;;  %5801 = vmatpush1.bf16.msra.mxu1 %v8210_v36  ;;  %v8282_v35 = vld [vmem:[#allocation11 + $0xc0] ss:$8 sps:$4 sm:$0xff]   ;;  %v8287_v36 = vld [vmem:[#allocation11 + $0xd4] ss:$8 sps:$4 sm:$0xff]  }
 0x3b9   : > { %v3935_v42 = vmax.f32 %v7641_v40, 0.0  ;;  %v3927_v51 = vpop.f32.mrb[11].mxu1  ;;  %5802 = vmatprep.subr.bf16.mxu1 %v8218_v37  ;;  %v8285_v61 = vld [vmem:[#allocation11 + $0xd0] ss:$8 sps:$4 sm:$0xff]   ;;  %v8290_v37 = vld [vmem:[#allocation11 + $0xe4] ss:$8 sps:$4 sm:$0xff]  }
 0x3ba   : > { %v3936_v52 = vmax.f32 %v7642_v18, 0.0  ;;  %5657 = vmatpush1.bf16.msra.mxu0 %v8213_v14  ;;  %v8293_v40 = vld [vmem:[#allocation11 + $0xf4] ss:$8 sps:$4 sm:$0xff]   ;;  %v8291_v41 = vld [vmem:[#allocation11 + $0xf0] ss:$8 sps:$4 sm:$0xff]   ;;  %v8342_v18 = vld [vmem:[#allocation14 + $0x40] sm:$0xff]  }
 0x3bb   : > { %6235 = vmatprep.subr.bf16.mxu0 %v8248_v49  ;;  %v9198_v44 = vpack.c.bf16 %v3935_v42, %v3935_v42  ;;  %v8296_v14 = vld [vmem:[#allocation11 + $0x104] ss:$8 sps:$4 sm:$0xff]   ;;  %v8346_v42 = vld [vmem:[#allocation14 + $0x50] sm:$0xff]  }
 0x3bc   : > { %v3944_v53 = vpack.c.bf16 %v3936_v52, %v3936_v52  ;;  %5803 = vmatpush1.bf16.msra.mxu1 %v8216_v48  ;;  %v8343_v43 = vld [vmem:[#allocation14] sm:$0xff]   ;;  %v8344_v48 = vld [vmem:[#allocation14 + $0x48] sm:$0xff]   ;;  %v8347_v51 = vld [vmem:[#allocation14 + $0x10] sm:$0xff]  }
 0x3bd   : > { %5804 = vmatprep.subr.bf16.mxu1 %v8221_v6  ;;  %v8345_v49 = vld [vmem:[#allocation14 + $0x8] sm:$0xff]   ;;  %v8348_v6 = vld [vmem:[#allocation14 + $0x58] sm:$0xff]  }
 0x3be   : > { %5658 = vmatprep.mubr.bf16.mxu0 %v3944_v53  ;;  %5822 = vmatprep.mubr.bf16.mxu1 %v3944_v53  ;;  %v8349_v52 = vld [vmem:[#allocation14 + $0x18] sm:$0xff]   ;;  %v8350_v53 = vld [vmem:[#allocation14 + $0x60] sm:$0xff]  }
 0x3bf   : > { %5659 = vmatmul.mubr.bf16.vlgmr.msra.gmra.mrb[8].mxu0 %v9198_v44 }
 0x3c0   : > { %5805 = vmatpush1.bf16.msra.mxu1 %v8219_v54  ;;  %6236 = vmatpush1.bf16.msra.mxu0 %v8246_v22  ;;  %v8351_v54 = vld [vmem:[#allocation14 + $0x20] sm:$0xff]   ;;  %v8352_v22 = vld [vmem:[#allocation14 + $0x68] sm:$0xff]  }
 0x3c1   : > { %5806 = vmatprep.subr.bf16.mxu1 %v8224_v15  ;;  %6237 = vmatprep.subr.bf16.mxu0 %v8251_v55  ;;  %v9202_v15 = vld [vmem:[#allocation10] sm:$0xf] }
 0x3c2   : > { %v4206_v55 = vrot.slane %v9202_v15, %v9137_v9 }
 0x3c4   : > { %5807 = vmatpush1.bf16.msra.mxu1 %v8222_v56  ;;  %6238 = vmatpush1.bf16.msra.mxu0 %v8249_v58  ;;  %v4210_v56 = vrot.slane %v9202_v15, %v9142_v16 }
 0x3c5   : > { %5808 = vmatprep.subr.bf16.mxu1 %v8227_v25  ;;  %6239 = vmatprep.subr.bf16.mxu0 %v8254_v46 }
 0x3c8   : > { %5809 = vmatpush1.bf16.msra.mxu1 %v8225_v59  ;;  %6240 = vmatpush1.bf16.msra.mxu0 %v8252_v60 }
 0x3c9   : > { %5810 = vmatprep.subr.bf16.mxu1 %v8230_v32  ;;  %6241 = vmatprep.subr.bf16.mxu0 %v8257_v62 }
 0x3cc   : > { %5811 = vmatpush1.bf16.msra.mxu1 %v8228_v63  ;;  %6242 = vmatpush1.bf16.msra.mxu0 %v8255_v47 }
 0x3cd   : > { %5812 = vmatprep.subr.bf16.mxu1 %v8233_v0  ;;  %6243 = vmatprep.subr.bf16.mxu0 %v8260_v2  ;;  %v8294_v0 = vld [vmem:[#allocation11 + $0x100] ss:$8 sps:$4 sm:$0xff]  }
 0x3d0   : > { %5813 = vmatpush1.bf16.msra.mxu1 %v8231_v4  ;;  %6244 = vmatpush1.bf16.msra.mxu0 %v8258_v45  ;;  %v8299_v4 = vld [vmem:[#allocation11 + $0x114] ss:$8 sps:$4 sm:$0xff]   ;;  %v8297_v45 = vld [vmem:[#allocation11 + $0x110] ss:$8 sps:$4 sm:$0xff]  }
 0x3d1   : > { %5814 = vmatprep.subr.bf16.mxu1 %v8236_v5  ;;  %6245 = vmatprep.subr.bf16.mxu0 %v8263_v34  ;;  %v8302_v5 = vld [vmem:[#allocation11 + $0x124] ss:$8 sps:$4 sm:$0xff]   ;;  %v8300_v34 = vld [vmem:[#allocation11 + $0x120] ss:$8 sps:$4 sm:$0xff]  }
 0x3d4   : > { %5815 = vmatpush1.bf16.msra.mxu1 %v8234_v50  ;;  %6246 = vmatpush1.bf16.msra.mxu0 %v8261_v1  ;;  %v8305_v50 = vld [vmem:[#allocation11 + $0x134] ss:$8 sps:$4 sm:$0xff]   ;;  %v8303_v1 = vld [vmem:[#allocation11 + $0x130] ss:$8 sps:$4 sm:$0xff]  }
 0x3d5   : > { %5816 = vmatprep.subr.bf16.mxu1 %v8239_v57  ;;  %6247 = vmatprep.subr.bf16.mxu0 %v8266_v7  ;;  %v8308_v57 = vld [vmem:[#allocation11 + $0x144] ss:$8 sps:$4 sm:$0xff]   ;;  %v8306_v7 = vld [vmem:[#allocation11 + $0x140] ss:$8 sps:$4 sm:$0xff]  }
 0x3d8   : > { %5817 = vmatpush1.bf16.msra.mxu1 %v8237_v12  ;;  %6248 = vmatpush1.bf16.msra.mxu0 %v8264_v8  ;;  %v8311_v12 = vld [vmem:[#allocation11 + $0x154] ss:$8 sps:$4 sm:$0xff]   ;;  %v8309_v8 = vld [vmem:[#allocation11 + $0x150] ss:$8 sps:$4 sm:$0xff]  }
 0x3d9   : > { %5818 = vmatprep.subr.bf16.mxu1 %v8242_v10  ;;  %6249 = vmatprep.subr.bf16.mxu0 %v8269_v11  ;;  %v8314_v10 = vld [vmem:[#allocation11 + $0x164] ss:$8 sps:$4 sm:$0xff]   ;;  %v8312_v11 = vld [vmem:[#allocation11 + $0x160] ss:$8 sps:$4 sm:$0xff]  }
 0x3dc   : > { %5819 = vmatpush1.bf16.msra.mxu1 %v8240_v17  ;;  %6250 = vmatpush1.bf16.msra.mxu0 %v8267_v19  ;;  %v8317_v17 = vld [vmem:[#allocation11 + $0x174] ss:$8 sps:$4 sm:$0xff]   ;;  %v8315_v19 = vld [vmem:[#allocation11 + $0x170] ss:$8 sps:$4 sm:$0xff]  }
 0x3dd   : > { %5820 = vmatprep.subr.bf16.mxu1 %v8245_v20  ;;  %6251 = vmatprep.subr.bf16.mxu0 %v8272_v21  ;;  %v4218_v20 = vrot.slane %v9202_v15, %v982_v13  ;;  %v8320_v21 = vld [vmem:[#allocation11 + $0x184] ss:$8 sps:$4 sm:$0xff]   ;;  %v8324_v13 = vld [vmem:[#allocation11 + $0x1a0] ss:$8 sps:$4 sm:$0xff]  }
 0x3e0   : > { %5821 = vmatpush1.bf16.msra.mxu1 %v8243_v23  ;;  %6252 = vmatpush1.bf16.msra.mxu0 %v8270_v24 }
 0x3e1   : > { %6253 = vmatprep.subr.bf16.mxu0 %v8275_v26  ;;  %7582 = vmatprep.subr.bf16.mxu1 %v8342_v18  ;;  %v4214_v18 = vrot.slane %v9202_v15, %v978_v38  ;;  %v8357_v38 = vld [vmem:[#allocation14 + $0x38] sm:$0xff]  }
 0x3e3   : > { %5823 = vmatmul.mubr.bf16.vlgmr.msra.gmra.mrb[12].mxu1 %v9198_v44  ;;  %v8353_v44 = vld [vmem:[#allocation14 + $0x28] sm:$0xff]  }
 0x3e4   : > { %6254 = vmatpush1.bf16.msra.mxu0 %v8273_v27  ;;  %7583 = vmatpush3.bf16.msra.mxu1 %v8343_v43  ;;  %v8338_v43 = vld [vmem:[#allocation11 + $0x1e4] ss:$8 sps:$4 sm:$0xff]  }
 0x3e5   : > { %6255 = vmatprep.subr.bf16.mxu0 %v8278_v28  ;;  %7584 = vmatprep.subr.bf16.mxu1 %v8344_v48  ;;  %v8318_v28 = vld [vmem:[#allocation11 + $0x180] ss:$8 sps:$4 sm:$0xff]  }
 0x3e6   : > { %v8336_v48 = vld [vmem:[#allocation11 + $0x1e0] ss:$8 sps:$4 sm:$0xff]  }
 0x3e8   : > { %6256 = vmatpush1.bf16.msra.mxu0 %v8276_v29  ;;  %7585 = vmatpush3.bf16.msra.mxu1 %v8345_v49 }
 0x3e9   : > { %6257 = vmatprep.subr.bf16.mxu0 %v8281_v30  ;;  %7586 = vmatprep.subr.bf16.mxu1 %v8346_v42  ;;  %v8323_v30 = vld [vmem:[#allocation11 + $0x194] ss:$8 sps:$4 sm:$0xff]  }
 0x3ea   : > { %v8341_v42 = vld [vmem:[#allocation11 + $0x1f4] ss:$8 sps:$4 sm:$0xff]  }
 0x3ec   : > { %6258 = vmatpush1.bf16.msra.mxu0 %v8279_v31  ;;  %7587 = vmatpush3.bf16.msra.mxu1 %v8347_v51  ;;  %v8339_v51 = vld [vmem:[#allocation11 + $0x1f0] ss:$8 sps:$4 sm:$0xff]  }
 0x3ed   : > { %6259 = vmatprep.subr.bf16.mxu0 %v8284_v33  ;;  %7588 = vmatprep.subr.bf16.mxu1 %v8348_v6 }
 0x3f0   : > { %6260 = vmatpush1.bf16.msra.mxu0 %v8282_v35  ;;  %7589 = vmatpush3.bf16.msra.mxu1 %v8349_v52  ;;  %v8321_v35 = vld [vmem:[#allocation11 + $0x190] ss:$8 sps:$4 sm:$0xff]  }
 0x3f1   : > { %6261 = vmatprep.subr.bf16.mxu0 %v8287_v36  ;;  %7590 = vmatprep.subr.bf16.mxu1 %v8350_v53  ;;  %v8326_v36 = vld [vmem:[#allocation11 + $0x1a4] ss:$8 sps:$4 sm:$0xff]   ;;  %v8354_v53 = vld [vmem:[#allocation14 + $0x70] sm:$0xff]  }
 0x3f4   : > { %6262 = vmatpush1.bf16.msra.mxu0 %v8285_v61  ;;  %7591 = vmatpush3.bf16.msra.mxu1 %v8351_v54  ;;  %v8329_v61 = vld [vmem:[#allocation11 + $0x1b4] ss:$8 sps:$4 sm:$0xff]  }
 0x3f5   : > { %6263 = vmatprep.subr.bf16.mxu0 %v8290_v37  ;;  %7592 = vmatprep.subr.bf16.mxu1 %v8352_v22  ;;  %v8327_v37 = vld [vmem:[#allocation11 + $0x1b0] ss:$8 sps:$4 sm:$0xff]   ;;  %v8697_v22 = vmov 0.0  }
 0x3f6   : > { %v8355_v54 = vld [vmem:[#allocation14 + $0x30] sm:$0xff]  }
 0x3f8   : > { %6264 = vmatpush1.bf16.msra.mxu0 %v8288_v39  ;;  %7593 = vmatpush3.bf16.msra.mxu1 %v8353_v44  ;;  %v8332_v39 = vld [vmem:[#allocation11 + $0x1c4] ss:$8 sps:$4 sm:$0xff]   ;;  %v5903_v44 = vld [vmem:[#allocation13] sm:$0x3] }
 0x3f9   : > { %6265 = vmatprep.subr.bf16.mxu0 %v8293_v40  ;;  %v8330_v40 = vld [vmem:[#allocation11 + $0x1c0] ss:$8 sps:$4 sm:$0xff]   ;;  %7594 = vmatprep.subr.bf16.mxu1 %v8354_v53  ;;  %v5908_v15 = vrot.slane %v5903_v44, %v9137_v9 }
 0x3fa   : > { %v8359_v9 = vld [vmem:[%s9290_s18 + $0x8] sm:$0xff]  }
 0x3fc   : > { %6266 = vmatpush1.bf16.msra.mxu0 %v8291_v41  ;;  %v8335_v41 = vld [vmem:[#allocation11 + $0x1d4] ss:$8 sps:$4 sm:$0xff]   ;;  %7595 = vmatpush3.bf16.msra.mxu1 %v8355_v54 }
 0x3fd   : > { %6276 = vmatprep.subr.bf16.mxu0 %v8296_v14  ;;  %v8333_v14 = vld [vmem:[#allocation11 + $0x1d0] ss:$8 sps:$4 sm:$0xff]   ;;  %7596 = vmatprep.subr.bf16.mxu1 %v8356_v3 }
 0x400   : > { %7597 = vmatpush3.bf16.msra.mxu1 %v8357_v38 }
 0x401   : > { %7613 = vmatprep.subr.bf16.mxu1 %v8697_v22 }
 0x492   : > { %v5660_v58 = vpop.f32.mrb[8].mxu0 }
 0x493   : > { %v7643_v25 = vadd.f32 %v5660_v58, %v4206_v55  ;;  %v5662_v46 = vpop.f32.mrb[9].mxu0  ;;  %v5912_v55 = vrot.slane %v5903_v44, %v9142_v16  ;;  %v8360_v16 = vld [vmem:[%s9290_s18 + $0x10] sm:$0xff]  }
 0x494   : > { %v7644_v59 = vadd.f32 %v5662_v46, %v4210_v56  ;;  %v5664_v60 = vpop.f32.mrb[10].mxu0 }
 0x495   : > { %v5831_v32 = vmax.f32 %v7643_v25, 0.0  ;;  %v5665_v62 = vpop.f32.mrb[11].mxu0 }
 0x496   : > { %v5832_v63 = vmax.f32 %v7644_v59, 0.0 }
 0x497   : > { %v5835_v2 = vpack.c.bf16 %v5831_v32, %v5831_v32 }
 0x498   : > { %v5836_v47 = vpack.c.bf16 %v5832_v63, %v5832_v63 }
 0x49a   : > { %6267 = vmatprep.mubr.bf16.mxu0 %v5836_v47  ;;  %v8358_v47 = vld [vmem:[%s9290_s18] sm:$0xff]  }
 0x49b   : > { %6268 = vmatmul.mubr.bf16.vlgmr.msra.gmra.mrb[12].mxu0 %v5835_v2  ;;  %v8361_v2 = vld [vmem:[%s9290_s18 + $0x18] sm:$0xff]  }
 0x49c   : > { %6277 = vmatpush1.bf16.msra.mxu0 %v8294_v0 }
 0x49d   : > { %6278 = vmatprep.subr.bf16.mxu0 %v8299_v4  ;;  %v8362_v4 = vld [vmem:[%s9290_s18 + $0x20] sm:$0xff]  }
 0x4a0   : > { %6279 = vmatpush1.bf16.msra.mxu0 %v8297_v45  ;;  %v8363_v45 = vld [vmem:[%s9290_s18 + $0x28] sm:$0xff]  }
 0x4a1   : > { %6280 = vmatprep.subr.bf16.mxu0 %v8302_v5  ;;  %v8364_v5 = vld [vmem:[%s9290_s18 + $0x30] sm:$0xff]  }
 0x4a4   : > { %6281 = vmatpush1.bf16.msra.mxu0 %v8300_v34  ;;  %v8365_v34 = vld [vmem:[%s9290_s18 + $0x38] sm:$0xff]  }
 0x4a5   : > { %6282 = vmatprep.subr.bf16.mxu0 %v8305_v50 }
 0x4a8   : > { %6283 = vmatpush1.bf16.msra.mxu0 %v8303_v1  ;;  %v7554_v1 = vld [vmem:[#allocation16] ss:$0 sm:$0xff] }
 0x4a9   : > { %6284 = vmatprep.subr.bf16.mxu0 %v8308_v57 }
 0x4ac   : > { %6285 = vmatpush1.bf16.msra.mxu0 %v8306_v7 }
 0x4ad   : > { %6286 = vmatprep.subr.bf16.mxu0 %v8311_v12 }
 0x4b0   : > { %6287 = vmatpush1.bf16.msra.mxu0 %v8309_v8 }
 0x4b1   : > { %6288 = vmatprep.subr.bf16.mxu0 %v8314_v10 }
 0x4b4   : > { %6289 = vmatpush1.bf16.msra.mxu0 %v8312_v11 }
 0x4b5   : > { %6290 = vmatprep.subr.bf16.mxu0 %v8317_v17 }
 0x4b6   : > { %v5824_v23 = vpop.f32.mrb[12].mxu1 }
 0x4b7   : > { %v5826_v24 = vpop.f32.mrb[13].mxu1  ;;  %v7645_v49 = vadd.f32 %v5824_v23, %v4214_v18 }
 0x4b8   : > { %v7646_v26 = vadd.f32 %v5826_v24, %v4218_v20  ;;  %6291 = vmatpush1.bf16.msra.mxu0 %v8315_v19  ;;  %v5828_v27 = vpop.f32.mrb[14].mxu1  ;;  %v7571_v19 = vld [vmem:[#allocation2] ss:$0 sm:$0xff] }
 0x4b9   : > { %v5829_v29 = vpop.f32.mrb[15].mxu1  ;;  %6292 = vmatprep.subr.bf16.mxu0 %v8320_v21  ;;  %v5833_v6 = vmax.f32 %v7645_v49, 0.0 }
 0x4ba   : > { %v5834_v31 = vmax.f32 %v7646_v26, 0.0 }
 0x4bb   : > { %v5837_v52 = vpack.c.bf16 %v5833_v6, %v5833_v6 }
 0x4bc   : > { %v5838_v33 = vpack.c.bf16 %v5834_v31, %v5834_v31  ;;  %6293 = vmatpush1.bf16.msra.mxu0 %v8318_v28 }
 0x4bd   : > { %6294 = vmatprep.subr.bf16.mxu0 %v8323_v30 }
 0x4be   : > { %6308 = vmatprep.mubr.bf16.mxu0 %v5838_v33 }
 0x4c0   : > { %6295 = vmatpush1.bf16.msra.mxu0 %v8321_v35 }
 0x4c1   : > { %6296 = vmatprep.subr.bf16.mxu0 %v8326_v36 }
 0x4c4   : > { %6297 = vmatpush1.bf16.msra.mxu0 %v8324_v13 }
 0x4c5   : > { %6298 = vmatprep.subr.bf16.mxu0 %v8329_v61 }
 0x4c8   : > { %6299 = vmatpush1.bf16.msra.mxu0 %v8327_v37 }
 0x4c9   : > { %6300 = vmatprep.subr.bf16.mxu0 %v8332_v39 }
 0x4cc   : > { %6301 = vmatpush1.bf16.msra.mxu0 %v8330_v40 }
 0x4cd   : > { %6302 = vmatprep.subr.bf16.mxu0 %v8335_v41 }
 0x4d0   : > { %6303 = vmatpush1.bf16.msra.mxu0 %v8333_v14 }
 0x4d1   : > { %6304 = vmatprep.subr.bf16.mxu0 %v8338_v43 }
 0x4d4   : > { %6305 = vmatpush1.bf16.msra.mxu0 %v8336_v48 }
 0x4d5   : > { %6306 = vmatprep.subr.bf16.mxu0 %v8341_v42 }
 0x4d8   : > { %6307 = vmatpush1.bf16.msra.mxu0 %v8339_v51 }
 0x4db   : > { %6309 = vmatmul.mubr.bf16.vlgmr.msra.gmra.mrb[12].mxu0 %v5837_v52 }
 0x5ae   : > { %v6310_v56 = vpop.f32.mrb[12].mxu0 }
 0x5af   : > { %v7647_v58 = vadd.f32 %v6310_v56, %v5908_v15  ;;  %v6312_v25 = vpop.f32.mrb[13].mxu0 }
 0x5b0   : > { %v7648_v46 = vadd.f32 %v6312_v25, %v5912_v55  ;;  %v6314_v59 = vpop.f32.mrb[14].mxu0 }
 0x5b1   : > { %v6317_v60 = vmax.f32 %v7647_v58, 0.0  ;;  %v6315_v32 = vpop.f32.mrb[15].mxu0 }
 0x5b2   : > { %v6318_v62 = vmax.f32 %v7648_v46, 0.0 }
 0x5b3   : > { %v6319_v0 = vpack.c.bf16 %v6317_v60, %v6317_v60 }
 0x5b4   : > { %v6320_v63 = vpack.c.bf16 %v6318_v62, %v6318_v62 }
 0x5b6   : > { %6488 = vmatprep.mubr.bf16.mxu1 %v6320_v63 }
 0x5b7   : > { %6489 = vmatmul.mubr.bf16.vlgmr.msra.gmra.mrb[16].mxu1 %v6319_v0 }
 0x5b8   : > { %7614 = vmatpush3.bf16.msra.mxu1 %v8358_v47  ;;  %7629 = vmatprep.mubr.msk.bf16.mxu1 %vm8698_vm0, %v8697_v22 }
 0x5b9   : > { %7615 = vmatprep.subr.bf16.mxu1 %v8697_v22 }
 0x5bc   : > { %7616 = vmatpush3.bf16.msra.mxu1 %v8359_v9 }
 0x5bd   : > { %7617 = vmatprep.subr.bf16.mxu1 %v8697_v22 }
 0x5c0   : > { %7618 = vmatpush3.bf16.msra.mxu1 %v8360_v16 }
 0x5c1   : > { %7619 = vmatprep.subr.bf16.mxu1 %v8697_v22 }
 0x5c4   : > { %7620 = vmatpush3.bf16.msra.mxu1 %v8361_v2 }
 0x5c5   : > { %7621 = vmatprep.subr.bf16.mxu1 %v8697_v22 }
 0x5c8   : > { %7622 = vmatpush3.bf16.msra.mxu1 %v8362_v4 }
 0x5c9   : > { %7623 = vmatprep.subr.bf16.mxu1 %v8697_v22 }
 0x5cc   : > { %7624 = vmatpush3.bf16.msra.mxu1 %v8363_v45 }
 0x5cd   : > { %7625 = vmatprep.subr.bf16.mxu1 %v8697_v22 }
 0x5d0   : > { %7626 = vmatpush3.bf16.msra.mxu1 %v8364_v5 }
 0x5d1   : > { %7627 = vmatprep.subr.bf16.mxu1 %v8697_v22 }
 0x5d4   : > { %7628 = vmatpush3.bf16.msra.mxu1 %v8365_v34 }
 0x68a   : > { %v7598_v50 = vpop.f32.mrb[16].mxu1 }
 0x68b   : > { %v7599_v57 = vpop.f32.mrb[17].mxu1 }
 0x68c   : > { %v7600_v7 = vadd.f32 %v7599_v57, %v7598_v50  ;;  %v7601_v12 = vpop.f32.mrb[18].mxu1 }
 0x68d   : > { %v7602_v8 = vpop.f32.mrb[19].mxu1 }
 0x68e   : > { %v6491_v10 = vadd.f32 %v7600_v7, %v7554_v1 }
 0x690   : > { %v6496_v11 = vmax.f32 %v6491_v10, 0.0 }
 0x692   : > { %v6497_v17 = vpack.c.bf16 %v6496_v11, %v6496_v11 }
 0x694   : > { %7630 = vmatmul.mubr.bf16.vlgmr.msra.gmra.mrb[20].mxu1 %v6497_v17 }
 0x767   : > { %v6603_v20 = vpop.f32.mrb[20].mxu1 }
 0x768   : > { %v6604_v21 = vadd.f32 %v7571_v19, %v6603_v20  ;;  %v7631_v23 = vpop.f32.mrb[21].mxu1 }
 0x769   : > { %v6606_v24 = vpop.f32.mrb[22].mxu1 }
 0x76a   : > { %v6609_v26 = vsub.f32 0.0, %v6604_v21  ;;  %v7632_v27 = vpop.f32.mrb[23].mxu1 }
 0x76c   : > { %v6610_v28 = vmul.f32 1.442695, %v6609_v26 }
 0x76e   : > { %8366 = vpow2.f32 %v6610_v28 }
 0x778   : > { %v8367_v29 = vpop.eup %8366 }
 0x779   : > { %v6612_v30 = vadd.f32 1.0, %v8367_v29 }
 0x77b   : > { %8368 = vrcp.f32 %v6612_v30 }
 0x785   : > { %v8369_v31 = vpop.eup %8368 }
 0x786   : > { %6615 = vst.msk [vmem:[%s512_s22] sm:$0xff] %vm6614_vm1, %v8369_v31 }
 0x787 PF: > { %p27_p8 = scmp.ge.s32.totalorder %s8983_s17, 4   ;;  %s9292_s19 = smov %s8669_s20 }
 0x788   : > { %s9293_s20 = smov %s8673_s21  ;;  %s9294_s21 = smov %s8995_s13 }
 0x789   : > { %s9295_s22 = smov %s8983_s17  ;;  %29 = sbr.rel (!%p27_p8) target bundleno = 10 (0xa), region = 136 }
 0x790   :  { %6635 = vsyncpa [#allocation4], 1 }
 0x791   :  { %6637 = vsyncpa [#allocation4 + $0x1], 1 }
 0x792   :  { %6638 = vsyncpa [#allocation6], 1 }
 0x793   :  { %6639 = vsyncpa [#allocation9], 1 }
 0x794   :  { %6640 = vsyncpa [#allocation12], 1 }
 0x795   :  { %6641 = vsyncpa [#allocation15], 1 }

</bundles_post_ra>
